<compile_context>
chip_gen: v7x
topology: tpu7x:2x2x1
jax: 0.10.0
libtpu: 0.0.40
codegen_flags: <defaults>
</compile_context>

<pallas_src>
import functools
import numpy as np
import jax
import jax.numpy as jnp
from jax.experimental import pallas as pl
from jax.experimental.pallas import tpu as pltpu


# ----------------------------------------------------------------------------
# fused kernel: one column block (kpb ConvT output pixels) per grid step
# ----------------------------------------------------------------------------
def _transformer_kernel(prob_ref, w1_ref, b1_ref, wct_ref, bns_ref, bnt_ref,
                        wc_ref, out_ref, *, nc: int, kpb: int, batch: int):
    # transform_1d: Linear(nz -> nc) + ReLU.  Recomputed per step (trivial
    # FLOPs) so every grid step is independent -> safe under "parallel".
    h = jnp.dot(prob_ref[...], w1_ref[...],
                preferred_element_type=jnp.float32)              # (B, nc) f32
    h = jnp.maximum(h + b1_ref[...], 0.0)

    # transform_2d[0]: ConvTranspose2d(nc, nc, 3, stride=1, pad=0, bias=False)
    # on a 1x1 spatial input == one matmul; this step produces kpb pixels.
    y = jnp.dot(h.astype(wct_ref.dtype), wct_ref[...],
                preferred_element_type=jnp.float32)              # (B, kpb*nc)

    # Densify to (B*kpb, nc): columns within the block are (dx, cout), so a
    # straight reshape gives rows ordered (b, dx) with channels on lanes.
    y = y.reshape(batch * kpb, nc)

    # transform_2d[1:3]: eval-mode BatchNorm2d folded affine (per-channel,
    # (1, nc)) + ReLU, all in f32.
    y = jnp.maximum(y * bns_ref[...] + bnt_ref[...], 0.0)

    # transform_2d[3]: Conv2d(nc, nc, 1, bias=False) = ONE matmul with the
    # shared (nc, nc) weight for all pixels/rows of this block.
    o = jnp.dot(y.astype(wc_ref.dtype), wc_ref[...],
                preferred_element_type=jnp.float32)              # (B*kpb, nc)
    out_ref[0, :, :] = o.astype(out_ref.dtype)


def transformer_forward(params, prob):
    """prob: (B, nz) f32 -> (B, nc, k, k) f32 (NCHW, matching the reference)."""
    B, nz = prob.shape
    nc, k = params["nc"], params["k"]
    kpb = k                        # pixels (ConvT taps) handled per grid step
    n_blocks = (k * k) // kpb      # = k = 3 column blocks of wct

    cost = pl.CostEstimate(
        flops=(2 * B * nc * (k * k * nc)          # ConvTranspose matmul
               + 2 * (B * k * k) * nc * nc        # 1x1 conv matmul
               + n_blocks * 2 * B * nz * nc),     # recomputed Linear
        transcendentals=0,
        bytes_accessed=((nc * k * k * nc + nc * nc + nz * nc) * 2   # bf16 weights
                        + (3 * nc + B * nz) * 4                     # f32 vectors
                        + B * k * k * nc * 4))                      # f32 output

    out = pl.pallas_call(
        functools.partial(_transformer_kernel, nc=nc, kpb=kpb, batch=B),
        out_shape=jax.ShapeDtypeStruct((n_blocks, B * kpb, nc), jnp.float32),
        grid_spec=pltpu.PrefetchScalarGridSpec(
            num_scalar_prefetch=0,
            grid=(n_blocks,),
            in_specs=[
                pl.BlockSpec((B, nz), lambda j: (0, 0)),          # prob (bf16)
                pl.BlockSpec((nz, nc), lambda j: (0, 0)),         # w1   (bf16)
                pl.BlockSpec((1, nc), lambda j: (0, 0)),          # b1   (f32)
                pl.BlockSpec((nc, kpb * nc), lambda j: (0, j)),   # wct block
                pl.BlockSpec((1, nc), lambda j: (0, 0)),          # bn_s (f32)
                pl.BlockSpec((1, nc), lambda j: (0, 0)),          # bn_t (f32)
                pl.BlockSpec((nc, nc), lambda j: (0, 0)),         # wc   (bf16)
            ],
            out_specs=pl.BlockSpec((1, B * kpb, nc), lambda j: (j, 0, 0)),
        ),
        compiler_params=pltpu.CompilerParams(
            dimension_semantics=("parallel",)),
        cost_estimate=cost,
    )(prob.astype(jnp.bfloat16), params["w1"], params["b1"], params["wct"],
      params["bn_s"], params["bn_t"], params["wc"])

    # (n_blocks, B*kpb, nc) rows are (dy, b, dx, c) -> NCHW, tiny wrapper glue.
    return out.reshape(k, B, k, nc).transpose(1, 3, 0, 2)


# ----------------------------------------------------------------------------
# deterministic parameter init (weights pre-flattened for x @ W layout)
# ----------------------------------------------------------------------------
def init_transformer(key, nz=7, nc=512, k=3, eps=1e-5):
    k1, k2, k3, k4 = jax.random.split(key, 4)

    # Linear(nz, nc): torch weight (nc, nz), bias (nc,)
    w1 = jax.random.normal(k1, (nc, nz), jnp.float32) / np.sqrt(nz)
    b1 = jax.random.normal(k2, (nc,), jnp.float32) * 0.01

    # ConvTranspose2d(nc, nc, k, bias=False): torch weight (cin, cout, kh, kw).
    # Flatten to (cin, kh*kw*cout), columns ordered (dy, dx, cout) so each
    # kpb-pixel column block reshapes directly to (B*kpb, nc).
    wct = jax.random.normal(k3, (nc, nc, k, k), jnp.float32) / np.sqrt(nc * k * k)
    wct_flat = jnp.transpose(wct, (0, 2, 3, 1)).reshape(nc, k * k * nc)

    # TODO(synk): BatchNorm2d is folded as an eval-mode affine with default
    # running stats (mean=0, var=1, gamma=1, beta=0); train-mode batch
    # statistics are not modeled.
    gamma = jnp.ones((nc,), jnp.float32)
    beta = jnp.zeros((nc,), jnp.float32)
    mean = jnp.zeros((nc,), jnp.float32)
    var = jnp.ones((nc,), jnp.float32)
    s = gamma / jnp.sqrt(var + eps)
    t = beta - mean * s

    # Conv2d(nc, nc, 1, bias=False): torch weight (cout, cin, 1, 1) -> (cin, cout)
    wc = jax.random.normal(k4, (nc, nc, 1, 1), jnp.float32) / np.sqrt(nc)
    wc_flat = jnp.transpose(wc[:, :, 0, 0], (1, 0))

    return dict(
        nc=nc, k=k,
        w1=jnp.transpose(w1, (1, 0)).astype(jnp.bfloat16),   # (nz, nc)  bf16
        b1=b1.reshape(1, nc),                                 # (1, nc)   f32
        wct=wct_flat.astype(jnp.bfloat16),                    # (nc, 9nc) bf16
        bn_s=s.reshape(1, nc), bn_t=t.reshape(1, nc),         # (1, nc)   f32
        wc=wc_flat.astype(jnp.bfloat16),                      # (nc, nc)  bf16
    )


# pure-JAX reference using the same (bf16-cast) weights, all-f32 math
def transformer_reference(params, prob):
    nc, k = params["nc"], params["k"]
    B = prob.shape[0]
    h = jnp.maximum(prob @ params["w1"].astype(jnp.float32) + params["b1"], 0.0)
    y = h @ params["wct"].astype(jnp.float32)                 # (B, 9*nc)
    y = y.reshape(B, k * k, nc)
    y = jnp.maximum(y * params["bn_s"] + params["bn_t"], 0.0)
    out = jnp.einsum("bpc,cd->bpd", y, params["wc"].astype(jnp.float32))
    return out.reshape(B, k, k, nc).transpose(0, 3, 1, 2)


# ----------------------------------------------------------------------------
if __name__ == "__main__":
    key = jax.random.PRNGKey(0)
    k_param, k_prob = jax.random.split(key)

    # The reference module hard-codes 512 channels in its ConvTranspose2d, so
    # nc=512 is the only self-consistent setting; batch kept small (2).
    B, NZ, NC, K = 2, 7, 512, 3

    params = init_transformer(k_param, nz=NZ, nc=NC, k=K)
    prob = jax.nn.softmax(jax.random.normal(k_prob, (B, NZ), jnp.float32), axis=-1)

    fwd = jax.jit(lambda p: transformer_forward(params, p))
    out = fwd(prob)
    jax.block_until_ready(out)

    assert out.shape == (B, NC, K, K), out.shape
    assert bool(jnp.isfinite(out).all())

    ref = transformer_reference(params, prob)
    # bf16 MXU operands / bf16-rounded intermediates vs an all-f32 reference;
    # coarse global-max-normalized tolerance.
    rel_err = float(jnp.max(jnp.abs(out - ref)) / (jnp.max(jnp.abs(ref)) + 1e-6))
    assert rel_err < 5e-2, rel_err

    print("KERNEL_OK")
</pallas_src>

<mosaic_0001>
module attributes {stable_mosaic.version = 11 : i64} {
  func.func @_transformer_kernel(%arg0: i32, %arg1: memref<2x7xbf16, #tpu.memory_space<vmem>>, %arg2: memref<7x512xbf16, #tpu.memory_space<vmem>>, %arg3: memref<1x512xf32, #tpu.memory_space<vmem>>, %arg4: memref<512x1536xbf16, #tpu.memory_space<vmem>>, %arg5: memref<1x512xf32, #tpu.memory_space<vmem>>, %arg6: memref<1x512xf32, #tpu.memory_space<vmem>>, %arg7: memref<512x512xbf16, #tpu.memory_space<vmem>>, %arg8: memref<1x6x512xf32, #tpu.memory_space<vmem>>) attributes {dimension_semantics = [#tpu.dimension_semantics<parallel>], iteration_bounds = array<i64: 3>, scalar_prefetch = 0 : i64, scratch_operands = 0 : i64, tpu.core_type = #tpu.core_type<tc>, window_params = [{pipeline_mode = #tpu.pipeline_mode<synchronous>, transform_indices = @transform_0, window_bounds = array<i64: 2, 7>}, {pipeline_mode = #tpu.pipeline_mode<synchronous>, transform_indices = @transform_1, window_bounds = array<i64: 7, 512>}, {pipeline_mode = #tpu.pipeline_mode<synchronous>, transform_indices = @transform_2, window_bounds = array<i64: 1, 512>}, {transform_indices = @transform_3, window_bounds = array<i64: 512, 1536>}, {pipeline_mode = #tpu.pipeline_mode<synchronous>, transform_indices = @transform_4, window_bounds = array<i64: 1, 512>}, {pipeline_mode = #tpu.pipeline_mode<synchronous>, transform_indices = @transform_5, window_bounds = array<i64: 1, 512>}, {pipeline_mode = #tpu.pipeline_mode<synchronous>, transform_indices = @transform_6, window_bounds = array<i64: 512, 512>}, {transform_indices = @transform_7, window_bounds = array<i64: 1, 6, 512>}]} {
    %c0 = arith.constant 0 : index
    %c0_0 = arith.constant 0 : index
    %0 = vector.load %arg1[%c0, %c0_0] : memref<2x7xbf16, #tpu.memory_space<vmem>>, vector<2x7xbf16>
    %c0_1 = arith.constant 0 : index
    %c0_2 = arith.constant 0 : index
    %1 = vector.load %arg2[%c0_1, %c0_2] : memref<7x512xbf16, #tpu.memory_space<vmem>>, vector<7x512xbf16>
    %cst = arith.constant dense<0.000000e+00> : vector<2x512xf32>
    %2 = tpu.matmul %0, %1, %cst {dimension_numbers = #tpu.dot_dimension_numbers<[1], [0], [0], [1], [0, 0, 1, 1], [], []>} : vector<2x7xbf16>, vector<7x512xbf16>, vector<2x512xf32> -> vector<2x512xf32>
    %c0_3 = arith.constant 0 : index
    %c0_4 = arith.constant 0 : index
    %3 = vector.load %arg3[%c0_3, %c0_4] : memref<1x512xf32, #tpu.memory_space<vmem>>, vector<1x512xf32>
    %4 = vector.broadcast %3 : vector<1x512xf32> to vector<2x512xf32>
    %5 = arith.addf %2, %4 : vector<2x512xf32>
    %cst_5 = arith.constant 0.000000e+00 : f32
    %6 = vector.broadcast %cst_5 : f32 to vector<2x512xf32>
    %7 = arith.maximumf %5, %6 : vector<2x512xf32>
    %8 = arith.truncf %7 : vector<2x512xf32> to vector<2x512xbf16>
    %c0_6 = arith.constant 0 : index
    %c0_7 = arith.constant 0 : index
    %9 = vector.load %arg4[%c0_6, %c0_7] : memref<512x1536xbf16, #tpu.memory_space<vmem>>, vector<512x1536xbf16>
    %cst_8 = arith.constant dense<0.000000e+00> : vector<2x1536xf32>
    %10 = tpu.matmul %8, %9, %cst_8 {dimension_numbers = #tpu.dot_dimension_numbers<[1], [0], [0], [1], [0, 0, 1, 1], [], []>} : vector<2x512xbf16>, vector<512x1536xbf16>, vector<2x1536xf32> -> vector<2x1536xf32>
    %11 = vector.shape_cast %10 : vector<2x1536xf32> to vector<6x512xf32>
    %c0_9 = arith.constant 0 : index
    %c0_10 = arith.constant 0 : index
    %12 = vector.load %arg5[%c0_9, %c0_10] : memref<1x512xf32, #tpu.memory_space<vmem>>, vector<1x512xf32>
    %13 = vector.broadcast %12 : vector<1x512xf32> to vector<6x512xf32>
    %14 = arith.mulf %11, %13 : vector<6x512xf32>
    %c0_11 = arith.constant 0 : index
    %c0_12 = arith.constant 0 : index
    %15 = vector.load %arg6[%c0_11, %c0_12] : memref<1x512xf32, #tpu.memory_space<vmem>>, vector<1x512xf32>
    %16 = vector.broadcast %15 : vector<1x512xf32> to vector<6x512xf32>
    %17 = arith.addf %14, %16 : vector<6x512xf32>
    %cst_13 = arith.constant 0.000000e+00 : f32
    %18 = vector.broadcast %cst_13 : f32 to vector<6x512xf32>
    %19 = arith.maximumf %17, %18 : vector<6x512xf32>
    %20 = arith.truncf %19 : vector<6x512xf32> to vector<6x512xbf16>
    %c0_14 = arith.constant 0 : index
    %c0_15 = arith.constant 0 : index
    %21 = vector.load %arg7[%c0_14, %c0_15] : memref<512x512xbf16, #tpu.memory_space<vmem>>, vector<512x512xbf16>
    %cst_16 = arith.constant dense<0.000000e+00> : vector<6x512xf32>
    %22 = tpu.matmul %20, %21, %cst_16 {dimension_numbers = #tpu.dot_dimension_numbers<[1], [0], [0], [1], [0, 0, 1, 1], [], []>} : vector<6x512xbf16>, vector<512x512xbf16>, vector<6x512xf32> -> vector<6x512xf32>
    %c0_17 = arith.constant 0 : index
    %c0_18 = arith.constant 0 : index
    %c0_19 = arith.constant 0 : index
    %23 = vector.load %arg8[%c0_17, %c0_18, %c0_19] : memref<1x6x512xf32, #tpu.memory_space<vmem>>, vector<1x6x512xf32>
    %24 = vector.shape_cast %23 : vector<1x6x512xf32> to vector<6x512xf32>
    %25 = vector.shape_cast %22 : vector<6x512xf32> to vector<1x6x512xf32>
    tpu.vector_store %arg8[%c0_17, %c0_18, %c0_19], %25 {strides = array<i32>} : memref<1x6x512xf32, #tpu.memory_space<vmem>>, vector<1x6x512xf32>,
    return
  }
  func.func @transform_0(%arg0: i32) -> (i32, i32) {
    %c0_i32 = arith.constant 0 : i32
    %c0_i32_0 = arith.constant 0 : i32
    %c0_i32_1 = arith.constant 0 : i32
    return %c0_i32, %c0_i32_0 : i32, i32
  }
  func.func @transform_1(%arg0: i32) -> (i32, i32) {
    %c0_i32 = arith.constant 0 : i32
    %c0_i32_0 = arith.constant 0 : i32
    %c0_i32_1 = arith.constant 0 : i32
    return %c0_i32, %c0_i32_0 : i32, i32
  }
  func.func @transform_2(%arg0: i32) -> (i32, i32) {
    %c0_i32 = arith.constant 0 : i32
    %c0_i32_0 = arith.constant 0 : i32
    %c0_i32_1 = arith.constant 0 : i32
    return %c0_i32, %c0_i32_0 : i32, i32
  }
  func.func @transform_3(%arg0: i32) -> (i32, i32) {
    %c0_i32 = arith.constant 0 : i32
    %c0_i32_0 = arith.constant 0 : i32
    return %c0_i32, %arg0 : i32, i32
  }
  func.func @transform_4(%arg0: i32) -> (i32, i32) {
    %c0_i32 = arith.constant 0 : i32
    %c0_i32_0 = arith.constant 0 : i32
    %c0_i32_1 = arith.constant 0 : i32
    return %c0_i32, %c0_i32_0 : i32, i32
  }
  func.func @transform_5(%arg0: i32) -> (i32, i32) {
    %c0_i32 = arith.constant 0 : i32
    %c0_i32_0 = arith.constant 0 : i32
    %c0_i32_1 = arith.constant 0 : i32
    return %c0_i32, %c0_i32_0 : i32, i32
  }
  func.func @transform_6(%arg0: i32) -> (i32, i32) {
    %c0_i32 = arith.constant 0 : i32
    %c0_i32_0 = arith.constant 0 : i32
    %c0_i32_1 = arith.constant 0 : i32
    return %c0_i32, %c0_i32_0 : i32, i32
  }
  func.func @transform_7(%arg0: i32) -> (i32, i32, i32) {
    %c0_i32 = arith.constant 0 : i32
    %c0_i32_0 = arith.constant 0 : i32
    %c0_i32_1 = arith.constant 0 : i32
    return %arg0, %c0_i32, %c0_i32_0 : i32, i32, i32
  }
}

</mosaic_0001>

<bundles_post_ra>
// kernel: _lambda_.1
= control target key start
LH: loop header
LB: loop body
LE: loop exit
PB: predicated region body
PF: predicated region fallthrough
CT: control target
= control target key end

     0   :  { %s6543_s24 = smov 0   ;;  %s6545_s25 = smov 0   ;;  %s8298_s0 = inlined_call_operand.vmem [shape: bf16[2,7], index: 0, kind: input, shape index: {}]   ;;  %s8299_s1 = inlined_call_operand.vmem [shape: bf16[7,512], index: 1, kind: input, shape index: {}]   ;;  %s8300_s2 = inlined_call_operand.vmem [shape: f32[1,512], index: 2, kind: input, shape index: {}]   ;;  %s8301_s3 = inlined_call_operand.vmem [shape: bf16[512,4608], index: 3, kind: input, shape index: {}]   ;;  %s8302_s4 = inlined_call_operand.vmem [shape: f32[1,512], index: 4, kind: input, shape index: {}]   ;;  %s8303_s5 = inlined_call_operand.vmem [shape: f32[1,512], index: 5, kind: input, shape index: {}]   ;;  %s8304_s6 = inlined_call_operand.vmem [shape: bf16[512,512], index: 6, kind: input, shape index: {}]   ;;  %s8305_s7 = inlined_call_operand.vmem [shape: f32[3,6,512], index: 7, kind: output, shape index: {}]  }
   0x1   :  { %s6547_s26 = smov 0  }
   0x2 LB: > { %s5115_s27 = sadd.s32 4294967295, %s6499_s26   ;;  %s6560_s28 = sadd.s32 1, %s6499_s26   ;;  %s6499_s26 = sphi %s6547_s26, %s8308_s26   ;;  %s6495_s25 = sphi %s6545_s25, %s8307_s25   ;;  %s6491_s24 = sphi %s6543_s24, %s8306_s24  }
   0x3   : > { %s84_s29 = ssub.s32 %s6499_s26, %s6560_s28  ;;  %s87_s30 = sadd.s32 1, %s6495_s25 }
   0x4   : > { %p85_p0 = scmp.eq.s32.totalorder %s84_s29, 0  ;;  %p94_p1 = scmp.ne.s32.totalorder %s6495_s25, %s6491_s24 }
   0x5   : > { %p95_p2 = scmp.eq.s32.totalorder %s6499_s26, 0  ;;  %p5118_p4 = scmp.ge.s32.totalorder %s6499_s26, 3 }
   0x6   : > { %s6569_s8 = scalar_select %p85_p0, %s6495_s25, %s87_s30  }
   0x7   : > { %p96_p3 = por %p95_p2, %p94_p1  ;;  %227 = sbr.rel (%p5118_p4) target bundleno = 211 (0xd3), region = 40 }
   0xe   : > { %230 = sbr.rel (!%p96_p3) target bundleno = 211 (0xd3), region = 44  ;;  %s232_s9 = sand.u32 (%p96_p3), 1, %s6495_s25  }
   0xf   : > { %s5643_s10 = smul.u32 (%p96_p3), 48, %s6499_s26 }
  0x10   : > { %s5677_s11 = smul.u32 (%p96_p3), 3072, %s232_s9 }
  0x11   : > { %s6577_s14 = scalar_lea.vmem (%p96_p3), %s8301_s3, %s5643_s10 }
  0x12   : > { %v250_v0 = vld [vmem:[%s6577_s14] sm:$0xff] (%p96_p3)  ;;  %v252_v1 = vld [vmem:[%s6577_s14 + $0x8] sm:$0xff] (%p96_p3)  ;;  %v254_v2 = vld [vmem:[%s6577_s14 + $0x10] sm:$0xff] (%p96_p3)  ;;  %s6582_s15 = scalar_lea.vmem (%p96_p3), [#allocation2], %s5677_s11 }
  0x13   : > { %251 = vst [vmem:[%s6582_s15] sm:$0xff] (%p96_p3), %v250_v0  ;;  %253 = vst [vmem:[%s6582_s15 + $0x8] sm:$0xff] (%p96_p3), %v252_v1  ;;  %v256_v3 = vld [vmem:[%s6577_s14 + $0x18] sm:$0xff] (%p96_p3)  ;;  %v258_v4 = vld [vmem:[%s6577_s14 + $0x20] sm:$0xff] (%p96_p3) }
  0x14   : > { %255 = vst [vmem:[%s6582_s15 + $0x10] sm:$0xff] (%p96_p3), %v254_v2  ;;  %v260_v5 = vld [vmem:[%s6577_s14 + $0x28] sm:$0xff] (%p96_p3)  ;;  %257 = vst [vmem:[%s6582_s15 + $0x18] sm:$0xff] (%p96_p3), %v256_v3  ;;  %v262_v6 = vld [vmem:[%s6577_s14 + $0x90] sm:$0xff] (%p96_p3) }
  0x15   : > { %259 = vst [vmem:[%s6582_s15 + $0x20] sm:$0xff] %v258_v4  ;;  %261 = vst [vmem:[%s6582_s15 + $0x28] sm:$0xff] %v260_v5  ;;  %v264_v7 = vld [vmem:[%s6577_s14 + $0x98] sm:$0xff]  ;;  %v266_v8 = vld [vmem:[%s6577_s14 + $0xa0] sm:$0xff] }
  0x16   : > { %263 = vst [vmem:[%s6582_s15 + $0x30] sm:$0xff] %v262_v6  ;;  %265 = vst [vmem:[%s6582_s15 + $0x38] sm:$0xff] %v264_v7  ;;  %v268_v9 = vld [vmem:[%s6577_s14 + $0xa8] sm:$0xff]  ;;  %v270_v10 = vld [vmem:[%s6577_s14 + $0xb0] sm:$0xff] }
  0x17   : > { %267 = vst [vmem:[%s6582_s15 + $0x40] sm:$0xff] %v266_v8  ;;  %v272_v11 = vld [vmem:[%s6577_s14 + $0xb8] sm:$0xff]  ;;  %269 = vst [vmem:[%s6582_s15 + $0x48] sm:$0xff] %v268_v9  ;;  %v274_v12 = vld [vmem:[%s6577_s14 + $0x120] sm:$0xff] }
  0x18   : > { %271 = vst [vmem:[%s6582_s15 + $0x50] sm:$0xff] %v270_v10  ;;  %273 = vst [vmem:[%s6582_s15 + $0x58] sm:$0xff] %v272_v11  ;;  %v276_v13 = vld [vmem:[%s6577_s14 + $0x128] sm:$0xff]  ;;  %v278_v14 = vld [vmem:[%s6577_s14 + $0x130] sm:$0xff] }
  0x19   : > { %275 = vst [vmem:[%s6582_s15 + $0x60] sm:$0xff] %v274_v12  ;;  %277 = vst [vmem:[%s6582_s15 + $0x68] sm:$0xff] %v276_v13  ;;  %v280_v15 = vld [vmem:[%s6577_s14 + $0x138] sm:$0xff]  ;;  %v282_v16 = vld [vmem:[%s6577_s14 + $0x140] sm:$0xff] }
  0x1a   : > { %279 = vst [vmem:[%s6582_s15 + $0x70] sm:$0xff] %v278_v14  ;;  %v284_v17 = vld [vmem:[%s6577_s14 + $0x148] sm:$0xff]  ;;  %281 = vst [vmem:[%s6582_s15 + $0x78] sm:$0xff] %v280_v15  ;;  %v286_v18 = vld [vmem:[%s6577_s14 + $0x1b0] sm:$0xff] }
  0x1b   : > { %283 = vst [vmem:[%s6582_s15 + $0x80] sm:$0xff] %v282_v16  ;;  %285 = vst [vmem:[%s6582_s15 + $0x88] sm:$0xff] %v284_v17  ;;  %v288_v19 = vld [vmem:[%s6577_s14 + $0x1b8] sm:$0xff]  ;;  %v290_v20 = vld [vmem:[%s6577_s14 + $0x1c0] sm:$0xff] }
  0x1c   : > { %287 = vst [vmem:[%s6582_s15 + $0x90] sm:$0xff] %v286_v18  ;;  %289 = vst [vmem:[%s6582_s15 + $0x98] sm:$0xff] %v288_v19  ;;  %v292_v21 = vld [vmem:[%s6577_s14 + $0x1c8] sm:$0xff]  ;;  %v294_v22 = vld [vmem:[%s6577_s14 + $0x1d0] sm:$0xff] }
  0x1d   : > { %291 = vst [vmem:[%s6582_s15 + $0xa0] sm:$0xff] %v290_v20  ;;  %v296_v23 = vld [vmem:[%s6577_s14 + $0x1d8] sm:$0xff]  ;;  %293 = vst [vmem:[%s6582_s15 + $0xa8] sm:$0xff] %v292_v21  ;;  %v298_v24 = vld [vmem:[%s6577_s14 + $0x240] sm:$0xff] }
  0x1e   : > { %295 = vst [vmem:[%s6582_s15 + $0xb0] sm:$0xff] %v294_v22  ;;  %297 = vst [vmem:[%s6582_s15 + $0xb8] sm:$0xff] %v296_v23  ;;  %v300_v25 = vld [vmem:[%s6577_s14 + $0x248] sm:$0xff]  ;;  %v302_v26 = vld [vmem:[%s6577_s14 + $0x250] sm:$0xff] }
  0x1f   : > { %299 = vst [vmem:[%s6582_s15 + $0xc0] sm:$0xff] %v298_v24  ;;  %301 = vst [vmem:[%s6582_s15 + $0xc8] sm:$0xff] %v300_v25  ;;  %v304_v27 = vld [vmem:[%s6577_s14 + $0x258] sm:$0xff]  ;;  %v306_v28 = vld [vmem:[%s6577_s14 + $0x260] sm:$0xff] }
  0x20   : > { %303 = vst [vmem:[%s6582_s15 + $0xd0] sm:$0xff] %v302_v26  ;;  %v308_v29 = vld [vmem:[%s6577_s14 + $0x268] sm:$0xff]  ;;  %305 = vst [vmem:[%s6582_s15 + $0xd8] sm:$0xff] %v304_v27  ;;  %v310_v30 = vld [vmem:[%s6577_s14 + $0x2d0] sm:$0xff] }
  0x21   : > { %307 = vst [vmem:[%s6582_s15 + $0xe0] sm:$0xff] %v306_v28  ;;  %309 = vst [vmem:[%s6582_s15 + $0xe8] sm:$0xff] %v308_v29  ;;  %v312_v31 = vld [vmem:[%s6577_s14 + $0x2d8] sm:$0xff]  ;;  %v314_v32 = vld [vmem:[%s6577_s14 + $0x2e0] sm:$0xff] }
  0x22   : > { %311 = vst [vmem:[%s6582_s15 + $0xf0] sm:$0xff] %v310_v30  ;;  %313 = vst [vmem:[%s6582_s15 + $0xf8] sm:$0xff] %v312_v31  ;;  %v316_v33 = vld [vmem:[%s6577_s14 + $0x2e8] sm:$0xff]  ;;  %v318_v34 = vld [vmem:[%s6577_s14 + $0x2f0] sm:$0xff] }
  0x23   : > { %315 = vst [vmem:[%s6582_s15 + $0x100] sm:$0xff] %v314_v32  ;;  %v320_v35 = vld [vmem:[%s6577_s14 + $0x2f8] sm:$0xff]  ;;  %317 = vst [vmem:[%s6582_s15 + $0x108] sm:$0xff] %v316_v33  ;;  %v322_v36 = vld [vmem:[%s6577_s14 + $0x360] sm:$0xff] }
  0x24   : > { %319 = vst [vmem:[%s6582_s15 + $0x110] sm:$0xff] %v318_v34  ;;  %321 = vst [vmem:[%s6582_s15 + $0x118] sm:$0xff] %v320_v35  ;;  %v324_v37 = vld [vmem:[%s6577_s14 + $0x368] sm:$0xff]  ;;  %v326_v38 = vld [vmem:[%s6577_s14 + $0x370] sm:$0xff] }
  0x25   : > { %323 = vst [vmem:[%s6582_s15 + $0x120] sm:$0xff] %v322_v36  ;;  %325 = vst [vmem:[%s6582_s15 + $0x128] sm:$0xff] %v324_v37  ;;  %v328_v39 = vld [vmem:[%s6577_s14 + $0x378] sm:$0xff]  ;;  %v330_v40 = vld [vmem:[%s6577_s14 + $0x380] sm:$0xff] }
  0x26   : > { %327 = vst [vmem:[%s6582_s15 + $0x130] sm:$0xff] %v326_v38  ;;  %v332_v41 = vld [vmem:[%s6577_s14 + $0x388] sm:$0xff]  ;;  %329 = vst [vmem:[%s6582_s15 + $0x138] sm:$0xff] %v328_v39  ;;  %v334_v42 = vld [vmem:[%s6577_s14 + $0x3f0] sm:$0xff] }
  0x27   : > { %331 = vst [vmem:[%s6582_s15 + $0x140] sm:$0xff] %v330_v40  ;;  %333 = vst [vmem:[%s6582_s15 + $0x148] sm:$0xff] %v332_v41  ;;  %v336_v43 = vld [vmem:[%s6577_s14 + $0x3f8] sm:$0xff]  ;;  %v338_v44 = vld [vmem:[%s6577_s14 + $0x400] sm:$0xff] }
  0x28   : > { %335 = vst [vmem:[%s6582_s15 + $0x150] sm:$0xff] %v334_v42  ;;  %337 = vst [vmem:[%s6582_s15 + $0x158] sm:$0xff] %v336_v43  ;;  %v340_v45 = vld [vmem:[%s6577_s14 + $0x408] sm:$0xff]  ;;  %v342_v46 = vld [vmem:[%s6577_s14 + $0x410] sm:$0xff] }
  0x29   : > { %339 = vst [vmem:[%s6582_s15 + $0x160] sm:$0xff] %v338_v44  ;;  %v344_v47 = vld [vmem:[%s6577_s14 + $0x418] sm:$0xff]  ;;  %341 = vst [vmem:[%s6582_s15 + $0x168] sm:$0xff] %v340_v45  ;;  %v346_v48 = vld [vmem:[%s6577_s14 + $0x480] sm:$0xff] }
  0x2a   : > { %343 = vst [vmem:[%s6582_s15 + $0x170] sm:$0xff] %v342_v46  ;;  %345 = vst [vmem:[%s6582_s15 + $0x178] sm:$0xff] %v344_v47  ;;  %v348_v49 = vld [vmem:[%s6577_s14 + $0x488] sm:$0xff]  ;;  %v350_v50 = vld [vmem:[%s6577_s14 + $0x490] sm:$0xff] }
  0x2b   : > { %347 = vst [vmem:[%s6582_s15 + $0x180] sm:$0xff] %v346_v48  ;;  %349 = vst [vmem:[%s6582_s15 + $0x188] sm:$0xff] %v348_v49  ;;  %v352_v51 = vld [vmem:[%s6577_s14 + $0x498] sm:$0xff]  ;;  %v354_v52 = vld [vmem:[%s6577_s14 + $0x4a0] sm:$0xff] }
  0x2c   : > { %351 = vst [vmem:[%s6582_s15 + $0x190] sm:$0xff] %v350_v50  ;;  %v356_v53 = vld [vmem:[%s6577_s14 + $0x4a8] sm:$0xff]  ;;  %353 = vst [vmem:[%s6582_s15 + $0x198] sm:$0xff] %v352_v51  ;;  %v358_v54 = vld [vmem:[%s6577_s14 + $0x510] sm:$0xff] }
  0x2d   : > { %355 = vst [vmem:[%s6582_s15 + $0x1a0] sm:$0xff] %v354_v52  ;;  %357 = vst [vmem:[%s6582_s15 + $0x1a8] sm:$0xff] %v356_v53  ;;  %v360_v55 = vld [vmem:[%s6577_s14 + $0x518] sm:$0xff]  ;;  %v362_v56 = vld [vmem:[%s6577_s14 + $0x520] sm:$0xff] }
  0x2e   : > { %359 = vst [vmem:[%s6582_s15 + $0x1b0] sm:$0xff] %v358_v54  ;;  %361 = vst [vmem:[%s6582_s15 + $0x1b8] sm:$0xff] %v360_v55  ;;  %v364_v57 = vld [vmem:[%s6577_s14 + $0x528] sm:$0xff]  ;;  %v366_v58 = vld [vmem:[%s6577_s14 + $0x530] sm:$0xff] }
  0x2f   : > { %363 = vst [vmem:[%s6582_s15 + $0x1c0] sm:$0xff] %v362_v56  ;;  %v368_v59 = vld [vmem:[%s6577_s14 + $0x538] sm:$0xff]  ;;  %365 = vst [vmem:[%s6582_s15 + $0x1c8] sm:$0xff] %v364_v57  ;;  %v370_v60 = vld [vmem:[%s6577_s14 + $0x5a0] sm:$0xff] }
  0x30   : > { %367 = vst [vmem:[%s6582_s15 + $0x1d0] sm:$0xff] %v366_v58  ;;  %369 = vst [vmem:[%s6582_s15 + $0x1d8] sm:$0xff] %v368_v59  ;;  %v372_v61 = vld [vmem:[%s6577_s14 + $0x5a8] sm:$0xff]  ;;  %v374_v62 = vld [vmem:[%s6577_s14 + $0x5b0] sm:$0xff] }
  0x31   : > { %371 = vst [vmem:[%s6582_s15 + $0x1e0] sm:$0xff] %v370_v60  ;;  %373 = vst [vmem:[%s6582_s15 + $0x1e8] sm:$0xff] %v372_v61  ;;  %v376_v63 = vld [vmem:[%s6577_s14 + $0x5b8] sm:$0xff]  ;;  %v378_v0 = vld [vmem:[%s6577_s14 + $0x5c0] sm:$0xff] }
  0x32   : > { %375 = vst [vmem:[%s6582_s15 + $0x1f0] sm:$0xff] %v374_v62  ;;  %v380_v1 = vld [vmem:[%s6577_s14 + $0x5c8] sm:$0xff]  ;;  %377 = vst [vmem:[%s6582_s15 + $0x1f8] sm:$0xff] %v376_v63  ;;  %v382_v2 = vld [vmem:[%s6577_s14 + $0x630] sm:$0xff] }
  0x33   : > { %379 = vst [vmem:[%s6582_s15 + $0x200] sm:$0xff] %v378_v0  ;;  %381 = vst [vmem:[%s6582_s15 + $0x208] sm:$0xff] %v380_v1  ;;  %v384_v3 = vld [vmem:[%s6577_s14 + $0x638] sm:$0xff]  ;;  %v386_v4 = vld [vmem:[%s6577_s14 + $0x640] sm:$0xff] }
  0x34   : > { %383 = vst [vmem:[%s6582_s15 + $0x210] sm:$0xff] %v382_v2  ;;  %385 = vst [vmem:[%s6582_s15 + $0x218] sm:$0xff] %v384_v3  ;;  %v388_v5 = vld [vmem:[%s6577_s14 + $0x648] sm:$0xff]  ;;  %v390_v6 = vld [vmem:[%s6577_s14 + $0x650] sm:$0xff] }
  0x35   : > { %387 = vst [vmem:[%s6582_s15 + $0x220] sm:$0xff] %v386_v4  ;;  %v392_v7 = vld [vmem:[%s6577_s14 + $0x658] sm:$0xff]  ;;  %389 = vst [vmem:[%s6582_s15 + $0x228] sm:$0xff] %v388_v5  ;;  %v394_v8 = vld [vmem:[%s6577_s14 + $0x6c0] sm:$0xff] }
  0x36   : > { %391 = vst [vmem:[%s6582_s15 + $0x230] sm:$0xff] %v390_v6  ;;  %393 = vst [vmem:[%s6582_s15 + $0x238] sm:$0xff] %v392_v7  ;;  %v396_v9 = vld [vmem:[%s6577_s14 + $0x6c8] sm:$0xff]  ;;  %v398_v10 = vld [vmem:[%s6577_s14 + $0x6d0] sm:$0xff] }
  0x37   : > { %395 = vst [vmem:[%s6582_s15 + $0x240] sm:$0xff] %v394_v8  ;;  %397 = vst [vmem:[%s6582_s15 + $0x248] sm:$0xff] %v396_v9  ;;  %v400_v11 = vld [vmem:[%s6577_s14 + $0x6d8] sm:$0xff]  ;;  %v402_v12 = vld [vmem:[%s6577_s14 + $0x6e0] sm:$0xff] }
  0x38   : > { %399 = vst [vmem:[%s6582_s15 + $0x250] sm:$0xff] %v398_v10  ;;  %v404_v13 = vld [vmem:[%s6577_s14 + $0x6e8] sm:$0xff]  ;;  %401 = vst [vmem:[%s6582_s15 + $0x258] sm:$0xff] %v400_v11  ;;  %v406_v14 = vld [vmem:[%s6577_s14 + $0x750] sm:$0xff] }
  0x39   : > { %403 = vst [vmem:[%s6582_s15 + $0x260] sm:$0xff] %v402_v12  ;;  %405 = vst [vmem:[%s6582_s15 + $0x268] sm:$0xff] %v404_v13  ;;  %v408_v15 = vld [vmem:[%s6577_s14 + $0x758] sm:$0xff]  ;;  %v410_v16 = vld [vmem:[%s6577_s14 + $0x760] sm:$0xff] }
  0x3a   : > { %407 = vst [vmem:[%s6582_s15 + $0x270] sm:$0xff] %v406_v14  ;;  %409 = vst [vmem:[%s6582_s15 + $0x278] sm:$0xff] %v408_v15  ;;  %v412_v17 = vld [vmem:[%s6577_s14 + $0x768] sm:$0xff]  ;;  %v414_v18 = vld [vmem:[%s6577_s14 + $0x770] sm:$0xff] }
  0x3b   : > { %411 = vst [vmem:[%s6582_s15 + $0x280] sm:$0xff] %v410_v16  ;;  %v416_v19 = vld [vmem:[%s6577_s14 + $0x778] sm:$0xff]  ;;  %413 = vst [vmem:[%s6582_s15 + $0x288] sm:$0xff] %v412_v17  ;;  %v418_v20 = vld [vmem:[%s6577_s14 + $0x7e0] sm:$0xff] }
  0x3c   : > { %415 = vst [vmem:[%s6582_s15 + $0x290] sm:$0xff] %v414_v18  ;;  %417 = vst [vmem:[%s6582_s15 + $0x298] sm:$0xff] %v416_v19  ;;  %v420_v21 = vld [vmem:[%s6577_s14 + $0x7e8] sm:$0xff]  ;;  %v422_v22 = vld [vmem:[%s6577_s14 + $0x7f0] sm:$0xff] }
  0x3d   : > { %419 = vst [vmem:[%s6582_s15 + $0x2a0] sm:$0xff] %v418_v20  ;;  %421 = vst [vmem:[%s6582_s15 + $0x2a8] sm:$0xff] %v420_v21  ;;  %v424_v23 = vld [vmem:[%s6577_s14 + $0x7f8] sm:$0xff]  ;;  %v426_v24 = vld [vmem:[%s6577_s14 + $0x800] sm:$0xff] }
  0x3e   : > { %423 = vst [vmem:[%s6582_s15 + $0x2b0] sm:$0xff] %v422_v22  ;;  %v428_v25 = vld [vmem:[%s6577_s14 + $0x808] sm:$0xff]  ;;  %425 = vst [vmem:[%s6582_s15 + $0x2b8] sm:$0xff] %v424_v23  ;;  %v430_v26 = vld [vmem:[%s6577_s14 + $0x870] sm:$0xff] }
  0x3f   : > { %427 = vst [vmem:[%s6582_s15 + $0x2c0] sm:$0xff] %v426_v24  ;;  %429 = vst [vmem:[%s6582_s15 + $0x2c8] sm:$0xff] %v428_v25  ;;  %v432_v27 = vld [vmem:[%s6577_s14 + $0x878] sm:$0xff]  ;;  %v434_v28 = vld [vmem:[%s6577_s14 + $0x880] sm:$0xff] }
  0x40   : > { %431 = vst [vmem:[%s6582_s15 + $0x2d0] sm:$0xff] %v430_v26  ;;  %433 = vst [vmem:[%s6582_s15 + $0x2d8] sm:$0xff] %v432_v27  ;;  %v436_v29 = vld [vmem:[%s6577_s14 + $0x888] sm:$0xff]  ;;  %v438_v30 = vld [vmem:[%s6577_s14 + $0x890] sm:$0xff] }
  0x41   : > { %435 = vst [vmem:[%s6582_s15 + $0x2e0] sm:$0xff] %v434_v28  ;;  %v440_v31 = vld [vmem:[%s6577_s14 + $0x898] sm:$0xff]  ;;  %437 = vst [vmem:[%s6582_s15 + $0x2e8] sm:$0xff] %v436_v29  ;;  %v442_v32 = vld [vmem:[%s6577_s14 + $0x900] sm:$0xff] }
  0x42   : > { %439 = vst [vmem:[%s6582_s15 + $0x2f0] sm:$0xff] %v438_v30  ;;  %441 = vst [vmem:[%s6582_s15 + $0x2f8] sm:$0xff] %v440_v31  ;;  %v444_v33 = vld [vmem:[%s6577_s14 + $0x908] sm:$0xff]  ;;  %v446_v34 = vld [vmem:[%s6577_s14 + $0x910] sm:$0xff] }
  0x43   : > { %443 = vst [vmem:[%s6582_s15 + $0x300] sm:$0xff] %v442_v32  ;;  %445 = vst [vmem:[%s6582_s15 + $0x308] sm:$0xff] %v444_v33  ;;  %v448_v35 = vld [vmem:[%s6577_s14 + $0x918] sm:$0xff]  ;;  %v450_v36 = vld [vmem:[%s6577_s14 + $0x920] sm:$0xff] }
  0x44   : > { %447 = vst [vmem:[%s6582_s15 + $0x310] sm:$0xff] %v446_v34  ;;  %v452_v37 = vld [vmem:[%s6577_s14 + $0x928] sm:$0xff]  ;;  %449 = vst [vmem:[%s6582_s15 + $0x318] sm:$0xff] %v448_v35  ;;  %v454_v38 = vld [vmem:[%s6577_s14 + $0x990] sm:$0xff] }
  0x45   : > { %451 = vst [vmem:[%s6582_s15 + $0x320] sm:$0xff] %v450_v36  ;;  %453 = vst [vmem:[%s6582_s15 + $0x328] sm:$0xff] %v452_v37  ;;  %v456_v39 = vld [vmem:[%s6577_s14 + $0x998] sm:$0xff]  ;;  %v458_v40 = vld [vmem:[%s6577_s14 + $0x9a0] sm:$0xff] }
  0x46   : > { %455 = vst [vmem:[%s6582_s15 + $0x330] sm:$0xff] %v454_v38  ;;  %457 = vst [vmem:[%s6582_s15 + $0x338] sm:$0xff] %v456_v39  ;;  %v460_v41 = vld [vmem:[%s6577_s14 + $0x9a8] sm:$0xff]  ;;  %v462_v42 = vld [vmem:[%s6577_s14 + $0x9b0] sm:$0xff] }
  0x47   : > { %459 = vst [vmem:[%s6582_s15 + $0x340] sm:$0xff] %v458_v40  ;;  %v464_v43 = vld [vmem:[%s6577_s14 + $0x9b8] sm:$0xff]  ;;  %461 = vst [vmem:[%s6582_s15 + $0x348] sm:$0xff] %v460_v41  ;;  %v466_v44 = vld [vmem:[%s6577_s14 + $0xa20] sm:$0xff] }
  0x48   : > { %463 = vst [vmem:[%s6582_s15 + $0x350] sm:$0xff] %v462_v42  ;;  %465 = vst [vmem:[%s6582_s15 + $0x358] sm:$0xff] %v464_v43  ;;  %v468_v45 = vld [vmem:[%s6577_s14 + $0xa28] sm:$0xff]  ;;  %v470_v46 = vld [vmem:[%s6577_s14 + $0xa30] sm:$0xff] }
  0x49   : > { %467 = vst [vmem:[%s6582_s15 + $0x360] sm:$0xff] %v466_v44  ;;  %469 = vst [vmem:[%s6582_s15 + $0x368] sm:$0xff] %v468_v45  ;;  %v472_v47 = vld [vmem:[%s6577_s14 + $0xa38] sm:$0xff]  ;;  %v474_v48 = vld [vmem:[%s6577_s14 + $0xa40] sm:$0xff] }
  0x4a   : > { %471 = vst [vmem:[%s6582_s15 + $0x370] sm:$0xff] %v470_v46  ;;  %v476_v49 = vld [vmem:[%s6577_s14 + $0xa48] sm:$0xff]  ;;  %473 = vst [vmem:[%s6582_s15 + $0x378] sm:$0xff] %v472_v47  ;;  %v478_v50 = vld [vmem:[%s6577_s14 + $0xab0] sm:$0xff] }
  0x4b   : > { %475 = vst [vmem:[%s6582_s15 + $0x380] sm:$0xff] %v474_v48  ;;  %477 = vst [vmem:[%s6582_s15 + $0x388] sm:$0xff] %v476_v49  ;;  %v480_v51 = vld [vmem:[%s6577_s14 + $0xab8] sm:$0xff]  ;;  %v482_v52 = vld [vmem:[%s6577_s14 + $0xac0] sm:$0xff] }
  0x4c   : > { %479 = vst [vmem:[%s6582_s15 + $0x390] sm:$0xff] %v478_v50  ;;  %481 = vst [vmem:[%s6582_s15 + $0x398] sm:$0xff] %v480_v51  ;;  %v484_v53 = vld [vmem:[%s6577_s14 + $0xac8] sm:$0xff]  ;;  %v486_v54 = vld [vmem:[%s6577_s14 + $0xad0] sm:$0xff] }
  0x4d   : > { %483 = vst [vmem:[%s6582_s15 + $0x3a0] sm:$0xff] %v482_v52  ;;  %v488_v55 = vld [vmem:[%s6577_s14 + $0xad8] sm:$0xff]  ;;  %485 = vst [vmem:[%s6582_s15 + $0x3a8] sm:$0xff] %v484_v53  ;;  %v490_v56 = vld [vmem:[%s6577_s14 + $0xb40] sm:$0xff] }
  0x4e   : > { %487 = vst [vmem:[%s6582_s15 + $0x3b0] sm:$0xff] %v486_v54  ;;  %489 = vst [vmem:[%s6582_s15 + $0x3b8] sm:$0xff] %v488_v55  ;;  %v492_v57 = vld [vmem:[%s6577_s14 + $0xb48] sm:$0xff]  ;;  %v494_v58 = vld [vmem:[%s6577_s14 + $0xb50] sm:$0xff] }
  0x4f   : > { %491 = vst [vmem:[%s6582_s15 + $0x3c0] sm:$0xff] %v490_v56  ;;  %493 = vst [vmem:[%s6582_s15 + $0x3c8] sm:$0xff] %v492_v57  ;;  %v496_v59 = vld [vmem:[%s6577_s14 + $0xb58] sm:$0xff]  ;;  %v498_v60 = vld [vmem:[%s6577_s14 + $0xb60] sm:$0xff] }
  0x50   : > { %495 = vst [vmem:[%s6582_s15 + $0x3d0] sm:$0xff] %v494_v58  ;;  %v500_v61 = vld [vmem:[%s6577_s14 + $0xb68] sm:$0xff]  ;;  %497 = vst [vmem:[%s6582_s15 + $0x3d8] sm:$0xff] %v496_v59  ;;  %v502_v62 = vld [vmem:[%s6577_s14 + $0xbd0] sm:$0xff] }
  0x51   : > { %499 = vst [vmem:[%s6582_s15 + $0x3e0] sm:$0xff] %v498_v60  ;;  %501 = vst [vmem:[%s6582_s15 + $0x3e8] sm:$0xff] %v500_v61  ;;  %v504_v63 = vld [vmem:[%s6577_s14 + $0xbd8] sm:$0xff]  ;;  %v506_v0 = vld [vmem:[%s6577_s14 + $0xbe0] sm:$0xff] }
  0x52   : > { %503 = vst [vmem:[%s6582_s15 + $0x3f0] sm:$0xff] %v502_v62  ;;  %505 = vst [vmem:[%s6582_s15 + $0x3f8] sm:$0xff] %v504_v63  ;;  %v508_v1 = vld [vmem:[%s6577_s14 + $0xbe8] sm:$0xff]  ;;  %v510_v2 = vld [vmem:[%s6577_s14 + $0xbf0] sm:$0xff] }
  0x53   : > { %507 = vst [vmem:[%s6582_s15 + $0x400] sm:$0xff] %v506_v0  ;;  %v512_v3 = vld [vmem:[%s6577_s14 + $0xbf8] sm:$0xff]  ;;  %509 = vst [vmem:[%s6582_s15 + $0x408] sm:$0xff] %v508_v1  ;;  %v514_v4 = vld [vmem:[%s6577_s14 + $0xc60] sm:$0xff] }
  0x54   : > { %511 = vst [vmem:[%s6582_s15 + $0x410] sm:$0xff] %v510_v2  ;;  %513 = vst [vmem:[%s6582_s15 + $0x418] sm:$0xff] %v512_v3  ;;  %v516_v5 = vld [vmem:[%s6577_s14 + $0xc68] sm:$0xff]  ;;  %v518_v6 = vld [vmem:[%s6577_s14 + $0xc70] sm:$0xff] }
  0x55   : > { %515 = vst [vmem:[%s6582_s15 + $0x420] sm:$0xff] %v514_v4  ;;  %517 = vst [vmem:[%s6582_s15 + $0x428] sm:$0xff] %v516_v5  ;;  %v520_v7 = vld [vmem:[%s6577_s14 + $0xc78] sm:$0xff]  ;;  %v522_v8 = vld [vmem:[%s6577_s14 + $0xc80] sm:$0xff] }
  0x56   : > { %519 = vst [vmem:[%s6582_s15 + $0x430] sm:$0xff] %v518_v6  ;;  %v524_v9 = vld [vmem:[%s6577_s14 + $0xc88] sm:$0xff]  ;;  %521 = vst [vmem:[%s6582_s15 + $0x438] sm:$0xff] %v520_v7  ;;  %v526_v10 = vld [vmem:[%s6577_s14 + $0xcf0] sm:$0xff] }
  0x57   : > { %523 = vst [vmem:[%s6582_s15 + $0x440] sm:$0xff] %v522_v8  ;;  %525 = vst [vmem:[%s6582_s15 + $0x448] sm:$0xff] %v524_v9  ;;  %v528_v11 = vld [vmem:[%s6577_s14 + $0xcf8] sm:$0xff]  ;;  %v530_v12 = vld [vmem:[%s6577_s14 + $0xd00] sm:$0xff] }
  0x58   : > { %527 = vst [vmem:[%s6582_s15 + $0x450] sm:$0xff] %v526_v10  ;;  %529 = vst [vmem:[%s6582_s15 + $0x458] sm:$0xff] %v528_v11  ;;  %v532_v13 = vld [vmem:[%s6577_s14 + $0xd08] sm:$0xff]  ;;  %v534_v14 = vld [vmem:[%s6577_s14 + $0xd10] sm:$0xff] }
  0x59   : > { %531 = vst [vmem:[%s6582_s15 + $0x460] sm:$0xff] %v530_v12  ;;  %v536_v15 = vld [vmem:[%s6577_s14 + $0xd18] sm:$0xff]  ;;  %533 = vst [vmem:[%s6582_s15 + $0x468] sm:$0xff] %v532_v13  ;;  %v538_v16 = vld [vmem:[%s6577_s14 + $0xd80] sm:$0xff] }
  0x5a   : > { %535 = vst [vmem:[%s6582_s15 + $0x470] sm:$0xff] %v534_v14  ;;  %537 = vst [vmem:[%s6582_s15 + $0x478] sm:$0xff] %v536_v15  ;;  %v540_v17 = vld [vmem:[%s6577_s14 + $0xd88] sm:$0xff]  ;;  %v542_v18 = vld [vmem:[%s6577_s14 + $0xd90] sm:$0xff] }
  0x5b   : > { %539 = vst [vmem:[%s6582_s15 + $0x480] sm:$0xff] %v538_v16  ;;  %541 = vst [vmem:[%s6582_s15 + $0x488] sm:$0xff] %v540_v17  ;;  %v544_v19 = vld [vmem:[%s6577_s14 + $0xd98] sm:$0xff]  ;;  %v546_v20 = vld [vmem:[%s6577_s14 + $0xda0] sm:$0xff] }
  0x5c   : > { %543 = vst [vmem:[%s6582_s15 + $0x490] sm:$0xff] %v542_v18  ;;  %v548_v21 = vld [vmem:[%s6577_s14 + $0xda8] sm:$0xff]  ;;  %545 = vst [vmem:[%s6582_s15 + $0x498] sm:$0xff] %v544_v19  ;;  %v550_v22 = vld [vmem:[%s6577_s14 + $0xe10] sm:$0xff] }
  0x5d   : > { %547 = vst [vmem:[%s6582_s15 + $0x4a0] sm:$0xff] %v546_v20  ;;  %549 = vst [vmem:[%s6582_s15 + $0x4a8] sm:$0xff] %v548_v21  ;;  %v552_v23 = vld [vmem:[%s6577_s14 + $0xe18] sm:$0xff]  ;;  %v554_v24 = vld [vmem:[%s6577_s14 + $0xe20] sm:$0xff] }
  0x5e   : > { %551 = vst [vmem:[%s6582_s15 + $0x4b0] sm:$0xff] %v550_v22  ;;  %553 = vst [vmem:[%s6582_s15 + $0x4b8] sm:$0xff] %v552_v23  ;;  %v556_v25 = vld [vmem:[%s6577_s14 + $0xe28] sm:$0xff]  ;;  %v558_v26 = vld [vmem:[%s6577_s14 + $0xe30] sm:$0xff] }
  0x5f   : > { %555 = vst [vmem:[%s6582_s15 + $0x4c0] sm:$0xff] %v554_v24  ;;  %v560_v27 = vld [vmem:[%s6577_s14 + $0xe38] sm:$0xff]  ;;  %557 = vst [vmem:[%s6582_s15 + $0x4c8] sm:$0xff] %v556_v25  ;;  %v562_v28 = vld [vmem:[%s6577_s14 + $0xea0] sm:$0xff] }
  0x60   : > { %559 = vst [vmem:[%s6582_s15 + $0x4d0] sm:$0xff] %v558_v26  ;;  %561 = vst [vmem:[%s6582_s15 + $0x4d8] sm:$0xff] %v560_v27  ;;  %v564_v29 = vld [vmem:[%s6577_s14 + $0xea8] sm:$0xff]  ;;  %v566_v30 = vld [vmem:[%s6577_s14 + $0xeb0] sm:$0xff] }
  0x61   : > { %563 = vst [vmem:[%s6582_s15 + $0x4e0] sm:$0xff] %v562_v28  ;;  %565 = vst [vmem:[%s6582_s15 + $0x4e8] sm:$0xff] %v564_v29  ;;  %v568_v31 = vld [vmem:[%s6577_s14 + $0xeb8] sm:$0xff]  ;;  %v570_v32 = vld [vmem:[%s6577_s14 + $0xec0] sm:$0xff] }
  0x62   : > { %567 = vst [vmem:[%s6582_s15 + $0x4f0] sm:$0xff] %v566_v30  ;;  %v572_v33 = vld [vmem:[%s6577_s14 + $0xec8] sm:$0xff]  ;;  %569 = vst [vmem:[%s6582_s15 + $0x4f8] sm:$0xff] %v568_v31  ;;  %v574_v34 = vld [vmem:[%s6577_s14 + $0xf30] sm:$0xff] }
  0x63   : > { %571 = vst [vmem:[%s6582_s15 + $0x500] sm:$0xff] %v570_v32  ;;  %573 = vst [vmem:[%s6582_s15 + $0x508] sm:$0xff] %v572_v33  ;;  %v576_v35 = vld [vmem:[%s6577_s14 + $0xf38] sm:$0xff]  ;;  %v578_v36 = vld [vmem:[%s6577_s14 + $0xf40] sm:$0xff] }
  0x64   : > { %575 = vst [vmem:[%s6582_s15 + $0x510] sm:$0xff] %v574_v34  ;;  %577 = vst [vmem:[%s6582_s15 + $0x518] sm:$0xff] %v576_v35  ;;  %v580_v37 = vld [vmem:[%s6577_s14 + $0xf48] sm:$0xff]  ;;  %v582_v38 = vld [vmem:[%s6577_s14 + $0xf50] sm:$0xff] }
  0x65   : > { %579 = vst [vmem:[%s6582_s15 + $0x520] sm:$0xff] %v578_v36  ;;  %v584_v39 = vld [vmem:[%s6577_s14 + $0xf58] sm:$0xff]  ;;  %581 = vst [vmem:[%s6582_s15 + $0x528] sm:$0xff] %v580_v37  ;;  %v586_v40 = vld [vmem:[%s6577_s14 + $0xfc0] sm:$0xff] }
  0x66   : > { %583 = vst [vmem:[%s6582_s15 + $0x530] sm:$0xff] %v582_v38  ;;  %585 = vst [vmem:[%s6582_s15 + $0x538] sm:$0xff] %v584_v39  ;;  %v588_v41 = vld [vmem:[%s6577_s14 + $0xfc8] sm:$0xff]  ;;  %v590_v42 = vld [vmem:[%s6577_s14 + $0xfd0] sm:$0xff] }
  0x67   : > { %587 = vst [vmem:[%s6582_s15 + $0x540] sm:$0xff] %v586_v40  ;;  %589 = vst [vmem:[%s6582_s15 + $0x548] sm:$0xff] %v588_v41  ;;  %v592_v43 = vld [vmem:[%s6577_s14 + $0xfd8] sm:$0xff]  ;;  %v594_v44 = vld [vmem:[%s6577_s14 + $0xfe0] sm:$0xff] }
  0x68   : > { %591 = vst [vmem:[%s6582_s15 + $0x550] sm:$0xff] %v590_v42  ;;  %v596_v45 = vld [vmem:[%s6577_s14 + $0xfe8] sm:$0xff]  ;;  %593 = vst [vmem:[%s6582_s15 + $0x558] sm:$0xff] %v592_v43  ;;  %v598_v46 = vld [vmem:[%s6577_s14 + $0x1050] sm:$0xff] }
  0x69   : > { %595 = vst [vmem:[%s6582_s15 + $0x560] sm:$0xff] %v594_v44  ;;  %597 = vst [vmem:[%s6582_s15 + $0x568] sm:$0xff] %v596_v45  ;;  %v600_v47 = vld [vmem:[%s6577_s14 + $0x1058] sm:$0xff]  ;;  %v602_v48 = vld [vmem:[%s6577_s14 + $0x1060] sm:$0xff] }
  0x6a   : > { %599 = vst [vmem:[%s6582_s15 + $0x570] sm:$0xff] %v598_v46  ;;  %601 = vst [vmem:[%s6582_s15 + $0x578] sm:$0xff] %v600_v47  ;;  %v604_v49 = vld [vmem:[%s6577_s14 + $0x1068] sm:$0xff]  ;;  %v606_v50 = vld [vmem:[%s6577_s14 + $0x1070] sm:$0xff] }
  0x6b   : > { %603 = vst [vmem:[%s6582_s15 + $0x580] sm:$0xff] %v602_v48  ;;  %v608_v51 = vld [vmem:[%s6577_s14 + $0x1078] sm:$0xff]  ;;  %605 = vst [vmem:[%s6582_s15 + $0x588] sm:$0xff] %v604_v49  ;;  %v610_v52 = vld [vmem:[%s6577_s14 + $0x10e0] sm:$0xff] }
  0x6c   : > { %607 = vst [vmem:[%s6582_s15 + $0x590] sm:$0xff] %v606_v50  ;;  %609 = vst [vmem:[%s6582_s15 + $0x598] sm:$0xff] %v608_v51  ;;  %v612_v53 = vld [vmem:[%s6577_s14 + $0x10e8] sm:$0xff]  ;;  %v614_v54 = vld [vmem:[%s6577_s14 + $0x10f0] sm:$0xff] }
  0x6d   : > { %611 = vst [vmem:[%s6582_s15 + $0x5a0] sm:$0xff] %v610_v52  ;;  %613 = vst [vmem:[%s6582_s15 + $0x5a8] sm:$0xff] %v612_v53  ;;  %v616_v55 = vld [vmem:[%s6577_s14 + $0x10f8] sm:$0xff]  ;;  %v618_v56 = vld [vmem:[%s6577_s14 + $0x1100] sm:$0xff] }
  0x6e   : > { %615 = vst [vmem:[%s6582_s15 + $0x5b0] sm:$0xff] %v614_v54  ;;  %v620_v57 = vld [vmem:[%s6577_s14 + $0x1108] sm:$0xff]  ;;  %617 = vst [vmem:[%s6582_s15 + $0x5b8] sm:$0xff] %v616_v55  ;;  %v622_v58 = vld [vmem:[%s6577_s14 + $0x1170] sm:$0xff] }
  0x6f   : > { %619 = vst [vmem:[%s6582_s15 + $0x5c0] sm:$0xff] %v618_v56  ;;  %621 = vst [vmem:[%s6582_s15 + $0x5c8] sm:$0xff] %v620_v57  ;;  %v624_v59 = vld [vmem:[%s6577_s14 + $0x1178] sm:$0xff]  ;;  %v626_v60 = vld [vmem:[%s6577_s14 + $0x1180] sm:$0xff] }
  0x70   : > { %623 = vst [vmem:[%s6582_s15 + $0x5d0] sm:$0xff] %v622_v58  ;;  %625 = vst [vmem:[%s6582_s15 + $0x5d8] sm:$0xff] %v624_v59  ;;  %v628_v61 = vld [vmem:[%s6577_s14 + $0x1188] sm:$0xff]  ;;  %v630_v62 = vld [vmem:[%s6577_s14 + $0x1190] sm:$0xff] }
  0x71   : > { %627 = vst [vmem:[%s6582_s15 + $0x5e0] sm:$0xff] %v626_v60  ;;  %v632_v63 = vld [vmem:[%s6577_s14 + $0x1198] sm:$0xff]  ;;  %629 = vst [vmem:[%s6582_s15 + $0x5e8] sm:$0xff] %v628_v61  ;;  %v634_v0 = vld [vmem:[%s6577_s14 + $0x1200] sm:$0xff] }
  0x72   : > { %631 = vst [vmem:[%s6582_s15 + $0x5f0] sm:$0xff] %v630_v62  ;;  %633 = vst [vmem:[%s6582_s15 + $0x5f8] sm:$0xff] %v632_v63  ;;  %v636_v1 = vld [vmem:[%s6577_s14 + $0x1208] sm:$0xff]  ;;  %v638_v2 = vld [vmem:[%s6577_s14 + $0x1210] sm:$0xff] }
  0x73   : > { %635 = vst [vmem:[%s6582_s15 + $0x600] sm:$0xff] %v634_v0  ;;  %637 = vst [vmem:[%s6582_s15 + $0x608] sm:$0xff] %v636_v1  ;;  %v640_v3 = vld [vmem:[%s6577_s14 + $0x1218] sm:$0xff]  ;;  %v642_v4 = vld [vmem:[%s6577_s14 + $0x1220] sm:$0xff] }
  0x74   : > { %639 = vst [vmem:[%s6582_s15 + $0x610] sm:$0xff] %v638_v2  ;;  %v644_v5 = vld [vmem:[%s6577_s14 + $0x1228] sm:$0xff]  ;;  %641 = vst [vmem:[%s6582_s15 + $0x618] sm:$0xff] %v640_v3  ;;  %v646_v6 = vld [vmem:[%s6577_s14 + $0x1290] sm:$0xff] }
  0x75   : > { %643 = vst [vmem:[%s6582_s15 + $0x620] sm:$0xff] %v642_v4  ;;  %645 = vst [vmem:[%s6582_s15 + $0x628] sm:$0xff] %v644_v5  ;;  %v648_v7 = vld [vmem:[%s6577_s14 + $0x1298] sm:$0xff]  ;;  %v650_v8 = vld [vmem:[%s6577_s14 + $0x12a0] sm:$0xff] }
  0x76   : > { %647 = vst [vmem:[%s6582_s15 + $0x630] sm:$0xff] %v646_v6  ;;  %649 = vst [vmem:[%s6582_s15 + $0x638] sm:$0xff] %v648_v7  ;;  %v652_v9 = vld [vmem:[%s6577_s14 + $0x12a8] sm:$0xff]  ;;  %v654_v10 = vld [vmem:[%s6577_s14 + $0x12b0] sm:$0xff] }
  0x77   : > { %651 = vst [vmem:[%s6582_s15 + $0x640] sm:$0xff] %v650_v8  ;;  %v656_v11 = vld [vmem:[%s6577_s14 + $0x12b8] sm:$0xff]  ;;  %653 = vst [vmem:[%s6582_s15 + $0x648] sm:$0xff] %v652_v9  ;;  %v658_v12 = vld [vmem:[%s6577_s14 + $0x1320] sm:$0xff] }
  0x78   : > { %655 = vst [vmem:[%s6582_s15 + $0x650] sm:$0xff] %v654_v10  ;;  %657 = vst [vmem:[%s6582_s15 + $0x658] sm:$0xff] %v656_v11  ;;  %v660_v13 = vld [vmem:[%s6577_s14 + $0x1328] sm:$0xff]  ;;  %v662_v14 = vld [vmem:[%s6577_s14 + $0x1330] sm:$0xff] }
  0x79   : > { %659 = vst [vmem:[%s6582_s15 + $0x660] sm:$0xff] %v658_v12  ;;  %661 = vst [vmem:[%s6582_s15 + $0x668] sm:$0xff] %v660_v13  ;;  %v664_v15 = vld [vmem:[%s6577_s14 + $0x1338] sm:$0xff]  ;;  %v666_v16 = vld [vmem:[%s6577_s14 + $0x1340] sm:$0xff] }
  0x7a   : > { %663 = vst [vmem:[%s6582_s15 + $0x670] sm:$0xff] %v662_v14  ;;  %v668_v17 = vld [vmem:[%s6577_s14 + $0x1348] sm:$0xff]  ;;  %665 = vst [vmem:[%s6582_s15 + $0x678] sm:$0xff] %v664_v15  ;;  %v670_v18 = vld [vmem:[%s6577_s14 + $0x13b0] sm:$0xff] }
  0x7b   : > { %667 = vst [vmem:[%s6582_s15 + $0x680] sm:$0xff] %v666_v16  ;;  %669 = vst [vmem:[%s6582_s15 + $0x688] sm:$0xff] %v668_v17  ;;  %v672_v19 = vld [vmem:[%s6577_s14 + $0x13b8] sm:$0xff]  ;;  %v674_v20 = vld [vmem:[%s6577_s14 + $0x13c0] sm:$0xff] }
  0x7c   : > { %671 = vst [vmem:[%s6582_s15 + $0x690] sm:$0xff] %v670_v18  ;;  %673 = vst [vmem:[%s6582_s15 + $0x698] sm:$0xff] %v672_v19  ;;  %v676_v21 = vld [vmem:[%s6577_s14 + $0x13c8] sm:$0xff]  ;;  %v678_v22 = vld [vmem:[%s6577_s14 + $0x13d0] sm:$0xff] }
  0x7d   : > { %675 = vst [vmem:[%s6582_s15 + $0x6a0] sm:$0xff] %v674_v20  ;;  %v680_v23 = vld [vmem:[%s6577_s14 + $0x13d8] sm:$0xff]  ;;  %677 = vst [vmem:[%s6582_s15 + $0x6a8] sm:$0xff] %v676_v21  ;;  %v682_v24 = vld [vmem:[%s6577_s14 + $0x1440] sm:$0xff] }
  0x7e   : > { %679 = vst [vmem:[%s6582_s15 + $0x6b0] sm:$0xff] %v678_v22  ;;  %681 = vst [vmem:[%s6582_s15 + $0x6b8] sm:$0xff] %v680_v23  ;;  %v684_v25 = vld [vmem:[%s6577_s14 + $0x1448] sm:$0xff]  ;;  %v686_v26 = vld [vmem:[%s6577_s14 + $0x1450] sm:$0xff] }
  0x7f   : > { %683 = vst [vmem:[%s6582_s15 + $0x6c0] sm:$0xff] %v682_v24  ;;  %685 = vst [vmem:[%s6582_s15 + $0x6c8] sm:$0xff] %v684_v25  ;;  %v688_v27 = vld [vmem:[%s6577_s14 + $0x1458] sm:$0xff]  ;;  %v690_v28 = vld [vmem:[%s6577_s14 + $0x1460] sm:$0xff] }
  0x80   : > { %687 = vst [vmem:[%s6582_s15 + $0x6d0] sm:$0xff] %v686_v26  ;;  %v692_v29 = vld [vmem:[%s6577_s14 + $0x1468] sm:$0xff]  ;;  %689 = vst [vmem:[%s6582_s15 + $0x6d8] sm:$0xff] %v688_v27  ;;  %v694_v30 = vld [vmem:[%s6577_s14 + $0x14d0] sm:$0xff] }
  0x81   : > { %691 = vst [vmem:[%s6582_s15 + $0x6e0] sm:$0xff] %v690_v28  ;;  %693 = vst [vmem:[%s6582_s15 + $0x6e8] sm:$0xff] %v692_v29  ;;  %v696_v31 = vld [vmem:[%s6577_s14 + $0x14d8] sm:$0xff]  ;;  %v698_v32 = vld [vmem:[%s6577_s14 + $0x14e0] sm:$0xff] }
  0x82   : > { %695 = vst [vmem:[%s6582_s15 + $0x6f0] sm:$0xff] %v694_v30  ;;  %697 = vst [vmem:[%s6582_s15 + $0x6f8] sm:$0xff] %v696_v31  ;;  %v700_v33 = vld [vmem:[%s6577_s14 + $0x14e8] sm:$0xff]  ;;  %v702_v34 = vld [vmem:[%s6577_s14 + $0x14f0] sm:$0xff] }
  0x83   : > { %699 = vst [vmem:[%s6582_s15 + $0x700] sm:$0xff] %v698_v32  ;;  %v704_v35 = vld [vmem:[%s6577_s14 + $0x14f8] sm:$0xff]  ;;  %701 = vst [vmem:[%s6582_s15 + $0x708] sm:$0xff] %v700_v33  ;;  %v706_v36 = vld [vmem:[%s6577_s14 + $0x1560] sm:$0xff] }
  0x84   : > { %703 = vst [vmem:[%s6582_s15 + $0x710] sm:$0xff] %v702_v34  ;;  %705 = vst [vmem:[%s6582_s15 + $0x718] sm:$0xff] %v704_v35  ;;  %v708_v37 = vld [vmem:[%s6577_s14 + $0x1568] sm:$0xff]  ;;  %v710_v38 = vld [vmem:[%s6577_s14 + $0x1570] sm:$0xff] }
  0x85   : > { %707 = vst [vmem:[%s6582_s15 + $0x720] sm:$0xff] %v706_v36  ;;  %709 = vst [vmem:[%s6582_s15 + $0x728] sm:$0xff] %v708_v37  ;;  %v712_v39 = vld [vmem:[%s6577_s14 + $0x1578] sm:$0xff]  ;;  %v714_v40 = vld [vmem:[%s6577_s14 + $0x1580] sm:$0xff] }
  0x86   : > { %711 = vst [vmem:[%s6582_s15 + $0x730] sm:$0xff] %v710_v38  ;;  %v716_v41 = vld [vmem:[%s6577_s14 + $0x1588] sm:$0xff]  ;;  %713 = vst [vmem:[%s6582_s15 + $0x738] sm:$0xff] %v712_v39  ;;  %v718_v42 = vld [vmem:[%s6577_s14 + $0x15f0] sm:$0xff] }
  0x87   : > { %715 = vst [vmem:[%s6582_s15 + $0x740] sm:$0xff] %v714_v40  ;;  %717 = vst [vmem:[%s6582_s15 + $0x748] sm:$0xff] %v716_v41  ;;  %v720_v43 = vld [vmem:[%s6577_s14 + $0x15f8] sm:$0xff]  ;;  %v722_v44 = vld [vmem:[%s6577_s14 + $0x1600] sm:$0xff] }
  0x88   : > { %719 = vst [vmem:[%s6582_s15 + $0x750] sm:$0xff] %v718_v42  ;;  %721 = vst [vmem:[%s6582_s15 + $0x758] sm:$0xff] %v720_v43  ;;  %v724_v45 = vld [vmem:[%s6577_s14 + $0x1608] sm:$0xff]  ;;  %v726_v46 = vld [vmem:[%s6577_s14 + $0x1610] sm:$0xff] }
  0x89   : > { %723 = vst [vmem:[%s6582_s15 + $0x760] sm:$0xff] %v722_v44  ;;  %v728_v47 = vld [vmem:[%s6577_s14 + $0x1618] sm:$0xff]  ;;  %725 = vst [vmem:[%s6582_s15 + $0x768] sm:$0xff] %v724_v45  ;;  %v730_v48 = vld [vmem:[%s6577_s14 + $0x1680] sm:$0xff] }
  0x8a   : > { %727 = vst [vmem:[%s6582_s15 + $0x770] sm:$0xff] %v726_v46  ;;  %729 = vst [vmem:[%s6582_s15 + $0x778] sm:$0xff] %v728_v47  ;;  %v732_v49 = vld [vmem:[%s6577_s14 + $0x1688] sm:$0xff]  ;;  %v734_v50 = vld [vmem:[%s6577_s14 + $0x1690] sm:$0xff] }
  0x8b   : > { %731 = vst [vmem:[%s6582_s15 + $0x780] sm:$0xff] %v730_v48  ;;  %733 = vst [vmem:[%s6582_s15 + $0x788] sm:$0xff] %v732_v49  ;;  %v736_v51 = vld [vmem:[%s6577_s14 + $0x1698] sm:$0xff]  ;;  %v738_v52 = vld [vmem:[%s6577_s14 + $0x16a0] sm:$0xff] }
  0x8c   : > { %735 = vst [vmem:[%s6582_s15 + $0x790] sm:$0xff] %v734_v50  ;;  %v740_v53 = vld [vmem:[%s6577_s14 + $0x16a8] sm:$0xff]  ;;  %737 = vst [vmem:[%s6582_s15 + $0x798] sm:$0xff] %v736_v51  ;;  %v742_v54 = vld [vmem:[%s6577_s14 + $0x1710] sm:$0xff] }
  0x8d   : > { %739 = vst [vmem:[%s6582_s15 + $0x7a0] sm:$0xff] %v738_v52  ;;  %741 = vst [vmem:[%s6582_s15 + $0x7a8] sm:$0xff] %v740_v53  ;;  %v744_v55 = vld [vmem:[%s6577_s14 + $0x1718] sm:$0xff]  ;;  %v746_v56 = vld [vmem:[%s6577_s14 + $0x1720] sm:$0xff] }
  0x8e   : > { %743 = vst [vmem:[%s6582_s15 + $0x7b0] sm:$0xff] %v742_v54  ;;  %745 = vst [vmem:[%s6582_s15 + $0x7b8] sm:$0xff] %v744_v55  ;;  %v748_v57 = vld [vmem:[%s6577_s14 + $0x1728] sm:$0xff]  ;;  %v750_v58 = vld [vmem:[%s6577_s14 + $0x1730] sm:$0xff] }
  0x8f   : > { %747 = vst [vmem:[%s6582_s15 + $0x7c0] sm:$0xff] %v746_v56  ;;  %v752_v59 = vld [vmem:[%s6577_s14 + $0x1738] sm:$0xff]  ;;  %749 = vst [vmem:[%s6582_s15 + $0x7c8] sm:$0xff] %v748_v57  ;;  %v754_v60 = vld [vmem:[%s6577_s14 + $0x17a0] sm:$0xff] }
  0x90   : > { %751 = vst [vmem:[%s6582_s15 + $0x7d0] sm:$0xff] %v750_v58  ;;  %753 = vst [vmem:[%s6582_s15 + $0x7d8] sm:$0xff] %v752_v59  ;;  %v756_v61 = vld [vmem:[%s6577_s14 + $0x17a8] sm:$0xff]  ;;  %v758_v62 = vld [vmem:[%s6577_s14 + $0x17b0] sm:$0xff] }
  0x91   : > { %755 = vst [vmem:[%s6582_s15 + $0x7e0] sm:$0xff] %v754_v60  ;;  %757 = vst [vmem:[%s6582_s15 + $0x7e8] sm:$0xff] %v756_v61  ;;  %v760_v63 = vld [vmem:[%s6577_s14 + $0x17b8] sm:$0xff]  ;;  %v762_v0 = vld [vmem:[%s6577_s14 + $0x17c0] sm:$0xff] }
  0x92   : > { %759 = vst [vmem:[%s6582_s15 + $0x7f0] sm:$0xff] %v758_v62  ;;  %v764_v1 = vld [vmem:[%s6577_s14 + $0x17c8] sm:$0xff]  ;;  %761 = vst [vmem:[%s6582_s15 + $0x7f8] sm:$0xff] %v760_v63  ;;  %v766_v2 = vld [vmem:[%s6577_s14 + $0x1830] sm:$0xff] }
  0x93   : > { %763 = vst [vmem:[%s6582_s15 + $0x800] sm:$0xff] %v762_v0  ;;  %765 = vst [vmem:[%s6582_s15 + $0x808] sm:$0xff] %v764_v1  ;;  %v768_v3 = vld [vmem:[%s6577_s14 + $0x1838] sm:$0xff]  ;;  %v770_v4 = vld [vmem:[%s6577_s14 + $0x1840] sm:$0xff] }
  0x94   : > { %767 = vst [vmem:[%s6582_s15 + $0x810] sm:$0xff] %v766_v2  ;;  %769 = vst [vmem:[%s6582_s15 + $0x818] sm:$0xff] %v768_v3  ;;  %v772_v5 = vld [vmem:[%s6577_s14 + $0x1848] sm:$0xff]  ;;  %v774_v6 = vld [vmem:[%s6577_s14 + $0x1850] sm:$0xff] }
  0x95   : > { %771 = vst [vmem:[%s6582_s15 + $0x820] sm:$0xff] %v770_v4  ;;  %v776_v7 = vld [vmem:[%s6577_s14 + $0x1858] sm:$0xff]  ;;  %773 = vst [vmem:[%s6582_s15 + $0x828] sm:$0xff] %v772_v5  ;;  %v778_v8 = vld [vmem:[%s6577_s14 + $0x18c0] sm:$0xff] }
  0x96   : > { %775 = vst [vmem:[%s6582_s15 + $0x830] sm:$0xff] %v774_v6  ;;  %777 = vst [vmem:[%s6582_s15 + $0x838] sm:$0xff] %v776_v7  ;;  %v780_v9 = vld [vmem:[%s6577_s14 + $0x18c8] sm:$0xff]  ;;  %v782_v10 = vld [vmem:[%s6577_s14 + $0x18d0] sm:$0xff] }
  0x97   : > { %779 = vst [vmem:[%s6582_s15 + $0x840] sm:$0xff] %v778_v8  ;;  %781 = vst [vmem:[%s6582_s15 + $0x848] sm:$0xff] %v780_v9  ;;  %v784_v11 = vld [vmem:[%s6577_s14 + $0x18d8] sm:$0xff]  ;;  %v786_v12 = vld [vmem:[%s6577_s14 + $0x18e0] sm:$0xff] }
  0x98   : > { %783 = vst [vmem:[%s6582_s15 + $0x850] sm:$0xff] %v782_v10  ;;  %v788_v13 = vld [vmem:[%s6577_s14 + $0x18e8] sm:$0xff]  ;;  %785 = vst [vmem:[%s6582_s15 + $0x858] sm:$0xff] %v784_v11  ;;  %v790_v14 = vld [vmem:[%s6577_s14 + $0x1950] sm:$0xff] }
  0x99   : > { %787 = vst [vmem:[%s6582_s15 + $0x860] sm:$0xff] %v786_v12  ;;  %789 = vst [vmem:[%s6582_s15 + $0x868] sm:$0xff] %v788_v13  ;;  %v792_v15 = vld [vmem:[%s6577_s14 + $0x1958] sm:$0xff]  ;;  %v794_v16 = vld [vmem:[%s6577_s14 + $0x1960] sm:$0xff] }
  0x9a   : > { %791 = vst [vmem:[%s6582_s15 + $0x870] sm:$0xff] %v790_v14  ;;  %793 = vst [vmem:[%s6582_s15 + $0x878] sm:$0xff] %v792_v15  ;;  %v796_v17 = vld [vmem:[%s6577_s14 + $0x1968] sm:$0xff]  ;;  %v798_v18 = vld [vmem:[%s6577_s14 + $0x1970] sm:$0xff] }
  0x9b   : > { %795 = vst [vmem:[%s6582_s15 + $0x880] sm:$0xff] %v794_v16  ;;  %v800_v19 = vld [vmem:[%s6577_s14 + $0x1978] sm:$0xff]  ;;  %797 = vst [vmem:[%s6582_s15 + $0x888] sm:$0xff] %v796_v17  ;;  %v802_v20 = vld [vmem:[%s6577_s14 + $0x19e0] sm:$0xff] }
  0x9c   : > { %799 = vst [vmem:[%s6582_s15 + $0x890] sm:$0xff] %v798_v18  ;;  %801 = vst [vmem:[%s6582_s15 + $0x898] sm:$0xff] %v800_v19  ;;  %v804_v21 = vld [vmem:[%s6577_s14 + $0x19e8] sm:$0xff]  ;;  %v806_v22 = vld [vmem:[%s6577_s14 + $0x19f0] sm:$0xff] }
  0x9d   : > { %803 = vst [vmem:[%s6582_s15 + $0x8a0] sm:$0xff] %v802_v20  ;;  %805 = vst [vmem:[%s6582_s15 + $0x8a8] sm:$0xff] %v804_v21  ;;  %v808_v23 = vld [vmem:[%s6577_s14 + $0x19f8] sm:$0xff]  ;;  %v810_v24 = vld [vmem:[%s6577_s14 + $0x1a00] sm:$0xff] }
  0x9e   : > { %807 = vst [vmem:[%s6582_s15 + $0x8b0] sm:$0xff] %v806_v22  ;;  %v812_v25 = vld [vmem:[%s6577_s14 + $0x1a08] sm:$0xff]  ;;  %809 = vst [vmem:[%s6582_s15 + $0x8b8] sm:$0xff] %v808_v23  ;;  %v814_v26 = vld [vmem:[%s6577_s14 + $0x1a70] sm:$0xff] }
  0x9f   : > { %811 = vst [vmem:[%s6582_s15 + $0x8c0] sm:$0xff] %v810_v24  ;;  %813 = vst [vmem:[%s6582_s15 + $0x8c8] sm:$0xff] %v812_v25  ;;  %v816_v27 = vld [vmem:[%s6577_s14 + $0x1a78] sm:$0xff]  ;;  %v818_v28 = vld [vmem:[%s6577_s14 + $0x1a80] sm:$0xff] }
  0xa0   : > { %815 = vst [vmem:[%s6582_s15 + $0x8d0] sm:$0xff] %v814_v26  ;;  %817 = vst [vmem:[%s6582_s15 + $0x8d8] sm:$0xff] %v816_v27  ;;  %v820_v29 = vld [vmem:[%s6577_s14 + $0x1a88] sm:$0xff]  ;;  %v822_v30 = vld [vmem:[%s6577_s14 + $0x1a90] sm:$0xff] }
  0xa1   : > { %819 = vst [vmem:[%s6582_s15 + $0x8e0] sm:$0xff] %v818_v28  ;;  %v824_v31 = vld [vmem:[%s6577_s14 + $0x1a98] sm:$0xff]  ;;  %821 = vst [vmem:[%s6582_s15 + $0x8e8] sm:$0xff] %v820_v29  ;;  %v826_v32 = vld [vmem:[%s6577_s14 + $0x1b00] sm:$0xff] }
  0xa2   : > { %823 = vst [vmem:[%s6582_s15 + $0x8f0] sm:$0xff] %v822_v30  ;;  %825 = vst [vmem:[%s6582_s15 + $0x8f8] sm:$0xff] %v824_v31  ;;  %v828_v33 = vld [vmem:[%s6577_s14 + $0x1b08] sm:$0xff]  ;;  %v830_v34 = vld [vmem:[%s6577_s14 + $0x1b10] sm:$0xff] }
  0xa3   : > { %827 = vst [vmem:[%s6582_s15 + $0x900] sm:$0xff] %v826_v32  ;;  %829 = vst [vmem:[%s6582_s15 + $0x908] sm:$0xff] %v828_v33  ;;  %v832_v35 = vld [vmem:[%s6577_s14 + $0x1b18] sm:$0xff]  ;;  %v834_v36 = vld [vmem:[%s6577_s14 + $0x1b20] sm:$0xff] }
  0xa4   : > { %831 = vst [vmem:[%s6582_s15 + $0x910] sm:$0xff] %v830_v34  ;;  %v836_v37 = vld [vmem:[%s6577_s14 + $0x1b28] sm:$0xff]  ;;  %833 = vst [vmem:[%s6582_s15 + $0x918] sm:$0xff] %v832_v35  ;;  %v838_v38 = vld [vmem:[%s6577_s14 + $0x1b90] sm:$0xff] }
  0xa5   : > { %835 = vst [vmem:[%s6582_s15 + $0x920] sm:$0xff] %v834_v36  ;;  %837 = vst [vmem:[%s6582_s15 + $0x928] sm:$0xff] %v836_v37  ;;  %v840_v39 = vld [vmem:[%s6577_s14 + $0x1b98] sm:$0xff]  ;;  %v842_v40 = vld [vmem:[%s6577_s14 + $0x1ba0] sm:$0xff] }
  0xa6   : > { %839 = vst [vmem:[%s6582_s15 + $0x930] sm:$0xff] %v838_v38  ;;  %841 = vst [vmem:[%s6582_s15 + $0x938] sm:$0xff] %v840_v39  ;;  %v844_v41 = vld [vmem:[%s6577_s14 + $0x1ba8] sm:$0xff]  ;;  %v846_v42 = vld [vmem:[%s6577_s14 + $0x1bb0] sm:$0xff] }
  0xa7   : > { %843 = vst [vmem:[%s6582_s15 + $0x940] sm:$0xff] %v842_v40  ;;  %v848_v43 = vld [vmem:[%s6577_s14 + $0x1bb8] sm:$0xff]  ;;  %845 = vst [vmem:[%s6582_s15 + $0x948] sm:$0xff] %v844_v41  ;;  %v850_v44 = vld [vmem:[%s6577_s14 + $0x1c20] sm:$0xff] }
  0xa8   : > { %847 = vst [vmem:[%s6582_s15 + $0x950] sm:$0xff] %v846_v42  ;;  %849 = vst [vmem:[%s6582_s15 + $0x958] sm:$0xff] %v848_v43  ;;  %v852_v45 = vld [vmem:[%s6577_s14 + $0x1c28] sm:$0xff]  ;;  %v854_v46 = vld [vmem:[%s6577_s14 + $0x1c30] sm:$0xff] }
  0xa9   : > { %851 = vst [vmem:[%s6582_s15 + $0x960] sm:$0xff] %v850_v44  ;;  %853 = vst [vmem:[%s6582_s15 + $0x968] sm:$0xff] %v852_v45  ;;  %v856_v47 = vld [vmem:[%s6577_s14 + $0x1c38] sm:$0xff]  ;;  %v858_v48 = vld [vmem:[%s6577_s14 + $0x1c40] sm:$0xff] }
  0xaa   : > { %855 = vst [vmem:[%s6582_s15 + $0x970] sm:$0xff] %v854_v46  ;;  %v860_v49 = vld [vmem:[%s6577_s14 + $0x1c48] sm:$0xff]  ;;  %857 = vst [vmem:[%s6582_s15 + $0x978] sm:$0xff] %v856_v47  ;;  %v862_v50 = vld [vmem:[%s6577_s14 + $0x1cb0] sm:$0xff] }
  0xab   : > { %859 = vst [vmem:[%s6582_s15 + $0x980] sm:$0xff] %v858_v48  ;;  %861 = vst [vmem:[%s6582_s15 + $0x988] sm:$0xff] %v860_v49  ;;  %v864_v51 = vld [vmem:[%s6577_s14 + $0x1cb8] sm:$0xff]  ;;  %v866_v52 = vld [vmem:[%s6577_s14 + $0x1cc0] sm:$0xff] }
  0xac   : > { %863 = vst [vmem:[%s6582_s15 + $0x990] sm:$0xff] %v862_v50  ;;  %865 = vst [vmem:[%s6582_s15 + $0x998] sm:$0xff] %v864_v51  ;;  %v868_v53 = vld [vmem:[%s6577_s14 + $0x1cc8] sm:$0xff]  ;;  %v870_v54 = vld [vmem:[%s6577_s14 + $0x1cd0] sm:$0xff] }
  0xad   : > { %867 = vst [vmem:[%s6582_s15 + $0x9a0] sm:$0xff] %v866_v52  ;;  %v872_v55 = vld [vmem:[%s6577_s14 + $0x1cd8] sm:$0xff]  ;;  %869 = vst [vmem:[%s6582_s15 + $0x9a8] sm:$0xff] %v868_v53  ;;  %v874_v56 = vld [vmem:[%s6577_s14 + $0x1d40] sm:$0xff] }
  0xae   : > { %871 = vst [vmem:[%s6582_s15 + $0x9b0] sm:$0xff] %v870_v54  ;;  %873 = vst [vmem:[%s6582_s15 + $0x9b8] sm:$0xff] %v872_v55  ;;  %v876_v57 = vld [vmem:[%s6577_s14 + $0x1d48] sm:$0xff]  ;;  %v878_v58 = vld [vmem:[%s6577_s14 + $0x1d50] sm:$0xff] }
  0xaf   : > { %875 = vst [vmem:[%s6582_s15 + $0x9c0] sm:$0xff] %v874_v56  ;;  %877 = vst [vmem:[%s6582_s15 + $0x9c8] sm:$0xff] %v876_v57  ;;  %v880_v59 = vld [vmem:[%s6577_s14 + $0x1d58] sm:$0xff]  ;;  %v882_v60 = vld [vmem:[%s6577_s14 + $0x1d60] sm:$0xff] }
  0xb0   : > { %879 = vst [vmem:[%s6582_s15 + $0x9d0] sm:$0xff] %v878_v58  ;;  %v884_v61 = vld [vmem:[%s6577_s14 + $0x1d68] sm:$0xff]  ;;  %881 = vst [vmem:[%s6582_s15 + $0x9d8] sm:$0xff] %v880_v59  ;;  %v886_v62 = vld [vmem:[%s6577_s14 + $0x1dd0] sm:$0xff] }
  0xb1   : > { %883 = vst [vmem:[%s6582_s15 + $0x9e0] sm:$0xff] %v882_v60  ;;  %885 = vst [vmem:[%s6582_s15 + $0x9e8] sm:$0xff] %v884_v61  ;;  %v888_v63 = vld [vmem:[%s6577_s14 + $0x1dd8] sm:$0xff]  ;;  %v890_v0 = vld [vmem:[%s6577_s14 + $0x1de0] sm:$0xff] }
  0xb2   : > { %887 = vst [vmem:[%s6582_s15 + $0x9f0] sm:$0xff] %v886_v62  ;;  %889 = vst [vmem:[%s6582_s15 + $0x9f8] sm:$0xff] %v888_v63  ;;  %v892_v1 = vld [vmem:[%s6577_s14 + $0x1de8] sm:$0xff]  ;;  %v894_v2 = vld [vmem:[%s6577_s14 + $0x1df0] sm:$0xff] }
  0xb3   : > { %891 = vst [vmem:[%s6582_s15 + $0xa00] sm:$0xff] %v890_v0  ;;  %v896_v3 = vld [vmem:[%s6577_s14 + $0x1df8] sm:$0xff]  ;;  %893 = vst [vmem:[%s6582_s15 + $0xa08] sm:$0xff] %v892_v1  ;;  %v898_v4 = vld [vmem:[%s6577_s14 + $0x1e60] sm:$0xff] }
  0xb4   : > { %895 = vst [vmem:[%s6582_s15 + $0xa10] sm:$0xff] %v894_v2  ;;  %897 = vst [vmem:[%s6582_s15 + $0xa18] sm:$0xff] %v896_v3  ;;  %v900_v5 = vld [vmem:[%s6577_s14 + $0x1e68] sm:$0xff]  ;;  %v902_v6 = vld [vmem:[%s6577_s14 + $0x1e70] sm:$0xff] }
  0xb5   : > { %899 = vst [vmem:[%s6582_s15 + $0xa20] sm:$0xff] %v898_v4  ;;  %901 = vst [vmem:[%s6582_s15 + $0xa28] sm:$0xff] %v900_v5  ;;  %v904_v7 = vld [vmem:[%s6577_s14 + $0x1e78] sm:$0xff]  ;;  %v906_v8 = vld [vmem:[%s6577_s14 + $0x1e80] sm:$0xff] }
  0xb6   : > { %903 = vst [vmem:[%s6582_s15 + $0xa30] sm:$0xff] %v902_v6  ;;  %v908_v9 = vld [vmem:[%s6577_s14 + $0x1e88] sm:$0xff]  ;;  %905 = vst [vmem:[%s6582_s15 + $0xa38] sm:$0xff] %v904_v7  ;;  %v910_v10 = vld [vmem:[%s6577_s14 + $0x1ef0] sm:$0xff] }
  0xb7   : > { %907 = vst [vmem:[%s6582_s15 + $0xa40] sm:$0xff] %v906_v8  ;;  %909 = vst [vmem:[%s6582_s15 + $0xa48] sm:$0xff] %v908_v9  ;;  %v912_v11 = vld [vmem:[%s6577_s14 + $0x1ef8] sm:$0xff]  ;;  %v914_v12 = vld [vmem:[%s6577_s14 + $0x1f00] sm:$0xff] }
  0xb8   : > { %911 = vst [vmem:[%s6582_s15 + $0xa50] sm:$0xff] %v910_v10  ;;  %913 = vst [vmem:[%s6582_s15 + $0xa58] sm:$0xff] %v912_v11  ;;  %v916_v13 = vld [vmem:[%s6577_s14 + $0x1f08] sm:$0xff]  ;;  %v918_v14 = vld [vmem:[%s6577_s14 + $0x1f10] sm:$0xff] }
  0xb9   : > { %915 = vst [vmem:[%s6582_s15 + $0xa60] sm:$0xff] %v914_v12  ;;  %v920_v15 = vld [vmem:[%s6577_s14 + $0x1f18] sm:$0xff]  ;;  %917 = vst [vmem:[%s6582_s15 + $0xa68] sm:$0xff] %v916_v13  ;;  %v922_v16 = vld [vmem:[%s6577_s14 + $0x1f80] sm:$0xff] }
  0xba   : > { %919 = vst [vmem:[%s6582_s15 + $0xa70] sm:$0xff] %v918_v14  ;;  %921 = vst [vmem:[%s6582_s15 + $0xa78] sm:$0xff] %v920_v15  ;;  %v924_v17 = vld [vmem:[%s6577_s14 + $0x1f88] sm:$0xff]  ;;  %v926_v18 = vld [vmem:[%s6577_s14 + $0x1f90] sm:$0xff] }
  0xbb   : > { %923 = vst [vmem:[%s6582_s15 + $0xa80] sm:$0xff] %v922_v16  ;;  %925 = vst [vmem:[%s6582_s15 + $0xa88] sm:$0xff] %v924_v17  ;;  %v928_v19 = vld [vmem:[%s6577_s14 + $0x1f98] sm:$0xff]  ;;  %v930_v20 = vld [vmem:[%s6577_s14 + $0x1fa0] sm:$0xff] }
  0xbc   : > { %927 = vst [vmem:[%s6582_s15 + $0xa90] sm:$0xff] %v926_v18  ;;  %v932_v21 = vld [vmem:[%s6577_s14 + $0x1fa8] sm:$0xff]  ;;  %929 = vst [vmem:[%s6582_s15 + $0xa98] sm:$0xff] %v928_v19  ;;  %v934_v22 = vld [vmem:[%s6577_s14 + $0x2010] sm:$0xff] }
  0xbd   : > { %931 = vst [vmem:[%s6582_s15 + $0xaa0] sm:$0xff] %v930_v20  ;;  %933 = vst [vmem:[%s6582_s15 + $0xaa8] sm:$0xff] %v932_v21  ;;  %v936_v23 = vld [vmem:[%s6577_s14 + $0x2018] sm:$0xff]  ;;  %v938_v24 = vld [vmem:[%s6577_s14 + $0x2020] sm:$0xff] }
  0xbe   : > { %935 = vst [vmem:[%s6582_s15 + $0xab0] sm:$0xff] %v934_v22  ;;  %937 = vst [vmem:[%s6582_s15 + $0xab8] sm:$0xff] %v936_v23  ;;  %v940_v25 = vld [vmem:[%s6577_s14 + $0x2028] sm:$0xff]  ;;  %v942_v26 = vld [vmem:[%s6577_s14 + $0x2030] sm:$0xff] }
  0xbf   : > { %939 = vst [vmem:[%s6582_s15 + $0xac0] sm:$0xff] %v938_v24  ;;  %v944_v27 = vld [vmem:[%s6577_s14 + $0x2038] sm:$0xff]  ;;  %941 = vst [vmem:[%s6582_s15 + $0xac8] sm:$0xff] %v940_v25  ;;  %v946_v28 = vld [vmem:[%s6577_s14 + $0x20a0] sm:$0xff] }
  0xc0   : > { %943 = vst [vmem:[%s6582_s15 + $0xad0] sm:$0xff] %v942_v26  ;;  %945 = vst [vmem:[%s6582_s15 + $0xad8] sm:$0xff] %v944_v27  ;;  %v948_v29 = vld [vmem:[%s6577_s14 + $0x20a8] sm:$0xff]  ;;  %v950_v30 = vld [vmem:[%s6577_s14 + $0x20b0] sm:$0xff] }
  0xc1   : > { %947 = vst [vmem:[%s6582_s15 + $0xae0] sm:$0xff] %v946_v28  ;;  %949 = vst [vmem:[%s6582_s15 + $0xae8] sm:$0xff] %v948_v29  ;;  %v952_v31 = vld [vmem:[%s6577_s14 + $0x20b8] sm:$0xff]  ;;  %v954_v32 = vld [vmem:[%s6577_s14 + $0x20c0] sm:$0xff] }
  0xc2   : > { %951 = vst [vmem:[%s6582_s15 + $0xaf0] sm:$0xff] %v950_v30  ;;  %v956_v33 = vld [vmem:[%s6577_s14 + $0x20c8] sm:$0xff]  ;;  %953 = vst [vmem:[%s6582_s15 + $0xaf8] sm:$0xff] %v952_v31  ;;  %v958_v34 = vld [vmem:[%s6577_s14 + $0x2130] sm:$0xff] }
  0xc3   : > { %955 = vst [vmem:[%s6582_s15 + $0xb00] sm:$0xff] %v954_v32  ;;  %957 = vst [vmem:[%s6582_s15 + $0xb08] sm:$0xff] %v956_v33  ;;  %v960_v35 = vld [vmem:[%s6577_s14 + $0x2138] sm:$0xff]  ;;  %v962_v36 = vld [vmem:[%s6577_s14 + $0x2140] sm:$0xff] }
  0xc4   : > { %959 = vst [vmem:[%s6582_s15 + $0xb10] sm:$0xff] %v958_v34  ;;  %961 = vst [vmem:[%s6582_s15 + $0xb18] sm:$0xff] %v960_v35  ;;  %v964_v37 = vld [vmem:[%s6577_s14 + $0x2148] sm:$0xff]  ;;  %v966_v38 = vld [vmem:[%s6577_s14 + $0x2150] sm:$0xff] }
  0xc5   : > { %963 = vst [vmem:[%s6582_s15 + $0xb20] sm:$0xff] %v962_v36  ;;  %v968_v39 = vld [vmem:[%s6577_s14 + $0x2158] sm:$0xff]  ;;  %965 = vst [vmem:[%s6582_s15 + $0xb28] sm:$0xff] %v964_v37  ;;  %v970_v40 = vld [vmem:[%s6577_s14 + $0x21c0] sm:$0xff] }
  0xc6   : > { %967 = vst [vmem:[%s6582_s15 + $0xb30] sm:$0xff] %v966_v38  ;;  %969 = vst [vmem:[%s6582_s15 + $0xb38] sm:$0xff] %v968_v39  ;;  %v972_v41 = vld [vmem:[%s6577_s14 + $0x21c8] sm:$0xff]  ;;  %v974_v42 = vld [vmem:[%s6577_s14 + $0x21d0] sm:$0xff] }
  0xc7   : > { %971 = vst [vmem:[%s6582_s15 + $0xb40] sm:$0xff] %v970_v40  ;;  %973 = vst [vmem:[%s6582_s15 + $0xb48] sm:$0xff] %v972_v41  ;;  %v976_v43 = vld [vmem:[%s6577_s14 + $0x21d8] sm:$0xff]  ;;  %v978_v44 = vld [vmem:[%s6577_s14 + $0x21e0] sm:$0xff] }
  0xc8   : > { %975 = vst [vmem:[%s6582_s15 + $0xb50] sm:$0xff] %v974_v42  ;;  %v980_v45 = vld [vmem:[%s6577_s14 + $0x21e8] sm:$0xff]  ;;  %977 = vst [vmem:[%s6582_s15 + $0xb58] sm:$0xff] %v976_v43  ;;  %v982_v46 = vld [vmem:[%s6577_s14 + $0x2250] sm:$0xff] }
  0xc9   : > { %979 = vst [vmem:[%s6582_s15 + $0xb60] sm:$0xff] %v978_v44  ;;  %981 = vst [vmem:[%s6582_s15 + $0xb68] sm:$0xff] %v980_v45  ;;  %v984_v47 = vld [vmem:[%s6577_s14 + $0x2258] sm:$0xff]  ;;  %v986_v48 = vld [vmem:[%s6577_s14 + $0x2260] sm:$0xff] }
  0xca   : > { %983 = vst [vmem:[%s6582_s15 + $0xb70] sm:$0xff] %v982_v46  ;;  %985 = vst [vmem:[%s6582_s15 + $0xb78] sm:$0xff] %v984_v47  ;;  %v988_v49 = vld [vmem:[%s6577_s14 + $0x2268] sm:$0xff]  ;;  %v990_v50 = vld [vmem:[%s6577_s14 + $0x2270] sm:$0xff] }
  0xcb   : > { %987 = vst [vmem:[%s6582_s15 + $0xb80] sm:$0xff] %v986_v48  ;;  %v992_v51 = vld [vmem:[%s6577_s14 + $0x2278] sm:$0xff]  ;;  %989 = vst [vmem:[%s6582_s15 + $0xb88] sm:$0xff] %v988_v49  ;;  %v994_v52 = vld [vmem:[%s6577_s14 + $0x22e0] sm:$0xff] }
  0xcc   : > { %991 = vst [vmem:[%s6582_s15 + $0xb90] sm:$0xff] %v990_v50  ;;  %993 = vst [vmem:[%s6582_s15 + $0xb98] sm:$0xff] %v992_v51  ;;  %v996_v53 = vld [vmem:[%s6577_s14 + $0x22e8] sm:$0xff]  ;;  %v998_v54 = vld [vmem:[%s6577_s14 + $0x22f0] sm:$0xff] }
  0xcd   : > { %995 = vst [vmem:[%s6582_s15 + $0xba0] sm:$0xff] %v994_v52  ;;  %997 = vst [vmem:[%s6582_s15 + $0xba8] sm:$0xff] %v996_v53  ;;  %v1000_v55 = vld [vmem:[%s6577_s14 + $0x22f8] sm:$0xff]  ;;  %v1002_v56 = vld [vmem:[%s6577_s14 + $0x2300] sm:$0xff] }
  0xce   : > { %999 = vst [vmem:[%s6582_s15 + $0xbb0] sm:$0xff] %v998_v54  ;;  %v1004_v57 = vld [vmem:[%s6577_s14 + $0x2308] sm:$0xff]  ;;  %1001 = vst [vmem:[%s6582_s15 + $0xbb8] sm:$0xff] %v1000_v55  ;;  %v1006_v58 = vld [vmem:[%s6577_s14 + $0x2370] sm:$0xff] }
  0xcf   : > { %1003 = vst [vmem:[%s6582_s15 + $0xbc0] sm:$0xff] %v1002_v56  ;;  %1005 = vst [vmem:[%s6582_s15 + $0xbc8] sm:$0xff] %v1004_v57  ;;  %v1008_v59 = vld [vmem:[%s6577_s14 + $0x2378] sm:$0xff]  ;;  %v1010_v60 = vld [vmem:[%s6577_s14 + $0x2380] sm:$0xff] }
  0xd0   : > { %1007 = vst [vmem:[%s6582_s15 + $0xbd0] sm:$0xff] %v1006_v58  ;;  %1009 = vst [vmem:[%s6582_s15 + $0xbd8] sm:$0xff] %v1008_v59  ;;  %v1012_v61 = vld [vmem:[%s6577_s14 + $0x2388] sm:$0xff]  ;;  %v1014_v62 = vld [vmem:[%s6577_s14 + $0x2390] sm:$0xff] }
  0xd1   : > { %1011 = vst [vmem:[%s6582_s15 + $0xbe0] sm:$0xff] %v1010_v60  ;;  %v1016_v63 = vld [vmem:[%s6577_s14 + $0x2398] sm:$0xff]  ;;  %1013 = vst [vmem:[%s6582_s15 + $0xbe8] sm:$0xff] %v1012_v61 }
  0xd2   : > { %1015 = vst [vmem:[%s6582_s15 + $0xbf0] sm:$0xff] %v1014_v62  ;;  %1017 = vst [vmem:[%s6582_s15 + $0xbf8] sm:$0xff] %v1016_v63 }
  0xd3 PF: > { %p5120_p5 = scmp.ge.s32.totalorder %s6499_s26, 1  ;;  %p1022_p6 = scmp.lt.s32.totalorder %s6499_s26, 4 }
  0xd5   : > { %p1023_p7 = pnand %p5120_p5, %p1022_p6 }
  0xd6   : > { %v1068_v0 = vld [vmem:[%s8299_s1] sm:$0xff] (!%p1023_p7)  ;;  %vm1106_vm0 = vcmask (!%p1023_p7), 1042432   ;;  %vm1107_vm1 = vcmask (!%p1023_p7), 1043456   ;;  %v1069_v1 = vld [vmem:[%s8299_s1 + $0x8] sm:$0xff] (!%p1023_p7)  ;;  %v6501_v3 = vmov (!%p1023_p7), 65535   ;;  %v6502_v6 = vmov (!%p1023_p7), 0  }
  0xd7   : > { %1026 = sbr.rel (%p1023_p7) target bundleno = 1270 (0x4f6), region = 67  ;;  %v5124_v2 = vcombine.high (!%p1023_p7), %v1068_v0, %v1068_v0  ;;  %v1108_v4 = vsel (!%p1023_p7), %vm1106_vm0, 4294967295, %v6501_v3  ;;  %v5123_v5 = vcombine.low (!%p1023_p7), %v1068_v0, %v1068_v0  ;;  %1154 = vmatprep.mubr.bf16.mxu0 (!%p1023_p7), %v6502_v6  ;;  %1195 = vmatprep.mubr.bf16.mxu1 (!%p1023_p7), %v6502_v6  ;;  %s1029_s20 = sand.u32 (!%p1023_p7), 1, %s6491_s24   ;;  %v5126_v8 = vcombine.high (!%p1023_p7), %v1069_v1, %v1069_v1  ;;  %v1067_v12 = vld [vmem:[%s8298_s0] sm:$0x1] (!%p1023_p7) }
  0xd8   : > { %v1109_v7 = vsel (!%p1023_p7), %vm1107_vm1, %v1108_v4, 0  ;;  %v5125_v9 = vcombine.low (!%p1023_p7), %v1069_v1, %v1069_v1  ;;  %s5678_s21 = smul.u32 (!%p1023_p7), 3072, %s1029_s20  ;;  %vm1102_vm2 = vcmask (!%p1023_p7), 56320   ;;  %vm4008_vm3 = vcmask (!%p1023_p7), 1040384   ;;  %p1061_p8 = scmp.lt.s32.totalorder (!%p1023_p7), %s5115_s27, 2 }
  0xd9   : > { %v1114_v10 = vand.u32 (!%p1023_p7), %v5124_v2, %v1109_v7  ;;  %v1111_v11 = vand.u32 (!%p1023_p7), %v5123_v5, %v1109_v7  ;;  %v1120_v13 = vand.u32 (!%p1023_p7), %v5126_v8, %v1109_v7  ;;  %vm4011_vm4 = vcmask (!%p1023_p7), 1041409  }
  0xda   : > { %v1117_v14 = vand.u32 (!%p1023_p7), %v5125_v9, %v1109_v7  ;;  %s7361_s29 = scalar_lea.vmem (!%p1023_p7), [#allocation2], %s5678_s21  ;;  %vm4014_vm5 = vcmask (!%p1023_p7), 1042434   ;;  %vm4017_vm6 = vcmask (!%p1023_p7), 1043459   ;;  %vm4020_vm7 = vcmask (!%p1023_p7), 1044484  }
  0xdb   : > { %1122 = vmatprep.subr.bf16.mxu0 (!%p1023_p7), %v1114_v10  ;;  %v5709_v15 = vld [vmem:[%s7361_s29] ss:$48 sps:$4 sm:$0xff] (!%p1023_p7)   ;;  %1163 = vmatprep.subr.bf16.mxu1 (!%p1023_p7), %v1120_v13  ;;  %v5711_v16 = vld [vmem:[%s7361_s29 + $0x4] ss:$48 sps:$4 sm:$0xff] (!%p1023_p7)   ;;  %v5712_v17 = vld [vmem:[%s7361_s29 + $0x8] ss:$48 sps:$4 sm:$0xff] (!%p1023_p7)  }
  0xdc   : > { %1123 = vmatpush1.bf16.msra.mxu0 (!%p1023_p7), %v1111_v11  ;;  %1164 = vmatpush1.bf16.msra.mxu1 (!%p1023_p7), %v1117_v14  ;;  %v5714_v18 = vld [vmem:[%s7361_s29 + $0xc] ss:$48 sps:$4 sm:$0xff] (!%p1023_p7)   ;;  %v5717_v19 = vld [vmem:[%s7361_s29 + $0x64] ss:$48 sps:$4 sm:$0xff] (!%p1023_p7)   ;;  %v5715_v20 = vld [vmem:[%s7361_s29 + $0x60] ss:$48 sps:$4 sm:$0xff] (!%p1023_p7)  }
  0xdd   : > { %3516 = vmatprep.subr.bf16.mxu0 (!%p1023_p7), %v5711_v16  ;;  %3598 = vmatprep.subr.bf16.mxu1 (!%p1023_p7), %v5714_v18  ;;  %v5720_v21 = vld [vmem:[%s7361_s29 + $0x6c] ss:$48 sps:$4 sm:$0xff] (!%p1023_p7)   ;;  %v5718_v22 = vld [vmem:[%s7361_s29 + $0x68] ss:$48 sps:$4 sm:$0xff] (!%p1023_p7)   ;;  %v5723_v23 = vld [vmem:[%s7361_s29 + $0xc4] ss:$48 sps:$4 sm:$0xff] (!%p1023_p7)  }
  0xde   : > { %v5726_v24 = vld [vmem:[%s7361_s29 + $0xcc] ss:$48 sps:$4 sm:$0xff]   ;;  %v5721_v25 = vld [vmem:[%s7361_s29 + $0xc0] ss:$48 sps:$4 sm:$0xff]   ;;  %v5724_v26 = vld [vmem:[%s7361_s29 + $0xc8] ss:$48 sps:$4 sm:$0xff]  }
  0xdf   : > { %5127 = vmatmul.mubr.msk.bf16.vlgmr.msra.gmra.mrb[0].mxu0 %vm1102_vm2, %v1067_v12  ;;  %5128 = vmatmul.mubr.msk.bf16.vlgmr.msra.gmra.mrb[0].mxu1 %vm1102_vm2, %v1067_v12  ;;  %v5729_v27 = vld [vmem:[%s7361_s29 + $0x124] ss:$48 sps:$4 sm:$0xff]   ;;  %v5732_v28 = vld [vmem:[%s7361_s29 + $0x12c] ss:$48 sps:$4 sm:$0xff]   ;;  %v5727_v29 = vld [vmem:[%s7361_s29 + $0x120] ss:$48 sps:$4 sm:$0xff]  }
  0xe0   : > { %3517 = vmatpush1.bf16.msra.mxu0 %v5709_v15  ;;  %3599 = vmatpush1.bf16.msra.mxu1 %v5712_v17  ;;  %v5730_v30 = vld [vmem:[%s7361_s29 + $0x128] ss:$48 sps:$4 sm:$0xff]   ;;  %v5735_v31 = vld [vmem:[%s7361_s29 + $0x184] ss:$48 sps:$4 sm:$0xff]   ;;  %v5738_v32 = vld [vmem:[%s7361_s29 + $0x18c] ss:$48 sps:$4 sm:$0xff]   ;;  %v1072_v17 = vlaneseq }
  0xe1   : > { %3518 = vmatprep.subr.bf16.mxu0 %v5717_v19  ;;  %3600 = vmatprep.subr.bf16.mxu1 %v5720_v21  ;;  %v5733_v33 = vld [vmem:[%s7361_s29 + $0x180] ss:$48 sps:$4 sm:$0xff]   ;;  %v5736_v34 = vld [vmem:[%s7361_s29 + $0x188] ss:$48 sps:$4 sm:$0xff]   ;;  %v5741_v35 = vld [vmem:[%s7361_s29 + $0x1e4] ss:$48 sps:$4 sm:$0xff]  }
  0xe2   : > { %v5744_v36 = vld [vmem:[%s7361_s29 + $0x1ec] ss:$48 sps:$4 sm:$0xff]   ;;  %v5739_v37 = vld [vmem:[%s7361_s29 + $0x1e0] ss:$48 sps:$4 sm:$0xff]   ;;  %v5742_v38 = vld [vmem:[%s7361_s29 + $0x1e8] ss:$48 sps:$4 sm:$0xff]  }
  0xe3   : > { %v5747_v39 = vld [vmem:[%s7361_s29 + $0x244] ss:$48 sps:$4 sm:$0xff]   ;;  %v5750_v40 = vld [vmem:[%s7361_s29 + $0x24c] ss:$48 sps:$4 sm:$0xff]   ;;  %v5745_v41 = vld [vmem:[%s7361_s29 + $0x240] ss:$48 sps:$4 sm:$0xff]  }
  0xe4   : > { %3519 = vmatpush1.bf16.msra.mxu0 %v5715_v20  ;;  %3601 = vmatpush1.bf16.msra.mxu1 %v5718_v22  ;;  %v5748_v42 = vld [vmem:[%s7361_s29 + $0x248] ss:$48 sps:$4 sm:$0xff]   ;;  %v5753_v43 = vld [vmem:[%s7361_s29 + $0x2a4] ss:$48 sps:$4 sm:$0xff]   ;;  %v5756_v44 = vld [vmem:[%s7361_s29 + $0x2ac] ss:$48 sps:$4 sm:$0xff]  }
  0xe5   : > { %3520 = vmatprep.subr.bf16.mxu0 %v5723_v23  ;;  %3602 = vmatprep.subr.bf16.mxu1 %v5726_v24  ;;  %v5751_v45 = vld [vmem:[%s7361_s29 + $0x2a0] ss:$48 sps:$4 sm:$0xff]   ;;  %v5754_v46 = vld [vmem:[%s7361_s29 + $0x2a8] ss:$48 sps:$4 sm:$0xff]   ;;  %v5759_v47 = vld [vmem:[%s7361_s29 + $0x304] ss:$48 sps:$4 sm:$0xff]  }
  0xe6   : > { %v5762_v48 = vld [vmem:[%s7361_s29 + $0x30c] ss:$48 sps:$4 sm:$0xff]   ;;  %v5757_v49 = vld [vmem:[%s7361_s29 + $0x300] ss:$48 sps:$4 sm:$0xff]   ;;  %v5760_v50 = vld [vmem:[%s7361_s29 + $0x308] ss:$48 sps:$4 sm:$0xff]  }
  0xe7   : > { %v5765_v51 = vld [vmem:[%s7361_s29 + $0x364] ss:$48 sps:$4 sm:$0xff]   ;;  %v5763_v52 = vld [vmem:[%s7361_s29 + $0x360] ss:$48 sps:$4 sm:$0xff]   ;;  %v5768_v53 = vld [vmem:[%s7361_s29 + $0x36c] ss:$48 sps:$4 sm:$0xff]  }
  0xe8   : > { %3521 = vmatpush1.bf16.msra.mxu0 %v5721_v25  ;;  %3603 = vmatpush1.bf16.msra.mxu1 %v5724_v26  ;;  %v5766_v54 = vld [vmem:[%s7361_s29 + $0x368] ss:$48 sps:$4 sm:$0xff]   ;;  %v5771_v55 = vld [vmem:[%s7361_s29 + $0x3c4] ss:$48 sps:$4 sm:$0xff]   ;;  %v5774_v56 = vld [vmem:[%s7361_s29 + $0x3cc] ss:$48 sps:$4 sm:$0xff]  }
  0xe9   : > { %3522 = vmatprep.subr.bf16.mxu0 %v5729_v27  ;;  %3604 = vmatprep.subr.bf16.mxu1 %v5732_v28  ;;  %v5769_v57 = vld [vmem:[%s7361_s29 + $0x3c0] ss:$48 sps:$4 sm:$0xff]   ;;  %v5772_v58 = vld [vmem:[%s7361_s29 + $0x3c8] ss:$48 sps:$4 sm:$0xff]   ;;  %v5777_v59 = vld [vmem:[%s7361_s29 + $0x424] ss:$48 sps:$4 sm:$0xff]  }
  0xea   : > { %v5780_v60 = vld [vmem:[%s7361_s29 + $0x42c] ss:$48 sps:$4 sm:$0xff]   ;;  %v5775_v61 = vld [vmem:[%s7361_s29 + $0x420] ss:$48 sps:$4 sm:$0xff]   ;;  %v5778_v62 = vld [vmem:[%s7361_s29 + $0x428] ss:$48 sps:$4 sm:$0xff]  }
  0xeb   : > { %v5783_v63 = vld [vmem:[%s7361_s29 + $0x484] ss:$48 sps:$4 sm:$0xff]   ;;  %v5786_v0 = vld [vmem:[%s7361_s29 + $0x48c] ss:$48 sps:$4 sm:$0xff]   ;;  %v5781_v1 = vld [vmem:[%s7361_s29 + $0x480] ss:$48 sps:$4 sm:$0xff]  }
  0xec   : > { %3523 = vmatpush1.bf16.msra.mxu0 %v5727_v29  ;;  %3605 = vmatpush1.bf16.msra.mxu1 %v5730_v30  ;;  %v5784_v2 = vld [vmem:[%s7361_s29 + $0x488] ss:$48 sps:$4 sm:$0xff]   ;;  %v5789_v3 = vld [vmem:[%s7361_s29 + $0x4e4] ss:$48 sps:$4 sm:$0xff]   ;;  %v5792_v4 = vld [vmem:[%s7361_s29 + $0x4ec] ss:$48 sps:$4 sm:$0xff]  }
  0xed   : > { %3524 = vmatprep.subr.bf16.mxu0 %v5735_v31  ;;  %3606 = vmatprep.subr.bf16.mxu1 %v5738_v32  ;;  %v5787_v5 = vld [vmem:[%s7361_s29 + $0x4e0] ss:$48 sps:$4 sm:$0xff]   ;;  %v5790_v6 = vld [vmem:[%s7361_s29 + $0x4e8] ss:$48 sps:$4 sm:$0xff]   ;;  %v5795_v7 = vld [vmem:[%s7361_s29 + $0x544] ss:$48 sps:$4 sm:$0xff]  }
  0xee   : > { %v5798_v8 = vld [vmem:[%s7361_s29 + $0x54c] ss:$48 sps:$4 sm:$0xff]   ;;  %v5793_v9 = vld [vmem:[%s7361_s29 + $0x540] ss:$48 sps:$4 sm:$0xff]   ;;  %v5796_v10 = vld [vmem:[%s7361_s29 + $0x548] ss:$48 sps:$4 sm:$0xff]  }
  0xef   : > { %v5801_v11 = vld [vmem:[%s7361_s29 + $0x5a4] ss:$48 sps:$4 sm:$0xff]   ;;  %v5804_v12 = vld [vmem:[%s7361_s29 + $0x5ac] ss:$48 sps:$4 sm:$0xff]   ;;  %v5799_v13 = vld [vmem:[%s7361_s29 + $0x5a0] ss:$48 sps:$4 sm:$0xff]  }
  0xf0   : > { %3525 = vmatpush1.bf16.msra.mxu0 %v5733_v33  ;;  %3607 = vmatpush1.bf16.msra.mxu1 %v5736_v34  ;;  %v5802_v14 = vld [vmem:[%s7361_s29 + $0x5a8] ss:$48 sps:$4 sm:$0xff]   ;;  %v5807_v15 = vld [vmem:[%s7361_s29 + $0x604] ss:$48 sps:$4 sm:$0xff]   ;;  %v5810_v16 = vld [vmem:[%s7361_s29 + $0x60c] ss:$48 sps:$4 sm:$0xff]  }
  0xf1   : > { %3526 = vmatprep.subr.bf16.mxu0 %v5741_v35  ;;  %3608 = vmatprep.subr.bf16.mxu1 %v5744_v36  ;;  %v7429_v18 = vshrl.u32 %v1072_v17, 7  ;;  %v7434_v19 = vld [vmem:[%s8300_s2] sm:$0xf]  ;;  %v5867_v17 = vld [vmem:[%s7361_s29 + $0x9c4] ss:$48 sps:$4 sm:$0xff]   ;;  %vm4023_vm8 = vcmask 1045509  }
  0xf2   : > { %s8310_s27 = smov (!%p1061_p8, %s5115_s27), 2 }
  0xf3   : > { %v7437_v20 = vsub.s32 0, %v7429_v18  ;;  %v7440_v21 = vsub.s32 1, %v7429_v18  ;;  %v7443_v22 = vsub.s32 3, %v7429_v18  ;;  %s5644_s17 = sshll.u32 %s8310_s27, 5 }
  0xf4   : > { %3527 = vmatpush1.bf16.msra.mxu0 %v5739_v37  ;;  %3609 = vmatpush1.bf16.msra.mxu1 %v5742_v38  ;;  %v5805_v38 = vld [vmem:[%s7361_s29 + $0x600] ss:$48 sps:$4 sm:$0xff]   ;;  %s1065_s20 = scalar_lea.vmem %s8305_s7, %s5644_s17 }
  0xf5   : > { %3528 = vmatprep.subr.bf16.mxu0 %v5747_v39  ;;  %3610 = vmatprep.subr.bf16.mxu1 %v5750_v40  ;;  %v1075_v23 = vrot.slane %v7434_v19, %v7437_v20  ;;  %v1079_v24 = vrot.slane %v7434_v19, %v7440_v21  ;;  %v1087_v25 = vrot.slane %v7434_v19, %v7443_v22  ;;  %v5808_v39 = vld [vmem:[%s7361_s29 + $0x608] ss:$48 sps:$4 sm:$0xff]  }
  0xf8   : > { %3529 = vmatpush1.bf16.msra.mxu0 %v5745_v41  ;;  %3611 = vmatpush1.bf16.msra.mxu1 %v5748_v42  ;;  %v5813_v41 = vld [vmem:[%s7361_s29 + $0x664] ss:$48 sps:$4 sm:$0xff]   ;;  %v5816_v42 = vld [vmem:[%s7361_s29 + $0x66c] ss:$48 sps:$4 sm:$0xff]  }
  0xf9   : > { %3530 = vmatprep.subr.bf16.mxu0 %v5753_v43  ;;  %3612 = vmatprep.subr.bf16.mxu1 %v5756_v44 }
  0xfc   : > { %3531 = vmatpush1.bf16.msra.mxu0 %v5751_v45  ;;  %3613 = vmatpush1.bf16.msra.mxu1 %v5754_v46  ;;  %v5811_v46 = vld [vmem:[%s7361_s29 + $0x660] ss:$48 sps:$4 sm:$0xff]  }
  0xfd   : > { %3532 = vmatprep.subr.bf16.mxu0 %v5759_v47  ;;  %3614 = vmatprep.subr.bf16.mxu1 %v5762_v48  ;;  %v5814_v47 = vld [vmem:[%s7361_s29 + $0x668] ss:$48 sps:$4 sm:$0xff]  }
 0x100   : > { %3533 = vmatpush1.bf16.msra.mxu0 %v5757_v49  ;;  %3615 = vmatpush1.bf16.msra.mxu1 %v5760_v50  ;;  %v5819_v49 = vld [vmem:[%s7361_s29 + $0x6c4] ss:$48 sps:$4 sm:$0xff]   ;;  %v5822_v50 = vld [vmem:[%s7361_s29 + $0x6cc] ss:$48 sps:$4 sm:$0xff]  }
 0x101   : > { %3534 = vmatprep.subr.bf16.mxu0 %v5765_v51  ;;  %3616 = vmatprep.subr.bf16.mxu1 %v5768_v53  ;;  %v5817_v51 = vld [vmem:[%s7361_s29 + $0x6c0] ss:$48 sps:$4 sm:$0xff]   ;;  %v5825_v53 = vld [vmem:[%s7361_s29 + $0x724] ss:$48 sps:$4 sm:$0xff]  }
 0x104   : > { %3535 = vmatpush1.bf16.msra.mxu0 %v5763_v52  ;;  %3617 = vmatpush1.bf16.msra.mxu1 %v5766_v54  ;;  %v5820_v52 = vld [vmem:[%s7361_s29 + $0x6c8] ss:$48 sps:$4 sm:$0xff]   ;;  %v5828_v54 = vld [vmem:[%s7361_s29 + $0x72c] ss:$48 sps:$4 sm:$0xff]  }
 0x105   : > { %3536 = vmatprep.subr.bf16.mxu0 %v5771_v55  ;;  %3618 = vmatprep.subr.bf16.mxu1 %v5774_v56  ;;  %v5823_v55 = vld [vmem:[%s7361_s29 + $0x720] ss:$48 sps:$4 sm:$0xff]   ;;  %v5826_v56 = vld [vmem:[%s7361_s29 + $0x728] ss:$48 sps:$4 sm:$0xff]  }
 0x108   : > { %3537 = vmatpush1.bf16.msra.mxu0 %v5769_v57  ;;  %3619 = vmatpush1.bf16.msra.mxu1 %v5772_v58  ;;  %v5831_v57 = vld [vmem:[%s7361_s29 + $0x784] ss:$48 sps:$4 sm:$0xff]   ;;  %v5834_v58 = vld [vmem:[%s7361_s29 + $0x78c] ss:$48 sps:$4 sm:$0xff]  }
 0x109   : > { %3538 = vmatprep.subr.bf16.mxu0 %v5777_v59  ;;  %3620 = vmatprep.subr.bf16.mxu1 %v5780_v60  ;;  %v5829_v59 = vld [vmem:[%s7361_s29 + $0x780] ss:$48 sps:$4 sm:$0xff]   ;;  %v5832_v60 = vld [vmem:[%s7361_s29 + $0x788] ss:$48 sps:$4 sm:$0xff]  }
 0x10c   : > { %3539 = vmatpush1.bf16.msra.mxu0 %v5775_v61  ;;  %3621 = vmatpush1.bf16.msra.mxu1 %v5778_v62  ;;  %v5837_v61 = vld [vmem:[%s7361_s29 + $0x7e4] ss:$48 sps:$4 sm:$0xff]   ;;  %v5840_v62 = vld [vmem:[%s7361_s29 + $0x7ec] ss:$48 sps:$4 sm:$0xff]  }
 0x10d   : > { %3540 = vmatprep.subr.bf16.mxu0 %v5783_v63  ;;  %3622 = vmatprep.subr.bf16.mxu1 %v5786_v0  ;;  %v5835_v63 = vld [vmem:[%s7361_s29 + $0x7e0] ss:$48 sps:$4 sm:$0xff]   ;;  %v5838_v0 = vld [vmem:[%s7361_s29 + $0x7e8] ss:$48 sps:$4 sm:$0xff]  }
 0x110   : > { %3541 = vmatpush1.bf16.msra.mxu0 %v5781_v1  ;;  %3623 = vmatpush1.bf16.msra.mxu1 %v5784_v2  ;;  %v5843_v1 = vld [vmem:[%s7361_s29 + $0x844] ss:$48 sps:$4 sm:$0xff]   ;;  %v5846_v2 = vld [vmem:[%s7361_s29 + $0x84c] ss:$48 sps:$4 sm:$0xff]  }
 0x111   : > { %3542 = vmatprep.subr.bf16.mxu0 %v5789_v3  ;;  %3624 = vmatprep.subr.bf16.mxu1 %v5792_v4  ;;  %v5841_v3 = vld [vmem:[%s7361_s29 + $0x840] ss:$48 sps:$4 sm:$0xff]   ;;  %v5844_v4 = vld [vmem:[%s7361_s29 + $0x848] ss:$48 sps:$4 sm:$0xff]  }
 0x114   : > { %3543 = vmatpush1.bf16.msra.mxu0 %v5787_v5  ;;  %3625 = vmatpush1.bf16.msra.mxu1 %v5790_v6  ;;  %v5849_v5 = vld [vmem:[%s7361_s29 + $0x8a4] ss:$48 sps:$4 sm:$0xff]   ;;  %v5852_v6 = vld [vmem:[%s7361_s29 + $0x8ac] ss:$48 sps:$4 sm:$0xff]  }
 0x115   : > { %3544 = vmatprep.subr.bf16.mxu0 %v5795_v7  ;;  %3626 = vmatprep.subr.bf16.mxu1 %v5798_v8  ;;  %v5847_v7 = vld [vmem:[%s7361_s29 + $0x8a0] ss:$48 sps:$4 sm:$0xff]   ;;  %v5850_v8 = vld [vmem:[%s7361_s29 + $0x8a8] ss:$48 sps:$4 sm:$0xff]  }
 0x118   : > { %3545 = vmatpush1.bf16.msra.mxu0 %v5793_v9  ;;  %3627 = vmatpush1.bf16.msra.mxu1 %v5796_v10  ;;  %v5855_v9 = vld [vmem:[%s7361_s29 + $0x904] ss:$48 sps:$4 sm:$0xff]   ;;  %v5858_v10 = vld [vmem:[%s7361_s29 + $0x90c] ss:$48 sps:$4 sm:$0xff]  }
 0x119   : > { %3546 = vmatprep.subr.bf16.mxu0 %v5801_v11  ;;  %3628 = vmatprep.subr.bf16.mxu1 %v5804_v12  ;;  %v5853_v11 = vld [vmem:[%s7361_s29 + $0x900] ss:$48 sps:$4 sm:$0xff]   ;;  %v5856_v12 = vld [vmem:[%s7361_s29 + $0x908] ss:$48 sps:$4 sm:$0xff]  }
 0x11c   : > { %3547 = vmatpush1.bf16.msra.mxu0 %v5799_v13  ;;  %3629 = vmatpush1.bf16.msra.mxu1 %v5802_v14  ;;  %v5861_v13 = vld [vmem:[%s7361_s29 + $0x964] ss:$48 sps:$4 sm:$0xff]   ;;  %v5864_v14 = vld [vmem:[%s7361_s29 + $0x96c] ss:$48 sps:$4 sm:$0xff]  }
 0x11d   : > { %3557 = vmatprep.subr.bf16.mxu0 %v5807_v15  ;;  %3639 = vmatprep.subr.bf16.mxu1 %v5810_v16  ;;  %v5859_v15 = vld [vmem:[%s7361_s29 + $0x960] ss:$48 sps:$4 sm:$0xff]   ;;  %v5862_v16 = vld [vmem:[%s7361_s29 + $0x968] ss:$48 sps:$4 sm:$0xff]  }
 0x1b2   : > { %v1156_v26 = vpop.f32.mrb[0].mxu0  ;;  %v7451_v29 = vpop.f32.mrb[0].mxu1 }
 0x1b3   : > { %v1157_v27 = vadd.f32 %v1156_v26, %v1075_v23  ;;  %v1158_v28 = vpop.f32.mrb[1].mxu0  ;;  %v1199_v32 = vpop.f32.mrb[1].mxu1  ;;  %v5870_v23 = vld [vmem:[%s7361_s29 + $0x9cc] ss:$48 sps:$4 sm:$0xff]   ;;  %v5873_v26 = vld [vmem:[%s7361_s29 + $0xa24] ss:$48 sps:$4 sm:$0xff]  }
 0x1b4   : > { %v1159_v30 = vadd.f32 %v1158_v28, %v1079_v24  ;;  %v1160_v31 = vpop.f32.mrb[2].mxu0  ;;  %v1200_v35 = vadd.f32 %v1199_v32, %v1087_v25  ;;  %v1201_v36 = vpop.f32.mrb[2].mxu1  ;;  %v5865_v24 = vld [vmem:[%s7361_s29 + $0x9c0] ss:$48 sps:$4 sm:$0xff]   ;;  %v5868_v25 = vld [vmem:[%s7361_s29 + $0x9c8] ss:$48 sps:$4 sm:$0xff]  }
 0x1b5   : > { %v1204_v33 = vmax.f32 %v1157_v27, 0.0  ;;  %v1161_v34 = vpop.f32.mrb[3].mxu0  ;;  %v1202_v40 = vpop.f32.mrb[3].mxu1  ;;  %v5876_v27 = vld [vmem:[%s7361_s29 + $0xa2c] ss:$48 sps:$4 sm:$0xff]  }
 0x1b6   : > { %v1205_v37 = vmax.f32 %v1159_v30, 0.0  ;;  %v1207_v43 = vmax.f32 %v1200_v35, 0.0  ;;  %v5871_v28 = vld [vmem:[%s7361_s29 + $0xa20] ss:$48 sps:$4 sm:$0xff]   ;;  %v5874_v30 = vld [vmem:[%s7361_s29 + $0xa28] ss:$48 sps:$4 sm:$0xff]  }
 0x1b7   : > { %v7459_v45 = vpack.c.bf16 %v1204_v33, %v1204_v33  ;;  %v5879_v31 = vld [vmem:[%s7361_s29 + $0xa84] ss:$48 sps:$4 sm:$0xff]   ;;  %v5882_v32 = vld [vmem:[%s7361_s29 + $0xa8c] ss:$48 sps:$4 sm:$0xff]   ;;  %v7514_v33 = vsub.s32 2, %v7429_v18 }
 0x1b8   : > { %v7457_v44 = vpack.c.bf16 %v1205_v37, %v1205_v37  ;;  %v7465_v48 = vpack.c.bf16 %v1207_v43, %v1207_v43  ;;  %v5877_v34 = vld [vmem:[%s7361_s29 + $0xa80] ss:$48 sps:$4 sm:$0xff]   ;;  %v5880_v35 = vld [vmem:[%s7361_s29 + $0xa88] ss:$48 sps:$4 sm:$0xff]   ;;  %v5885_v36 = vld [vmem:[%s7361_s29 + $0xae4] ss:$48 sps:$4 sm:$0xff]  }
 0x1b9   : > { %v5888_v37 = vld [vmem:[%s7361_s29 + $0xaec] ss:$48 sps:$4 sm:$0xff]   ;;  %v5883_v18 = vld [vmem:[%s7361_s29 + $0xae0] ss:$48 sps:$4 sm:$0xff]   ;;  %v5891_v40 = vld [vmem:[%s7361_s29 + $0xb44] ss:$48 sps:$4 sm:$0xff]  }
 0x1ba   : > { %3548 = vmatprep.mubr.bf16.mxu0 %v7457_v44  ;;  %3630 = vmatprep.mubr.bf16.mxu1 %v7457_v44  ;;  %v5889_v43 = vld [vmem:[%s7361_s29 + $0xb40] ss:$48 sps:$4 sm:$0xff]  }
 0x1bb   : > { %3549 = vmatmul.mubr.bf16.vlgmr.msra.gmra.mrb[4].mxu0 %v7459_v45  ;;  %3631 = vmatmul.mubr.bf16.vlgmr.msra.gmra.mrb[4].mxu1 %v7459_v45 }
 0x1bc   : > { %3558 = vmatpush1.bf16.msra.mxu0 %v5805_v38  ;;  %3640 = vmatpush1.bf16.msra.mxu1 %v5808_v39  ;;  %v1083_v38 = vrot.slane %v7434_v19, %v7514_v33  ;;  %v5886_v39 = vld [vmem:[%s7361_s29 + $0xae8] ss:$48 sps:$4 sm:$0xff]  }
 0x1bd   : > { %3559 = vmatprep.subr.bf16.mxu0 %v5813_v41  ;;  %3641 = vmatprep.subr.bf16.mxu1 %v5816_v42  ;;  %v5894_v41 = vld [vmem:[%s7361_s29 + $0xb4c] ss:$48 sps:$4 sm:$0xff]   ;;  %v5892_v19 = vld [vmem:[%s7361_s29 + $0xb48] ss:$48 sps:$4 sm:$0xff]  }
 0x1be   : > { %3589 = vmatprep.mubr.bf16.mxu0 %v7465_v48  ;;  %3671 = vmatprep.mubr.bf16.mxu1 %v7465_v48  ;;  %v1198_v42 = vadd.f32 %v7451_v29, %v1083_v38  ;;  %v5903_v29 = vld [vmem:[%s7361_s29 + $0x14] ss:$48 sps:$4 sm:$0xff]   ;;  %v5964_v38 = vld [vmem:[%s7361_s29 + $0x3d8] ss:$48 sps:$4 sm:$0xff]  }
 0x1c0   : > { %3560 = vmatpush1.bf16.msra.mxu0 %v5811_v46  ;;  %3642 = vmatpush1.bf16.msra.mxu1 %v5814_v47  ;;  %v5897_v46 = vld [vmem:[%s7361_s29 + $0xba4] ss:$48 sps:$4 sm:$0xff]   ;;  %v5900_v47 = vld [vmem:[%s7361_s29 + $0xbac] ss:$48 sps:$4 sm:$0xff]  }
 0x1c1   : > { %3561 = vmatprep.subr.bf16.mxu0 %v5819_v49  ;;  %3643 = vmatprep.subr.bf16.mxu1 %v5822_v50  ;;  %v1206_v49 = vmax.f32 %v1198_v42, 0.0  ;;  %v5895_v50 = vld [vmem:[%s7361_s29 + $0xba0] ss:$48 sps:$4 sm:$0xff]   ;;  %v5975_v42 = vld [vmem:[%s7361_s29 + $0x494] ss:$48 sps:$4 sm:$0xff]  }
 0x1c4   : > { %3562 = vmatpush1.bf16.msra.mxu0 %v5817_v51  ;;  %3644 = vmatpush1.bf16.msra.mxu1 %v5820_v52  ;;  %v5898_v51 = vld [vmem:[%s7361_s29 + $0xba8] ss:$48 sps:$4 sm:$0xff]   ;;  %v5906_v52 = vld [vmem:[%s7361_s29 + $0x1c] ss:$48 sps:$4 sm:$0xff]  }
 0x1c5   : > { %3563 = vmatprep.subr.bf16.mxu0 %v5825_v53  ;;  %3645 = vmatprep.subr.bf16.mxu1 %v5828_v54  ;;  %v7535_v53 = vpack.c.bf16 %v1206_v49, %v1206_v49  ;;  %v5901_v54 = vld [vmem:[%s7361_s29 + $0x10] ss:$48 sps:$4 sm:$0xff]   ;;  %v5984_v49 = vld [vmem:[%s7361_s29 + $0x4fc] ss:$48 sps:$4 sm:$0xff]  }
 0x1c8   : > { %3564 = vmatpush1.bf16.msra.mxu0 %v5823_v55  ;;  %3646 = vmatpush1.bf16.msra.mxu1 %v5826_v56  ;;  %v5904_v55 = vld [vmem:[%s7361_s29 + $0x18] ss:$48 sps:$4 sm:$0xff]   ;;  %v5909_v56 = vld [vmem:[%s7361_s29 + $0x74] ss:$48 sps:$4 sm:$0xff]  }
 0x1c9   : > { %3565 = vmatprep.subr.bf16.mxu0 %v5831_v57  ;;  %3647 = vmatprep.subr.bf16.mxu1 %v5834_v58  ;;  %v5912_v57 = vld [vmem:[%s7361_s29 + $0x7c] ss:$48 sps:$4 sm:$0xff]   ;;  %v5907_v58 = vld [vmem:[%s7361_s29 + $0x70] ss:$48 sps:$4 sm:$0xff]  }
 0x1cc   : > { %3566 = vmatpush1.bf16.msra.mxu0 %v5829_v59  ;;  %3648 = vmatpush1.bf16.msra.mxu1 %v5832_v60  ;;  %v5910_v59 = vld [vmem:[%s7361_s29 + $0x78] ss:$48 sps:$4 sm:$0xff]   ;;  %v5915_v60 = vld [vmem:[%s7361_s29 + $0xd4] ss:$48 sps:$4 sm:$0xff]  }
 0x1cd   : > { %3567 = vmatprep.subr.bf16.mxu0 %v5837_v61  ;;  %3649 = vmatprep.subr.bf16.mxu1 %v5840_v62  ;;  %v5918_v61 = vld [vmem:[%s7361_s29 + $0xdc] ss:$48 sps:$4 sm:$0xff]   ;;  %v5913_v62 = vld [vmem:[%s7361_s29 + $0xd0] ss:$48 sps:$4 sm:$0xff]  }
 0x1d0   : > { %3568 = vmatpush1.bf16.msra.mxu0 %v5835_v63  ;;  %3650 = vmatpush1.bf16.msra.mxu1 %v5838_v0  ;;  %v5916_v63 = vld [vmem:[%s7361_s29 + $0xd8] ss:$48 sps:$4 sm:$0xff]   ;;  %v5921_v0 = vld [vmem:[%s7361_s29 + $0x134] ss:$48 sps:$4 sm:$0xff]  }
 0x1d1   : > { %3569 = vmatprep.subr.bf16.mxu0 %v5843_v1  ;;  %3651 = vmatprep.subr.bf16.mxu1 %v5846_v2  ;;  %v5924_v1 = vld [vmem:[%s7361_s29 + $0x13c] ss:$48 sps:$4 sm:$0xff]   ;;  %v5919_v2 = vld [vmem:[%s7361_s29 + $0x130] ss:$48 sps:$4 sm:$0xff]  }
 0x1d4   : > { %3570 = vmatpush1.bf16.msra.mxu0 %v5841_v3  ;;  %3652 = vmatpush1.bf16.msra.mxu1 %v5844_v4  ;;  %v5922_v3 = vld [vmem:[%s7361_s29 + $0x138] ss:$48 sps:$4 sm:$0xff]   ;;  %v5927_v4 = vld [vmem:[%s7361_s29 + $0x194] ss:$48 sps:$4 sm:$0xff]  }
 0x1d5   : > { %3571 = vmatprep.subr.bf16.mxu0 %v5849_v5  ;;  %3653 = vmatprep.subr.bf16.mxu1 %v5852_v6  ;;  %v5930_v5 = vld [vmem:[%s7361_s29 + $0x19c] ss:$48 sps:$4 sm:$0xff]   ;;  %v5925_v6 = vld [vmem:[%s7361_s29 + $0x190] ss:$48 sps:$4 sm:$0xff]  }
 0x1d8   : > { %3572 = vmatpush1.bf16.msra.mxu0 %v5847_v7  ;;  %3654 = vmatpush1.bf16.msra.mxu1 %v5850_v8  ;;  %v5928_v7 = vld [vmem:[%s7361_s29 + $0x198] ss:$48 sps:$4 sm:$0xff]   ;;  %v5933_v8 = vld [vmem:[%s7361_s29 + $0x1f4] ss:$48 sps:$4 sm:$0xff]  }
 0x1d9   : > { %3573 = vmatprep.subr.bf16.mxu0 %v5855_v9  ;;  %3655 = vmatprep.subr.bf16.mxu1 %v5858_v10  ;;  %v5936_v9 = vld [vmem:[%s7361_s29 + $0x1fc] ss:$48 sps:$4 sm:$0xff]   ;;  %v5931_v10 = vld [vmem:[%s7361_s29 + $0x1f0] ss:$48 sps:$4 sm:$0xff]  }
 0x1dc   : > { %3574 = vmatpush1.bf16.msra.mxu0 %v5853_v11  ;;  %3656 = vmatpush1.bf16.msra.mxu1 %v5856_v12  ;;  %v5934_v11 = vld [vmem:[%s7361_s29 + $0x1f8] ss:$48 sps:$4 sm:$0xff]   ;;  %v5939_v12 = vld [vmem:[%s7361_s29 + $0x254] ss:$48 sps:$4 sm:$0xff]  }
 0x1dd   : > { %3575 = vmatprep.subr.bf16.mxu0 %v5861_v13  ;;  %3657 = vmatprep.subr.bf16.mxu1 %v5864_v14  ;;  %v5942_v13 = vld [vmem:[%s7361_s29 + $0x25c] ss:$48 sps:$4 sm:$0xff]   ;;  %v5937_v14 = vld [vmem:[%s7361_s29 + $0x250] ss:$48 sps:$4 sm:$0xff]  }
 0x1e0   : > { %3576 = vmatpush1.bf16.msra.mxu0 %v5859_v15  ;;  %3658 = vmatpush1.bf16.msra.mxu1 %v5862_v16  ;;  %v5940_v15 = vld [vmem:[%s7361_s29 + $0x258] ss:$48 sps:$4 sm:$0xff]   ;;  %v5945_v16 = vld [vmem:[%s7361_s29 + $0x2b4] ss:$48 sps:$4 sm:$0xff]  }
 0x1e1   : > { %3577 = vmatprep.subr.bf16.mxu0 %v5867_v17  ;;  %3659 = vmatprep.subr.bf16.mxu1 %v5870_v23  ;;  %v5948_v17 = vld [vmem:[%s7361_s29 + $0x2bc] ss:$48 sps:$4 sm:$0xff]   ;;  %v5943_v23 = vld [vmem:[%s7361_s29 + $0x2b0] ss:$48 sps:$4 sm:$0xff]  }
 0x1e4   : > { %3578 = vmatpush1.bf16.msra.mxu0 %v5865_v24  ;;  %3660 = vmatpush1.bf16.msra.mxu1 %v5868_v25  ;;  %v5946_v24 = vld [vmem:[%s7361_s29 + $0x2b8] ss:$48 sps:$4 sm:$0xff]   ;;  %v5951_v25 = vld [vmem:[%s7361_s29 + $0x314] ss:$48 sps:$4 sm:$0xff]  }
 0x1e5   : > { %3579 = vmatprep.subr.bf16.mxu0 %v5873_v26  ;;  %3661 = vmatprep.subr.bf16.mxu1 %v5876_v27  ;;  %v5954_v26 = vld [vmem:[%s7361_s29 + $0x31c] ss:$48 sps:$4 sm:$0xff]   ;;  %v5949_v27 = vld [vmem:[%s7361_s29 + $0x310] ss:$48 sps:$4 sm:$0xff]  }
 0x1e8   : > { %3580 = vmatpush1.bf16.msra.mxu0 %v5871_v28  ;;  %3662 = vmatpush1.bf16.msra.mxu1 %v5874_v30  ;;  %v5952_v28 = vld [vmem:[%s7361_s29 + $0x318] ss:$48 sps:$4 sm:$0xff]   ;;  %v5957_v30 = vld [vmem:[%s7361_s29 + $0x374] ss:$48 sps:$4 sm:$0xff]  }
 0x1e9   : > { %3581 = vmatprep.subr.bf16.mxu0 %v5879_v31  ;;  %3663 = vmatprep.subr.bf16.mxu1 %v5882_v32  ;;  %v5960_v31 = vld [vmem:[%s7361_s29 + $0x37c] ss:$48 sps:$4 sm:$0xff]   ;;  %v5955_v32 = vld [vmem:[%s7361_s29 + $0x370] ss:$48 sps:$4 sm:$0xff]  }
 0x1ec   : > { %3582 = vmatpush1.bf16.msra.mxu0 %v5877_v34  ;;  %3664 = vmatpush1.bf16.msra.mxu1 %v5880_v35  ;;  %v5958_v34 = vld [vmem:[%s7361_s29 + $0x378] ss:$48 sps:$4 sm:$0xff]   ;;  %v5963_v35 = vld [vmem:[%s7361_s29 + $0x3d4] ss:$48 sps:$4 sm:$0xff]  }
 0x1ed   : > { %3583 = vmatprep.subr.bf16.mxu0 %v5885_v36  ;;  %3665 = vmatprep.subr.bf16.mxu1 %v5888_v37  ;;  %v5966_v36 = vld [vmem:[%s7361_s29 + $0x3dc] ss:$48 sps:$4 sm:$0xff]   ;;  %v5961_v37 = vld [vmem:[%s7361_s29 + $0x3d0] ss:$48 sps:$4 sm:$0xff]  }
 0x1f0   : > { %3584 = vmatpush1.bf16.msra.mxu0 %v5883_v18  ;;  %3666 = vmatpush1.bf16.msra.mxu1 %v5886_v39  ;;  %v5969_v18 = vld [vmem:[%s7361_s29 + $0x434] ss:$48 sps:$4 sm:$0xff]   ;;  %v5972_v39 = vld [vmem:[%s7361_s29 + $0x43c] ss:$48 sps:$4 sm:$0xff]  }
 0x1f1   : > { %3585 = vmatprep.subr.bf16.mxu0 %v5891_v40  ;;  %3667 = vmatprep.subr.bf16.mxu1 %v5894_v41  ;;  %v5967_v40 = vld [vmem:[%s7361_s29 + $0x430] ss:$48 sps:$4 sm:$0xff]   ;;  %v5970_v41 = vld [vmem:[%s7361_s29 + $0x438] ss:$48 sps:$4 sm:$0xff]  }
 0x1f4   : > { %3586 = vmatpush1.bf16.msra.mxu0 %v5889_v43  ;;  %3668 = vmatpush1.bf16.msra.mxu1 %v5892_v19  ;;  %v5978_v43 = vld [vmem:[%s7361_s29 + $0x49c] ss:$48 sps:$4 sm:$0xff]   ;;  %v5973_v19 = vld [vmem:[%s7361_s29 + $0x490] ss:$48 sps:$4 sm:$0xff]  }
 0x1f5   : > { %3587 = vmatprep.subr.bf16.mxu0 %v5897_v46  ;;  %3669 = vmatprep.subr.bf16.mxu1 %v5900_v47  ;;  %v5976_v46 = vld [vmem:[%s7361_s29 + $0x498] ss:$48 sps:$4 sm:$0xff]   ;;  %v5981_v47 = vld [vmem:[%s7361_s29 + $0x4f4] ss:$48 sps:$4 sm:$0xff]  }
 0x1f8   : > { %3588 = vmatpush1.bf16.msra.mxu0 %v5895_v50  ;;  %3670 = vmatpush1.bf16.msra.mxu1 %v5898_v51  ;;  %v5979_v50 = vld [vmem:[%s7361_s29 + $0x4f0] ss:$48 sps:$4 sm:$0xff]   ;;  %v5982_v51 = vld [vmem:[%s7361_s29 + $0x4f8] ss:$48 sps:$4 sm:$0xff]  }
 0x1f9   : > { %3680 = vmatprep.subr.bf16.mxu0 %v5903_v29  ;;  %3762 = vmatprep.subr.bf16.mxu1 %v5906_v52  ;;  %v5987_v29 = vld [vmem:[%s7361_s29 + $0x554] ss:$48 sps:$4 sm:$0xff]   ;;  %v5990_v52 = vld [vmem:[%s7361_s29 + $0x55c] ss:$48 sps:$4 sm:$0xff]  }
 0x1fb   : > { %3590 = vmatmul.mubr.bf16.vlgmr.msra.gmra.mrb[4].mxu0 %v7535_v53  ;;  %3672 = vmatmul.mubr.bf16.vlgmr.msra.gmra.mrb[4].mxu1 %v7535_v53 }
 0x1fc   : > { %3681 = vmatpush1.bf16.msra.mxu0 %v5901_v54  ;;  %3712 = vmatprep.mubr.bf16.mxu0 %v7457_v44  ;;  %v5985_v54 = vld [vmem:[%s7361_s29 + $0x550] ss:$48 sps:$4 sm:$0xff]  }
 0x1fd   : > { %3763 = vmatpush1.bf16.msra.mxu1 %v5904_v55  ;;  %3794 = vmatprep.mubr.bf16.mxu1 %v7457_v44  ;;  %v5988_v55 = vld [vmem:[%s7361_s29 + $0x558] ss:$48 sps:$4 sm:$0xff]  }
 0x1fe   : > { %3682 = vmatprep.subr.bf16.mxu0 %v5909_v56  ;;  %3764 = vmatprep.subr.bf16.mxu1 %v5912_v57  ;;  %v5993_v56 = vld [vmem:[%s7361_s29 + $0x5b4] ss:$48 sps:$4 sm:$0xff]   ;;  %v5996_v57 = vld [vmem:[%s7361_s29 + $0x5bc] ss:$48 sps:$4 sm:$0xff]  }
 0x200   : > { %3683 = vmatpush1.bf16.msra.mxu0 %v5907_v58  ;;  %v5991_v58 = vld [vmem:[%s7361_s29 + $0x5b0] ss:$48 sps:$4 sm:$0xff]  }
 0x201   : > { %3765 = vmatpush1.bf16.msra.mxu1 %v5910_v59  ;;  %3684 = vmatprep.subr.bf16.mxu0 %v5915_v60  ;;  %v5994_v59 = vld [vmem:[%s7361_s29 + $0x5b8] ss:$48 sps:$4 sm:$0xff]   ;;  %v5999_v60 = vld [vmem:[%s7361_s29 + $0x614] ss:$48 sps:$4 sm:$0xff]  }
 0x202   : > { %3766 = vmatprep.subr.bf16.mxu1 %v5918_v61  ;;  %v6002_v61 = vld [vmem:[%s7361_s29 + $0x61c] ss:$48 sps:$4 sm:$0xff]  }
 0x204   : > { %3685 = vmatpush1.bf16.msra.mxu0 %v5913_v62  ;;  %v5997_v62 = vld [vmem:[%s7361_s29 + $0x610] ss:$48 sps:$4 sm:$0xff]  }
 0x205   : > { %3767 = vmatpush1.bf16.msra.mxu1 %v5916_v63  ;;  %3686 = vmatprep.subr.bf16.mxu0 %v5921_v0  ;;  %v6000_v63 = vld [vmem:[%s7361_s29 + $0x618] ss:$48 sps:$4 sm:$0xff]   ;;  %v6005_v0 = vld [vmem:[%s7361_s29 + $0x674] ss:$48 sps:$4 sm:$0xff]  }
 0x206   : > { %3768 = vmatprep.subr.bf16.mxu1 %v5924_v1  ;;  %v6008_v1 = vld [vmem:[%s7361_s29 + $0x67c] ss:$48 sps:$4 sm:$0xff]  }
 0x208   : > { %3687 = vmatpush1.bf16.msra.mxu0 %v5919_v2  ;;  %v6003_v2 = vld [vmem:[%s7361_s29 + $0x670] ss:$48 sps:$4 sm:$0xff]  }
 0x209   : > { %3769 = vmatpush1.bf16.msra.mxu1 %v5922_v3  ;;  %3688 = vmatprep.subr.bf16.mxu0 %v5927_v4  ;;  %v6006_v3 = vld [vmem:[%s7361_s29 + $0x678] ss:$48 sps:$4 sm:$0xff]   ;;  %v6011_v4 = vld [vmem:[%s7361_s29 + $0x6d4] ss:$48 sps:$4 sm:$0xff]  }
 0x20a   : > { %3770 = vmatprep.subr.bf16.mxu1 %v5930_v5  ;;  %v6014_v5 = vld [vmem:[%s7361_s29 + $0x6dc] ss:$48 sps:$4 sm:$0xff]  }
 0x20c   : > { %3689 = vmatpush1.bf16.msra.mxu0 %v5925_v6  ;;  %v6009_v6 = vld [vmem:[%s7361_s29 + $0x6d0] ss:$48 sps:$4 sm:$0xff]  }
 0x20d   : > { %3771 = vmatpush1.bf16.msra.mxu1 %v5928_v7  ;;  %3690 = vmatprep.subr.bf16.mxu0 %v5933_v8  ;;  %v6012_v7 = vld [vmem:[%s7361_s29 + $0x6d8] ss:$48 sps:$4 sm:$0xff]   ;;  %v6017_v8 = vld [vmem:[%s7361_s29 + $0x734] ss:$48 sps:$4 sm:$0xff]  }
 0x20e   : > { %3772 = vmatprep.subr.bf16.mxu1 %v5936_v9  ;;  %v6020_v9 = vld [vmem:[%s7361_s29 + $0x73c] ss:$48 sps:$4 sm:$0xff]  }
 0x210   : > { %3691 = vmatpush1.bf16.msra.mxu0 %v5931_v10  ;;  %v6015_v10 = vld [vmem:[%s7361_s29 + $0x730] ss:$48 sps:$4 sm:$0xff]  }
 0x211   : > { %3773 = vmatpush1.bf16.msra.mxu1 %v5934_v11  ;;  %3692 = vmatprep.subr.bf16.mxu0 %v5939_v12  ;;  %v6018_v11 = vld [vmem:[%s7361_s29 + $0x738] ss:$48 sps:$4 sm:$0xff]   ;;  %v6023_v12 = vld [vmem:[%s7361_s29 + $0x794] ss:$48 sps:$4 sm:$0xff]  }
 0x212   : > { %3774 = vmatprep.subr.bf16.mxu1 %v5942_v13  ;;  %v6026_v13 = vld [vmem:[%s7361_s29 + $0x79c] ss:$48 sps:$4 sm:$0xff]  }
 0x214   : > { %3693 = vmatpush1.bf16.msra.mxu0 %v5937_v14  ;;  %v6021_v14 = vld [vmem:[%s7361_s29 + $0x790] ss:$48 sps:$4 sm:$0xff]  }
 0x215   : > { %3775 = vmatpush1.bf16.msra.mxu1 %v5940_v15  ;;  %3694 = vmatprep.subr.bf16.mxu0 %v5945_v16  ;;  %v6024_v15 = vld [vmem:[%s7361_s29 + $0x798] ss:$48 sps:$4 sm:$0xff]   ;;  %v6029_v16 = vld [vmem:[%s7361_s29 + $0x7f4] ss:$48 sps:$4 sm:$0xff]  }
 0x216   : > { %3776 = vmatprep.subr.bf16.mxu1 %v5948_v17  ;;  %v6032_v17 = vld [vmem:[%s7361_s29 + $0x7fc] ss:$48 sps:$4 sm:$0xff]  }
 0x218   : > { %3695 = vmatpush1.bf16.msra.mxu0 %v5943_v23  ;;  %v6027_v23 = vld [vmem:[%s7361_s29 + $0x7f0] ss:$48 sps:$4 sm:$0xff]  }
 0x219   : > { %3777 = vmatpush1.bf16.msra.mxu1 %v5946_v24  ;;  %3696 = vmatprep.subr.bf16.mxu0 %v5951_v25  ;;  %v6030_v24 = vld [vmem:[%s7361_s29 + $0x7f8] ss:$48 sps:$4 sm:$0xff]   ;;  %v6035_v25 = vld [vmem:[%s7361_s29 + $0x854] ss:$48 sps:$4 sm:$0xff]  }
 0x21a   : > { %3778 = vmatprep.subr.bf16.mxu1 %v5954_v26  ;;  %v6038_v26 = vld [vmem:[%s7361_s29 + $0x85c] ss:$48 sps:$4 sm:$0xff]  }
 0x21c   : > { %3697 = vmatpush1.bf16.msra.mxu0 %v5949_v27  ;;  %v6033_v27 = vld [vmem:[%s7361_s29 + $0x850] ss:$48 sps:$4 sm:$0xff]  }
 0x21d   : > { %3779 = vmatpush1.bf16.msra.mxu1 %v5952_v28  ;;  %3698 = vmatprep.subr.bf16.mxu0 %v5957_v30  ;;  %v6036_v28 = vld [vmem:[%s7361_s29 + $0x858] ss:$48 sps:$4 sm:$0xff]   ;;  %v6041_v30 = vld [vmem:[%s7361_s29 + $0x8b4] ss:$48 sps:$4 sm:$0xff]  }
 0x21e   : > { %3780 = vmatprep.subr.bf16.mxu1 %v5960_v31  ;;  %v6044_v31 = vld [vmem:[%s7361_s29 + $0x8bc] ss:$48 sps:$4 sm:$0xff]  }
 0x220   : > { %3699 = vmatpush1.bf16.msra.mxu0 %v5955_v32  ;;  %v6039_v32 = vld [vmem:[%s7361_s29 + $0x8b0] ss:$48 sps:$4 sm:$0xff]  }
 0x221   : > { %3781 = vmatpush1.bf16.msra.mxu1 %v5958_v34  ;;  %3700 = vmatprep.subr.bf16.mxu0 %v5963_v35  ;;  %v6042_v34 = vld [vmem:[%s7361_s29 + $0x8b8] ss:$48 sps:$4 sm:$0xff]   ;;  %v6047_v35 = vld [vmem:[%s7361_s29 + $0x914] ss:$48 sps:$4 sm:$0xff]  }
 0x222   : > { %3782 = vmatprep.subr.bf16.mxu1 %v5966_v36  ;;  %v6050_v36 = vld [vmem:[%s7361_s29 + $0x91c] ss:$48 sps:$4 sm:$0xff]  }
 0x224   : > { %3701 = vmatpush1.bf16.msra.mxu0 %v5961_v37  ;;  %v6045_v37 = vld [vmem:[%s7361_s29 + $0x910] ss:$48 sps:$4 sm:$0xff]  }
 0x225   : > { %3783 = vmatpush1.bf16.msra.mxu1 %v5964_v38  ;;  %3702 = vmatprep.subr.bf16.mxu0 %v5969_v18  ;;  %v6048_v38 = vld [vmem:[%s7361_s29 + $0x918] ss:$48 sps:$4 sm:$0xff]   ;;  %v6053_v18 = vld [vmem:[%s7361_s29 + $0x974] ss:$48 sps:$4 sm:$0xff]  }
 0x226   : > { %3784 = vmatprep.subr.bf16.mxu1 %v5972_v39  ;;  %v6056_v39 = vld [vmem:[%s7361_s29 + $0x97c] ss:$48 sps:$4 sm:$0xff]  }
 0x228   : > { %3703 = vmatpush1.bf16.msra.mxu0 %v5967_v40  ;;  %v6051_v40 = vld [vmem:[%s7361_s29 + $0x970] ss:$48 sps:$4 sm:$0xff]  }
 0x229   : > { %3785 = vmatpush1.bf16.msra.mxu1 %v5970_v41  ;;  %3704 = vmatprep.subr.bf16.mxu0 %v5975_v42  ;;  %v6054_v41 = vld [vmem:[%s7361_s29 + $0x978] ss:$48 sps:$4 sm:$0xff]   ;;  %v6059_v42 = vld [vmem:[%s7361_s29 + $0x9d4] ss:$48 sps:$4 sm:$0xff]  }
 0x22a   : > { %3786 = vmatprep.subr.bf16.mxu1 %v5978_v43  ;;  %v6062_v43 = vld [vmem:[%s7361_s29 + $0x9dc] ss:$48 sps:$4 sm:$0xff]  }
 0x22c   : > { %3705 = vmatpush1.bf16.msra.mxu0 %v5973_v19  ;;  %v6057_v19 = vld [vmem:[%s7361_s29 + $0x9d0] ss:$48 sps:$4 sm:$0xff]  }
 0x22d   : > { %3787 = vmatpush1.bf16.msra.mxu1 %v5976_v46  ;;  %3706 = vmatprep.subr.bf16.mxu0 %v5981_v47  ;;  %v6060_v46 = vld [vmem:[%s7361_s29 + $0x9d8] ss:$48 sps:$4 sm:$0xff]   ;;  %v6065_v47 = vld [vmem:[%s7361_s29 + $0xa34] ss:$48 sps:$4 sm:$0xff]  }
 0x22e   : > { %3788 = vmatprep.subr.bf16.mxu1 %v5984_v49  ;;  %v6068_v49 = vld [vmem:[%s7361_s29 + $0xa3c] ss:$48 sps:$4 sm:$0xff]  }
 0x230   : > { %3707 = vmatpush1.bf16.msra.mxu0 %v5979_v50  ;;  %v6063_v50 = vld [vmem:[%s7361_s29 + $0xa30] ss:$48 sps:$4 sm:$0xff]  }
 0x231   : > { %3789 = vmatpush1.bf16.msra.mxu1 %v5982_v51  ;;  %3708 = vmatprep.subr.bf16.mxu0 %v5987_v29  ;;  %v6066_v51 = vld [vmem:[%s7361_s29 + $0xa38] ss:$48 sps:$4 sm:$0xff]   ;;  %v6071_v29 = vld [vmem:[%s7361_s29 + $0xa94] ss:$48 sps:$4 sm:$0xff]  }
 0x232   : > { %3790 = vmatprep.subr.bf16.mxu1 %v5990_v52  ;;  %v6074_v52 = vld [vmem:[%s7361_s29 + $0xa9c] ss:$48 sps:$4 sm:$0xff]  }
 0x234   : > { %3709 = vmatpush1.bf16.msra.mxu0 %v5985_v54  ;;  %v6069_v54 = vld [vmem:[%s7361_s29 + $0xa90] ss:$48 sps:$4 sm:$0xff]  }
 0x235   : > { %3791 = vmatpush1.bf16.msra.mxu1 %v5988_v55  ;;  %3710 = vmatprep.subr.bf16.mxu0 %v5993_v56  ;;  %v6072_v55 = vld [vmem:[%s7361_s29 + $0xa98] ss:$48 sps:$4 sm:$0xff]   ;;  %v6077_v56 = vld [vmem:[%s7361_s29 + $0xaf4] ss:$48 sps:$4 sm:$0xff]  }
 0x236   : > { %3792 = vmatprep.subr.bf16.mxu1 %v5996_v57  ;;  %v6080_v57 = vld [vmem:[%s7361_s29 + $0xafc] ss:$48 sps:$4 sm:$0xff]  }
 0x238   : > { %3711 = vmatpush1.bf16.msra.mxu0 %v5991_v58  ;;  %v6075_v58 = vld [vmem:[%s7361_s29 + $0xaf0] ss:$48 sps:$4 sm:$0xff]  }
 0x239   : > { %3793 = vmatpush1.bf16.msra.mxu1 %v5994_v59  ;;  %3721 = vmatprep.subr.bf16.mxu0 %v5999_v60  ;;  %v6078_v59 = vld [vmem:[%s7361_s29 + $0xaf8] ss:$48 sps:$4 sm:$0xff]   ;;  %v6083_v60 = vld [vmem:[%s7361_s29 + $0xb54] ss:$48 sps:$4 sm:$0xff]  }
 0x23a   : > { %3803 = vmatprep.subr.bf16.mxu1 %v6002_v61  ;;  %v6086_v61 = vld [vmem:[%s7361_s29 + $0xb5c] ss:$48 sps:$4 sm:$0xff]  }
 0x23b   : > { %3713 = vmatmul.mubr.bf16.vlgmr.msra.gmra.mrb[8].mxu0 %v7459_v45 }
 0x23c   : > { %3795 = vmatmul.mubr.bf16.vlgmr.msra.gmra.mrb[8].mxu1 %v7459_v45  ;;  %3722 = vmatpush1.bf16.msra.mxu0 %v5997_v62  ;;  %v6081_v62 = vld [vmem:[%s7361_s29 + $0xb50] ss:$48 sps:$4 sm:$0xff]  }
 0x23d   : > { %3753 = vmatprep.mubr.bf16.mxu0 %v7465_v48  ;;  %3804 = vmatpush1.bf16.msra.mxu1 %v6000_v63  ;;  %v6084_v63 = vld [vmem:[%s7361_s29 + $0xb58] ss:$48 sps:$4 sm:$0xff]  }
 0x23e   : > { %3835 = vmatprep.mubr.bf16.mxu1 %v7465_v48  ;;  %3723 = vmatprep.subr.bf16.mxu0 %v6005_v0  ;;  %v6089_v0 = vld [vmem:[%s7361_s29 + $0xbb4] ss:$48 sps:$4 sm:$0xff]  }
 0x23f   : > { %3805 = vmatprep.subr.bf16.mxu1 %v6008_v1  ;;  %v6092_v1 = vld [vmem:[%s7361_s29 + $0xbbc] ss:$48 sps:$4 sm:$0xff]  }
 0x240   : > { %3724 = vmatpush1.bf16.msra.mxu0 %v6003_v2  ;;  %v6087_v2 = vld [vmem:[%s7361_s29 + $0xbb0] ss:$48 sps:$4 sm:$0xff]  }
 0x241   : > { %3806 = vmatpush1.bf16.msra.mxu1 %v6006_v3  ;;  %3725 = vmatprep.subr.bf16.mxu0 %v6011_v4  ;;  %v6090_v3 = vld [vmem:[%s7361_s29 + $0xbb8] ss:$48 sps:$4 sm:$0xff]   ;;  %v6095_v4 = vld [vmem:[%s7361_s29 + $0x24] ss:$48 sps:$4 sm:$0xff]  }
 0x242   : > { %3807 = vmatprep.subr.bf16.mxu1 %v6014_v5  ;;  %v6098_v5 = vld [vmem:[%s7361_s29 + $0x2c] ss:$48 sps:$4 sm:$0xff]  }
 0x244   : > { %3726 = vmatpush1.bf16.msra.mxu0 %v6009_v6  ;;  %v6093_v6 = vld [vmem:[%s7361_s29 + $0x20] ss:$48 sps:$4 sm:$0xff]  }
 0x245   : > { %3808 = vmatpush1.bf16.msra.mxu1 %v6012_v7  ;;  %3727 = vmatprep.subr.bf16.mxu0 %v6017_v8  ;;  %v6096_v7 = vld [vmem:[%s7361_s29 + $0x28] ss:$48 sps:$4 sm:$0xff]   ;;  %v6101_v8 = vld [vmem:[%s7361_s29 + $0x84] ss:$48 sps:$4 sm:$0xff]  }
 0x246   : > { %3809 = vmatprep.subr.bf16.mxu1 %v6020_v9  ;;  %v6104_v9 = vld [vmem:[%s7361_s29 + $0x8c] ss:$48 sps:$4 sm:$0xff]  }
 0x248   : > { %3728 = vmatpush1.bf16.msra.mxu0 %v6015_v10  ;;  %v6099_v10 = vld [vmem:[%s7361_s29 + $0x80] ss:$48 sps:$4 sm:$0xff]  }
 0x249   : > { %3810 = vmatpush1.bf16.msra.mxu1 %v6018_v11  ;;  %3729 = vmatprep.subr.bf16.mxu0 %v6023_v12  ;;  %v6102_v11 = vld [vmem:[%s7361_s29 + $0x88] ss:$48 sps:$4 sm:$0xff]   ;;  %v6107_v12 = vld [vmem:[%s7361_s29 + $0xe4] ss:$48 sps:$4 sm:$0xff]  }
 0x24a   : > { %3811 = vmatprep.subr.bf16.mxu1 %v6026_v13  ;;  %v6110_v13 = vld [vmem:[%s7361_s29 + $0xec] ss:$48 sps:$4 sm:$0xff]  }
 0x24c   : > { %3730 = vmatpush1.bf16.msra.mxu0 %v6021_v14  ;;  %v6105_v14 = vld [vmem:[%s7361_s29 + $0xe0] ss:$48 sps:$4 sm:$0xff]  }
 0x24d   : > { %3812 = vmatpush1.bf16.msra.mxu1 %v6024_v15  ;;  %3731 = vmatprep.subr.bf16.mxu0 %v6029_v16  ;;  %v6108_v15 = vld [vmem:[%s7361_s29 + $0xe8] ss:$48 sps:$4 sm:$0xff]   ;;  %v6113_v16 = vld [vmem:[%s7361_s29 + $0x144] ss:$48 sps:$4 sm:$0xff]  }
 0x24e   : > { %3813 = vmatprep.subr.bf16.mxu1 %v6032_v17  ;;  %v6116_v17 = vld [vmem:[%s7361_s29 + $0x14c] ss:$48 sps:$4 sm:$0xff]  }
 0x250   : > { %3732 = vmatpush1.bf16.msra.mxu0 %v6027_v23  ;;  %v6114_v23 = vld [vmem:[%s7361_s29 + $0x148] ss:$48 sps:$4 sm:$0xff]  }
 0x251   : > { %3814 = vmatpush1.bf16.msra.mxu1 %v6030_v24  ;;  %3733 = vmatprep.subr.bf16.mxu0 %v6035_v25  ;;  %v6119_v24 = vld [vmem:[%s7361_s29 + $0x1a4] ss:$48 sps:$4 sm:$0xff]   ;;  %v6122_v25 = vld [vmem:[%s7361_s29 + $0x1ac] ss:$48 sps:$4 sm:$0xff]  }
 0x252   : > { %3815 = vmatprep.subr.bf16.mxu1 %v6038_v26  ;;  %v6117_v26 = vld [vmem:[%s7361_s29 + $0x1a0] ss:$48 sps:$4 sm:$0xff]  }
 0x254   : > { %3734 = vmatpush1.bf16.msra.mxu0 %v6033_v27  ;;  %v6120_v27 = vld [vmem:[%s7361_s29 + $0x1a8] ss:$48 sps:$4 sm:$0xff]  }
 0x255   : > { %3816 = vmatpush1.bf16.msra.mxu1 %v6036_v28  ;;  %3735 = vmatprep.subr.bf16.mxu0 %v6041_v30  ;;  %v6125_v28 = vld [vmem:[%s7361_s29 + $0x204] ss:$48 sps:$4 sm:$0xff]   ;;  %v6128_v30 = vld [vmem:[%s7361_s29 + $0x20c] ss:$48 sps:$4 sm:$0xff]  }
 0x256   : > { %3817 = vmatprep.subr.bf16.mxu1 %v6044_v31  ;;  %v6123_v31 = vld [vmem:[%s7361_s29 + $0x200] ss:$48 sps:$4 sm:$0xff]  }
 0x258   : > { %3736 = vmatpush1.bf16.msra.mxu0 %v6039_v32  ;;  %v6126_v32 = vld [vmem:[%s7361_s29 + $0x208] ss:$48 sps:$4 sm:$0xff]  }
 0x259   : > { %3818 = vmatpush1.bf16.msra.mxu1 %v6042_v34  ;;  %3737 = vmatprep.subr.bf16.mxu0 %v6047_v35  ;;  %v6131_v34 = vld [vmem:[%s7361_s29 + $0x264] ss:$48 sps:$4 sm:$0xff]   ;;  %v6134_v35 = vld [vmem:[%s7361_s29 + $0x26c] ss:$48 sps:$4 sm:$0xff]  }
 0x25a   : > { %3819 = vmatprep.subr.bf16.mxu1 %v6050_v36  ;;  %v6129_v36 = vld [vmem:[%s7361_s29 + $0x260] ss:$48 sps:$4 sm:$0xff]  }
 0x25c   : > { %3738 = vmatpush1.bf16.msra.mxu0 %v6045_v37  ;;  %v6132_v37 = vld [vmem:[%s7361_s29 + $0x268] ss:$48 sps:$4 sm:$0xff]  }
 0x25d   : > { %3820 = vmatpush1.bf16.msra.mxu1 %v6048_v38  ;;  %3739 = vmatprep.subr.bf16.mxu0 %v6053_v18  ;;  %v6137_v38 = vld [vmem:[%s7361_s29 + $0x2c4] ss:$48 sps:$4 sm:$0xff]   ;;  %v6140_v18 = vld [vmem:[%s7361_s29 + $0x2cc] ss:$48 sps:$4 sm:$0xff]  }
 0x25e   : > { %3821 = vmatprep.subr.bf16.mxu1 %v6056_v39  ;;  %v6135_v39 = vld [vmem:[%s7361_s29 + $0x2c0] ss:$48 sps:$4 sm:$0xff]  }
 0x260   : > { %3740 = vmatpush1.bf16.msra.mxu0 %v6051_v40  ;;  %v6138_v40 = vld [vmem:[%s7361_s29 + $0x2c8] ss:$48 sps:$4 sm:$0xff]  }
 0x261   : > { %3822 = vmatpush1.bf16.msra.mxu1 %v6054_v41  ;;  %3741 = vmatprep.subr.bf16.mxu0 %v6059_v42  ;;  %v6143_v41 = vld [vmem:[%s7361_s29 + $0x324] ss:$48 sps:$4 sm:$0xff]   ;;  %v6146_v42 = vld [vmem:[%s7361_s29 + $0x32c] ss:$48 sps:$4 sm:$0xff]  }
 0x262   : > { %3823 = vmatprep.subr.bf16.mxu1 %v6062_v43  ;;  %v6141_v43 = vld [vmem:[%s7361_s29 + $0x320] ss:$48 sps:$4 sm:$0xff]  }
 0x264   : > { %3742 = vmatpush1.bf16.msra.mxu0 %v6057_v19  ;;  %v6144_v19 = vld [vmem:[%s7361_s29 + $0x328] ss:$48 sps:$4 sm:$0xff]  }
 0x265   : > { %3824 = vmatpush1.bf16.msra.mxu1 %v6060_v46  ;;  %3743 = vmatprep.subr.bf16.mxu0 %v6065_v47  ;;  %v6149_v46 = vld [vmem:[%s7361_s29 + $0x384] ss:$48 sps:$4 sm:$0xff]   ;;  %v6152_v47 = vld [vmem:[%s7361_s29 + $0x38c] ss:$48 sps:$4 sm:$0xff]  }
 0x266   : > { %3825 = vmatprep.subr.bf16.mxu1 %v6068_v49  ;;  %v6147_v49 = vld [vmem:[%s7361_s29 + $0x380] ss:$48 sps:$4 sm:$0xff]  }
 0x268   : > { %3744 = vmatpush1.bf16.msra.mxu0 %v6063_v50  ;;  %v6150_v50 = vld [vmem:[%s7361_s29 + $0x388] ss:$48 sps:$4 sm:$0xff]  }
 0x269   : > { %3826 = vmatpush1.bf16.msra.mxu1 %v6066_v51  ;;  %3745 = vmatprep.subr.bf16.mxu0 %v6071_v29  ;;  %v6155_v51 = vld [vmem:[%s7361_s29 + $0x3e4] ss:$48 sps:$4 sm:$0xff]   ;;  %v6158_v29 = vld [vmem:[%s7361_s29 + $0x3ec] ss:$48 sps:$4 sm:$0xff]  }
 0x26a   : > { %3827 = vmatprep.subr.bf16.mxu1 %v6074_v52  ;;  %v6153_v52 = vld [vmem:[%s7361_s29 + $0x3e0] ss:$48 sps:$4 sm:$0xff]  }
 0x26c   : > { %3746 = vmatpush1.bf16.msra.mxu0 %v6069_v54  ;;  %v6156_v54 = vld [vmem:[%s7361_s29 + $0x3e8] ss:$48 sps:$4 sm:$0xff]  }
 0x26d   : > { %3828 = vmatpush1.bf16.msra.mxu1 %v6072_v55  ;;  %3747 = vmatprep.subr.bf16.mxu0 %v6077_v56  ;;  %v6161_v55 = vld [vmem:[%s7361_s29 + $0x444] ss:$48 sps:$4 sm:$0xff]   ;;  %v6164_v56 = vld [vmem:[%s7361_s29 + $0x44c] ss:$48 sps:$4 sm:$0xff]  }
 0x26e   : > { %3829 = vmatprep.subr.bf16.mxu1 %v6080_v57  ;;  %v6159_v57 = vld [vmem:[%s7361_s29 + $0x440] ss:$48 sps:$4 sm:$0xff]  }
 0x270   : > { %3748 = vmatpush1.bf16.msra.mxu0 %v6075_v58  ;;  %v6162_v58 = vld [vmem:[%s7361_s29 + $0x448] ss:$48 sps:$4 sm:$0xff]  }
 0x271   : > { %3830 = vmatpush1.bf16.msra.mxu1 %v6078_v59  ;;  %3749 = vmatprep.subr.bf16.mxu0 %v6083_v60  ;;  %v6167_v59 = vld [vmem:[%s7361_s29 + $0x4a4] ss:$48 sps:$4 sm:$0xff]   ;;  %v6170_v60 = vld [vmem:[%s7361_s29 + $0x4ac] ss:$48 sps:$4 sm:$0xff]  }
 0x272   : > { %3831 = vmatprep.subr.bf16.mxu1 %v6086_v61  ;;  %v6165_v61 = vld [vmem:[%s7361_s29 + $0x4a0] ss:$48 sps:$4 sm:$0xff]  }
 0x274   : > { %3750 = vmatpush1.bf16.msra.mxu0 %v6081_v62  ;;  %v6168_v62 = vld [vmem:[%s7361_s29 + $0x4a8] ss:$48 sps:$4 sm:$0xff]  }
 0x275   : > { %3832 = vmatpush1.bf16.msra.mxu1 %v6084_v63  ;;  %3751 = vmatprep.subr.bf16.mxu0 %v6089_v0  ;;  %v6173_v63 = vld [vmem:[%s7361_s29 + $0x504] ss:$48 sps:$4 sm:$0xff]   ;;  %v6176_v0 = vld [vmem:[%s7361_s29 + $0x50c] ss:$48 sps:$4 sm:$0xff]  }
 0x276   : > { %3833 = vmatprep.subr.bf16.mxu1 %v6092_v1  ;;  %v6171_v1 = vld [vmem:[%s7361_s29 + $0x500] ss:$48 sps:$4 sm:$0xff]  }
 0x278   : > { %3752 = vmatpush1.bf16.msra.mxu0 %v6087_v2  ;;  %v6174_v2 = vld [vmem:[%s7361_s29 + $0x508] ss:$48 sps:$4 sm:$0xff]  }
 0x279   : > { %3834 = vmatpush1.bf16.msra.mxu1 %v6090_v3  ;;  %3844 = vmatprep.subr.bf16.mxu0 %v6095_v4  ;;  %v6179_v3 = vld [vmem:[%s7361_s29 + $0x564] ss:$48 sps:$4 sm:$0xff]   ;;  %v6182_v4 = vld [vmem:[%s7361_s29 + $0x56c] ss:$48 sps:$4 sm:$0xff]  }
 0x27a   : > { %3926 = vmatprep.subr.bf16.mxu1 %v6098_v5  ;;  %v6177_v5 = vld [vmem:[%s7361_s29 + $0x560] ss:$48 sps:$4 sm:$0xff]  }
 0x27b   : > { %3754 = vmatmul.mubr.bf16.vlgmr.msra.gmra.mrb[8].mxu0 %v7535_v53 }
 0x27c   : > { %3836 = vmatmul.mubr.bf16.vlgmr.msra.gmra.mrb[8].mxu1 %v7535_v53  ;;  %3845 = vmatpush1.bf16.msra.mxu0 %v6093_v6  ;;  %v6180_v6 = vld [vmem:[%s7361_s29 + $0x568] ss:$48 sps:$4 sm:$0xff]  }
 0x27d   : > { %3876 = vmatprep.mubr.bf16.mxu0 %v7457_v44  ;;  %3927 = vmatpush1.bf16.msra.mxu1 %v6096_v7  ;;  %v6185_v7 = vld [vmem:[%s7361_s29 + $0x5c4] ss:$48 sps:$4 sm:$0xff]  }
 0x27e   : > { %3958 = vmatprep.mubr.bf16.mxu1 %v7457_v44  ;;  %3846 = vmatprep.subr.bf16.mxu0 %v6101_v8  ;;  %v6111_v44 = vld [vmem:[%s7361_s29 + $0x140] ss:$48 sps:$4 sm:$0xff]   ;;  %v6188_v8 = vld [vmem:[%s7361_s29 + $0x5cc] ss:$48 sps:$4 sm:$0xff]  }
 0x27f   : > { %3928 = vmatprep.subr.bf16.mxu1 %v6104_v9  ;;  %v6183_v9 = vld [vmem:[%s7361_s29 + $0x5c0] ss:$48 sps:$4 sm:$0xff]  }
 0x280   : > { %3847 = vmatpush1.bf16.msra.mxu0 %v6099_v10  ;;  %v6186_v10 = vld [vmem:[%s7361_s29 + $0x5c8] ss:$48 sps:$4 sm:$0xff]  }
 0x281   : > { %3929 = vmatpush1.bf16.msra.mxu1 %v6102_v11  ;;  %3848 = vmatprep.subr.bf16.mxu0 %v6107_v12  ;;  %v6191_v11 = vld [vmem:[%s7361_s29 + $0x624] ss:$48 sps:$4 sm:$0xff]   ;;  %v6194_v12 = vld [vmem:[%s7361_s29 + $0x62c] ss:$48 sps:$4 sm:$0xff]  }
 0x282   : > { %3930 = vmatprep.subr.bf16.mxu1 %v6110_v13  ;;  %v6189_v13 = vld [vmem:[%s7361_s29 + $0x620] ss:$48 sps:$4 sm:$0xff]  }
 0x284   : > { %3849 = vmatpush1.bf16.msra.mxu0 %v6105_v14  ;;  %v6192_v14 = vld [vmem:[%s7361_s29 + $0x628] ss:$48 sps:$4 sm:$0xff]  }
 0x285   : > { %3931 = vmatpush1.bf16.msra.mxu1 %v6108_v15  ;;  %3850 = vmatprep.subr.bf16.mxu0 %v6113_v16  ;;  %v6197_v15 = vld [vmem:[%s7361_s29 + $0x684] ss:$48 sps:$4 sm:$0xff]   ;;  %v6200_v16 = vld [vmem:[%s7361_s29 + $0x68c] ss:$48 sps:$4 sm:$0xff]  }
 0x286   : > { %3932 = vmatprep.subr.bf16.mxu1 %v6116_v17  ;;  %v6195_v17 = vld [vmem:[%s7361_s29 + $0x680] ss:$48 sps:$4 sm:$0xff]  }
 0x288   : > { %3851 = vmatpush1.bf16.msra.mxu0 %v6111_v44  ;;  %v6198_v44 = vld [vmem:[%s7361_s29 + $0x688] ss:$48 sps:$4 sm:$0xff]  }
 0x289   : > { %3933 = vmatpush1.bf16.msra.mxu1 %v6114_v23  ;;  %3852 = vmatprep.subr.bf16.mxu0 %v6119_v24  ;;  %v6203_v23 = vld [vmem:[%s7361_s29 + $0x6e4] ss:$48 sps:$4 sm:$0xff]   ;;  %v6206_v24 = vld [vmem:[%s7361_s29 + $0x6ec] ss:$48 sps:$4 sm:$0xff]  }
 0x28a   : > { %3934 = vmatprep.subr.bf16.mxu1 %v6122_v25  ;;  %v6204_v25 = vld [vmem:[%s7361_s29 + $0x6e8] ss:$48 sps:$4 sm:$0xff]  }
 0x28c   : > { %3853 = vmatpush1.bf16.msra.mxu0 %v6117_v26  ;;  %v6209_v26 = vld [vmem:[%s7361_s29 + $0x744] ss:$48 sps:$4 sm:$0xff]  }
 0x28d   : > { %3935 = vmatpush1.bf16.msra.mxu1 %v6120_v27  ;;  %3854 = vmatprep.subr.bf16.mxu0 %v6125_v28  ;;  %v6212_v27 = vld [vmem:[%s7361_s29 + $0x74c] ss:$48 sps:$4 sm:$0xff]   ;;  %v6210_v28 = vld [vmem:[%s7361_s29 + $0x748] ss:$48 sps:$4 sm:$0xff]  }
 0x28e   : > { %3936 = vmatprep.subr.bf16.mxu1 %v6128_v30  ;;  %v6215_v30 = vld [vmem:[%s7361_s29 + $0x7a4] ss:$48 sps:$4 sm:$0xff]  }
 0x290   : > { %3855 = vmatpush1.bf16.msra.mxu0 %v6123_v31  ;;  %v6218_v31 = vld [vmem:[%s7361_s29 + $0x7ac] ss:$48 sps:$4 sm:$0xff]  }
 0x291   : > { %3937 = vmatpush1.bf16.msra.mxu1 %v6126_v32  ;;  %3856 = vmatprep.subr.bf16.mxu0 %v6131_v34  ;;  %v6213_v32 = vld [vmem:[%s7361_s29 + $0x7a0] ss:$48 sps:$4 sm:$0xff]   ;;  %v6216_v34 = vld [vmem:[%s7361_s29 + $0x7a8] ss:$48 sps:$4 sm:$0xff]  }
 0x292   : > { %3938 = vmatprep.subr.bf16.mxu1 %v6134_v35  ;;  %v6221_v35 = vld [vmem:[%s7361_s29 + $0x804] ss:$48 sps:$4 sm:$0xff]  }
 0x294   : > { %3857 = vmatpush1.bf16.msra.mxu0 %v6129_v36  ;;  %v6224_v36 = vld [vmem:[%s7361_s29 + $0x80c] ss:$48 sps:$4 sm:$0xff]  }
 0x295   : > { %3939 = vmatpush1.bf16.msra.mxu1 %v6132_v37  ;;  %3858 = vmatprep.subr.bf16.mxu0 %v6137_v38  ;;  %v6219_v37 = vld [vmem:[%s7361_s29 + $0x800] ss:$48 sps:$4 sm:$0xff]   ;;  %v6222_v38 = vld [vmem:[%s7361_s29 + $0x808] ss:$48 sps:$4 sm:$0xff]  }
 0x296   : > { %3940 = vmatprep.subr.bf16.mxu1 %v6140_v18  ;;  %v6227_v18 = vld [vmem:[%s7361_s29 + $0x864] ss:$48 sps:$4 sm:$0xff]  }
 0x298   : > { %3859 = vmatpush1.bf16.msra.mxu0 %v6135_v39 }
 0x299   : > { %3941 = vmatpush1.bf16.msra.mxu1 %v6138_v40  ;;  %3860 = vmatprep.subr.bf16.mxu0 %v6143_v41  ;;  %v6230_v41 = vld [vmem:[%s7361_s29 + $0x86c] ss:$48 sps:$4 sm:$0xff]  }
 0x29a   : > { %3942 = vmatprep.subr.bf16.mxu1 %v6146_v42 }
 0x29c   : > { %3861 = vmatpush1.bf16.msra.mxu0 %v6141_v43 }
 0x29d   : > { %3943 = vmatpush1.bf16.msra.mxu1 %v6144_v19  ;;  %3862 = vmatprep.subr.bf16.mxu0 %v6149_v46 }
 0x29e   : > { %3944 = vmatprep.subr.bf16.mxu1 %v6152_v47 }
 0x2a0   : > { %3863 = vmatpush1.bf16.msra.mxu0 %v6147_v49  ;;  %v6225_v49 = vld [vmem:[%s7361_s29 + $0x860] ss:$48 sps:$4 sm:$0xff]  }
 0x2a1   : > { %3945 = vmatpush1.bf16.msra.mxu1 %v6150_v50  ;;  %3864 = vmatprep.subr.bf16.mxu0 %v6155_v51 }
 0x2a2   : > { %3946 = vmatprep.subr.bf16.mxu1 %v6158_v29  ;;  %v6228_v29 = vld [vmem:[%s7361_s29 + $0x868] ss:$48 sps:$4 sm:$0xff]  }
 0x2a4   : > { %3865 = vmatpush1.bf16.msra.mxu0 %v6153_v52  ;;  %v6233_v52 = vld [vmem:[%s7361_s29 + $0x8c4] ss:$48 sps:$4 sm:$0xff]  }
 0x2a5   : > { %3947 = vmatpush1.bf16.msra.mxu1 %v6156_v54  ;;  %3866 = vmatprep.subr.bf16.mxu0 %v6161_v55  ;;  %v6236_v54 = vld [vmem:[%s7361_s29 + $0x8cc] ss:$48 sps:$4 sm:$0xff]   ;;  %v6231_v55 = vld [vmem:[%s7361_s29 + $0x8c0] ss:$48 sps:$4 sm:$0xff]  }
 0x2a6   : > { %3948 = vmatprep.subr.bf16.mxu1 %v6164_v56  ;;  %v6234_v56 = vld [vmem:[%s7361_s29 + $0x8c8] ss:$48 sps:$4 sm:$0xff]  }
 0x2a8   : > { %3867 = vmatpush1.bf16.msra.mxu0 %v6159_v57  ;;  %v6239_v57 = vld [vmem:[%s7361_s29 + $0x924] ss:$48 sps:$4 sm:$0xff]  }
 0x2a9   : > { %3949 = vmatpush1.bf16.msra.mxu1 %v6162_v58  ;;  %3868 = vmatprep.subr.bf16.mxu0 %v6167_v59  ;;  %v6242_v58 = vld [vmem:[%s7361_s29 + $0x92c] ss:$48 sps:$4 sm:$0xff]   ;;  %v6237_v59 = vld [vmem:[%s7361_s29 + $0x920] ss:$48 sps:$4 sm:$0xff]  }
 0x2aa   : > { %3950 = vmatprep.subr.bf16.mxu1 %v6170_v60  ;;  %v6240_v60 = vld [vmem:[%s7361_s29 + $0x928] ss:$48 sps:$4 sm:$0xff]  }
 0x2ac   : > { %3869 = vmatpush1.bf16.msra.mxu0 %v6165_v61  ;;  %v6245_v61 = vld [vmem:[%s7361_s29 + $0x984] ss:$48 sps:$4 sm:$0xff]  }
 0x2ad   : > { %3951 = vmatpush1.bf16.msra.mxu1 %v6168_v62  ;;  %3870 = vmatprep.subr.bf16.mxu0 %v6173_v63  ;;  %v6248_v62 = vld [vmem:[%s7361_s29 + $0x98c] ss:$48 sps:$4 sm:$0xff]   ;;  %v6243_v63 = vld [vmem:[%s7361_s29 + $0x980] ss:$48 sps:$4 sm:$0xff]  }
 0x2ae   : > { %3952 = vmatprep.subr.bf16.mxu1 %v6176_v0  ;;  %v6246_v0 = vld [vmem:[%s7361_s29 + $0x988] ss:$48 sps:$4 sm:$0xff]  }
 0x2b0   : > { %3871 = vmatpush1.bf16.msra.mxu0 %v6171_v1  ;;  %v6251_v1 = vld [vmem:[%s7361_s29 + $0x9e4] ss:$48 sps:$4 sm:$0xff]  }
 0x2b1   : > { %3953 = vmatpush1.bf16.msra.mxu1 %v6174_v2  ;;  %3872 = vmatprep.subr.bf16.mxu0 %v6179_v3  ;;  %v6254_v2 = vld [vmem:[%s7361_s29 + $0x9ec] ss:$48 sps:$4 sm:$0xff]   ;;  %v6249_v3 = vld [vmem:[%s7361_s29 + $0x9e0] ss:$48 sps:$4 sm:$0xff]  }
 0x2b2   : > { %3954 = vmatprep.subr.bf16.mxu1 %v6182_v4  ;;  %v6252_v4 = vld [vmem:[%s7361_s29 + $0x9e8] ss:$48 sps:$4 sm:$0xff]  }
 0x2b4   : > { %3873 = vmatpush1.bf16.msra.mxu0 %v6177_v5  ;;  %v6257_v5 = vld [vmem:[%s7361_s29 + $0xa44] ss:$48 sps:$4 sm:$0xff]  }
 0x2b5   : > { %3955 = vmatpush1.bf16.msra.mxu1 %v6180_v6  ;;  %3874 = vmatprep.subr.bf16.mxu0 %v6185_v7  ;;  %v6260_v6 = vld [vmem:[%s7361_s29 + $0xa4c] ss:$48 sps:$4 sm:$0xff]   ;;  %v6255_v7 = vld [vmem:[%s7361_s29 + $0xa40] ss:$48 sps:$4 sm:$0xff]  }
 0x2b6   : > { %3956 = vmatprep.subr.bf16.mxu1 %v6188_v8  ;;  %v6258_v8 = vld [vmem:[%s7361_s29 + $0xa48] ss:$48 sps:$4 sm:$0xff]  }
 0x2b8   : > { %3875 = vmatpush1.bf16.msra.mxu0 %v6183_v9  ;;  %v6263_v9 = vld [vmem:[%s7361_s29 + $0xaa4] ss:$48 sps:$4 sm:$0xff]  }
 0x2b9   : > { %3957 = vmatpush1.bf16.msra.mxu1 %v6186_v10  ;;  %3885 = vmatprep.subr.bf16.mxu0 %v6191_v11  ;;  %v6266_v10 = vld [vmem:[%s7361_s29 + $0xaac] ss:$48 sps:$4 sm:$0xff]   ;;  %v6261_v11 = vld [vmem:[%s7361_s29 + $0xaa0] ss:$48 sps:$4 sm:$0xff]  }
 0x2ba   : > { %3967 = vmatprep.subr.bf16.mxu1 %v6194_v12  ;;  %v6264_v12 = vld [vmem:[%s7361_s29 + $0xaa8] ss:$48 sps:$4 sm:$0xff]  }
 0x2bb   : > { %3877 = vmatmul.mubr.bf16.vlgmr.msra.gmra.mrb[12].mxu0 %v7459_v45 }
 0x2bc   : > { %3959 = vmatmul.mubr.bf16.vlgmr.msra.gmra.mrb[12].mxu1 %v7459_v45  ;;  %3886 = vmatpush1.bf16.msra.mxu0 %v6189_v13  ;;  %v6201_v45 = vld [vmem:[%s7361_s29 + $0x6e0] ss:$48 sps:$4 sm:$0xff]   ;;  %v6269_v13 = vld [vmem:[%s7361_s29 + $0xb04] ss:$48 sps:$4 sm:$0xff]  }
 0x2bd   : > { %3917 = vmatprep.mubr.bf16.mxu0 %v7465_v48  ;;  %3968 = vmatpush1.bf16.msra.mxu1 %v6192_v14  ;;  %v6272_v14 = vld [vmem:[%s7361_s29 + $0xb0c] ss:$48 sps:$4 sm:$0xff]  }
 0x2be   : > { %3999 = vmatprep.mubr.bf16.mxu1 %v7465_v48  ;;  %3887 = vmatprep.subr.bf16.mxu0 %v6197_v15  ;;  %v6207_v48 = vld [vmem:[%s7361_s29 + $0x740] ss:$48 sps:$4 sm:$0xff]  }
 0x2bf   : > { %3969 = vmatprep.subr.bf16.mxu1 %v6200_v16  ;;  %v6267_v15 = vld [vmem:[%s7361_s29 + $0xb00] ss:$48 sps:$4 sm:$0xff]   ;;  %v6270_v16 = vld [vmem:[%s7361_s29 + $0xb08] ss:$48 sps:$4 sm:$0xff]  }
 0x2c0   : > { %3888 = vmatpush1.bf16.msra.mxu0 %v6195_v17  ;;  %v6275_v17 = vld [vmem:[%s7361_s29 + $0xb64] ss:$48 sps:$4 sm:$0xff]  }
 0x2c1   : > { %3970 = vmatpush1.bf16.msra.mxu1 %v6198_v44  ;;  %3889 = vmatprep.subr.bf16.mxu0 %v6203_v23  ;;  %v6278_v44 = vld [vmem:[%s7361_s29 + $0xb6c] ss:$48 sps:$4 sm:$0xff]   ;;  %v6273_v23 = vld [vmem:[%s7361_s29 + $0xb60] ss:$48 sps:$4 sm:$0xff]  }
 0x2c2   : > { %3971 = vmatprep.subr.bf16.mxu1 %v6206_v24  ;;  %v6276_v24 = vld [vmem:[%s7361_s29 + $0xb68] ss:$48 sps:$4 sm:$0xff]  }
 0x2c4   : > { %3890 = vmatpush1.bf16.msra.mxu0 %v6201_v45  ;;  %v6281_v45 = vld [vmem:[%s7361_s29 + $0xbc4] ss:$48 sps:$4 sm:$0xff]  }
 0x2c5   : > { %3972 = vmatpush1.bf16.msra.mxu1 %v6204_v25  ;;  %3891 = vmatprep.subr.bf16.mxu0 %v6209_v26  ;;  %v6284_v25 = vld [vmem:[%s7361_s29 + $0xbcc] ss:$48 sps:$4 sm:$0xff]   ;;  %v6279_v26 = vld [vmem:[%s7361_s29 + $0xbc0] ss:$48 sps:$4 sm:$0xff]  }
 0x2c6   : > { %3973 = vmatprep.subr.bf16.mxu1 %v6212_v27  ;;  %v6282_v27 = vld [vmem:[%s7361_s29 + $0xbc8] ss:$48 sps:$4 sm:$0xff]  }
 0x2c8   : > { %3892 = vmatpush1.bf16.msra.mxu0 %v6207_v48  ;;  %v6287_v48 = vld [vmem:[%s8304_s6 + $0x4] ss:$16 sps:$4 sm:$0xff]  }
 0x2c9   : > { %3974 = vmatpush1.bf16.msra.mxu1 %v6210_v28  ;;  %3893 = vmatprep.subr.bf16.mxu0 %v6215_v30  ;;  %v6290_v28 = vld [vmem:[%s8304_s6 + $0xc] ss:$16 sps:$4 sm:$0xff]   ;;  %v6285_v30 = vld [vmem:[%s8304_s6] ss:$16 sps:$4 sm:$0xff]  }
 0x2ca   : > { %3975 = vmatprep.subr.bf16.mxu1 %v6218_v31  ;;  %v6288_v31 = vld [vmem:[%s8304_s6 + $0x8] ss:$16 sps:$4 sm:$0xff]  }
 0x2cc   : > { %3894 = vmatpush1.bf16.msra.mxu0 %v6213_v32  ;;  %v6293_v32 = vld [vmem:[%s8304_s6 + $0x24] ss:$16 sps:$4 sm:$0xff]  }
 0x2cd   : > { %3976 = vmatpush1.bf16.msra.mxu1 %v6216_v34  ;;  %3895 = vmatprep.subr.bf16.mxu0 %v6221_v35  ;;  %v6296_v34 = vld [vmem:[%s8304_s6 + $0x2c] ss:$16 sps:$4 sm:$0xff]   ;;  %v6291_v35 = vld [vmem:[%s8304_s6 + $0x20] ss:$16 sps:$4 sm:$0xff]  }
 0x2ce   : > { %v7768_v39 = vpop.f32.mrb[4].mxu0  ;;  %v7770_v40 = vpop.f32.mrb[4].mxu1  ;;  %3977 = vmatprep.subr.bf16.mxu1 %v6224_v36  ;;  %v6294_v36 = vld [vmem:[%s8304_s6 + $0x28] ss:$16 sps:$4 sm:$0xff]  }
 0x2cf   : > { %v7775_v42 = vsel %vm4008_vm3, %v7770_v40, 0.0  ;;  %v7777_v43 = vpop.f32.mrb[5].mxu0  ;;  %v7779_v19 = vpop.f32.mrb[5].mxu1 }
 0x2d0   : > { %v3595_v46 = vpop.f32.mrb[6].mxu0  ;;  %v3677_v47 = vpop.f32.mrb[6].mxu1  ;;  %3896 = vmatpush1.bf16.msra.mxu0 %v6219_v37  ;;  %v6299_v37 = vld [vmem:[%s8304_s6 + $0x44] ss:$16 sps:$4 sm:$0xff]  }
 0x2d1   : > { %3978 = vmatpush1.bf16.msra.mxu1 %v6222_v38  ;;  %v3596_v50 = vpop.f32.mrb[7].mxu0  ;;  %v3678_v51 = vpop.f32.mrb[7].mxu1  ;;  %3897 = vmatprep.subr.bf16.mxu0 %v6227_v18  ;;  %v6297_v38 = vld [vmem:[%s8304_s6 + $0x40] ss:$16 sps:$4 sm:$0xff]   ;;  %v6300_v18 = vld [vmem:[%s8304_s6 + $0x48] ss:$16 sps:$4 sm:$0xff]  }
 0x2d2   : > { %3979 = vmatprep.subr.bf16.mxu1 %v6230_v41  ;;  %v6305_v41 = vld [vmem:[%s8304_s6 + $0x64] ss:$16 sps:$4 sm:$0xff]   ;;  %v6308_v46 = vld [vmem:[%s8304_s6 + $0x6c] ss:$16 sps:$4 sm:$0xff]   ;;  %v6303_v47 = vld [vmem:[%s8304_s6 + $0x60] ss:$16 sps:$4 sm:$0xff]  }
 0x2d3   : > { %v6311_v50 = vld [vmem:[%s8304_s6 + $0x84] ss:$16 sps:$4 sm:$0xff]   ;;  %v6314_v51 = vld [vmem:[%s8304_s6 + $0x8c] ss:$16 sps:$4 sm:$0xff]  }
 0x2d4   : > { %3898 = vmatpush1.bf16.msra.mxu0 %v6225_v49  ;;  %v6306_v49 = vld [vmem:[%s8304_s6 + $0x68] ss:$16 sps:$4 sm:$0xff]  }
 0x2d5   : > { %3980 = vmatpush1.bf16.msra.mxu1 %v6228_v29  ;;  %3899 = vmatprep.subr.bf16.mxu0 %v6233_v52  ;;  %v6309_v29 = vld [vmem:[%s8304_s6 + $0x80] ss:$16 sps:$4 sm:$0xff]   ;;  %v6312_v52 = vld [vmem:[%s8304_s6 + $0x88] ss:$16 sps:$4 sm:$0xff]  }
 0x2d6   : > { %3981 = vmatprep.subr.bf16.mxu1 %v6236_v54  ;;  %v6317_v54 = vld [vmem:[%s8304_s6 + $0xa4] ss:$16 sps:$4 sm:$0xff]  }
 0x2d8   : > { %3900 = vmatpush1.bf16.msra.mxu0 %v6231_v55  ;;  %v6320_v55 = vld [vmem:[%s8304_s6 + $0xac] ss:$16 sps:$4 sm:$0xff]  }
 0x2d9   : > { %3982 = vmatpush1.bf16.msra.mxu1 %v6234_v56  ;;  %3901 = vmatprep.subr.bf16.mxu0 %v6239_v57  ;;  %v6315_v56 = vld [vmem:[%s8304_s6 + $0xa0] ss:$16 sps:$4 sm:$0xff]   ;;  %v6318_v57 = vld [vmem:[%s8304_s6 + $0xa8] ss:$16 sps:$4 sm:$0xff]  }
 0x2da   : > { %3983 = vmatprep.subr.bf16.mxu1 %v6242_v58  ;;  %v6323_v58 = vld [vmem:[%s8304_s6 + $0xc4] ss:$16 sps:$4 sm:$0xff]  }
 0x2dc   : > { %3902 = vmatpush1.bf16.msra.mxu0 %v6237_v59  ;;  %v6326_v59 = vld [vmem:[%s8304_s6 + $0xcc] ss:$16 sps:$4 sm:$0xff]  }
 0x2dd   : > { %3984 = vmatpush1.bf16.msra.mxu1 %v6240_v60  ;;  %3903 = vmatprep.subr.bf16.mxu0 %v6245_v61  ;;  %v6321_v60 = vld [vmem:[%s8304_s6 + $0xc0] ss:$16 sps:$4 sm:$0xff]   ;;  %v6324_v61 = vld [vmem:[%s8304_s6 + $0xc8] ss:$16 sps:$4 sm:$0xff]  }
 0x2de   : > { %3985 = vmatprep.subr.bf16.mxu1 %v6248_v62  ;;  %v6329_v62 = vld [vmem:[%s8304_s6 + $0xe4] ss:$16 sps:$4 sm:$0xff]  }
 0x2e0   : > { %3904 = vmatpush1.bf16.msra.mxu0 %v6243_v63  ;;  %v6332_v63 = vld [vmem:[%s8304_s6 + $0xec] ss:$16 sps:$4 sm:$0xff]  }
 0x2e1   : > { %3986 = vmatpush1.bf16.msra.mxu1 %v6246_v0  ;;  %3905 = vmatprep.subr.bf16.mxu0 %v6251_v1  ;;  %v6327_v0 = vld [vmem:[%s8304_s6 + $0xe0] ss:$16 sps:$4 sm:$0xff]   ;;  %v6330_v1 = vld [vmem:[%s8304_s6 + $0xe8] ss:$16 sps:$4 sm:$0xff]  }
 0x2e2   : > { %3987 = vmatprep.subr.bf16.mxu1 %v6254_v2  ;;  %v6335_v2 = vld [vmem:[%s8304_s6 + $0x104] ss:$16 sps:$4 sm:$0xff]  }
 0x2e4   : > { %3906 = vmatpush1.bf16.msra.mxu0 %v6249_v3  ;;  %v6338_v3 = vld [vmem:[%s8304_s6 + $0x10c] ss:$16 sps:$4 sm:$0xff]  }
 0x2e5   : > { %3988 = vmatpush1.bf16.msra.mxu1 %v6252_v4  ;;  %3907 = vmatprep.subr.bf16.mxu0 %v6257_v5  ;;  %v6333_v4 = vld [vmem:[%s8304_s6 + $0x100] ss:$16 sps:$4 sm:$0xff]   ;;  %v6336_v5 = vld [vmem:[%s8304_s6 + $0x108] ss:$16 sps:$4 sm:$0xff]  }
 0x2e6   : > { %3989 = vmatprep.subr.bf16.mxu1 %v6260_v6  ;;  %v6341_v6 = vld [vmem:[%s8304_s6 + $0x124] ss:$16 sps:$4 sm:$0xff]  }
 0x2e8   : > { %3908 = vmatpush1.bf16.msra.mxu0 %v6255_v7  ;;  %v6344_v7 = vld [vmem:[%s8304_s6 + $0x12c] ss:$16 sps:$4 sm:$0xff]  }
 0x2e9   : > { %3990 = vmatpush1.bf16.msra.mxu1 %v6258_v8  ;;  %3909 = vmatprep.subr.bf16.mxu0 %v6263_v9  ;;  %v6339_v8 = vld [vmem:[%s8304_s6 + $0x120] ss:$16 sps:$4 sm:$0xff]   ;;  %v6342_v9 = vld [vmem:[%s8304_s6 + $0x128] ss:$16 sps:$4 sm:$0xff]  }
 0x2ea   : > { %3991 = vmatprep.subr.bf16.mxu1 %v6266_v10  ;;  %v6347_v10 = vld [vmem:[%s8304_s6 + $0x144] ss:$16 sps:$4 sm:$0xff]  }
 0x2ec   : > { %3910 = vmatpush1.bf16.msra.mxu0 %v6261_v11  ;;  %v6350_v11 = vld [vmem:[%s8304_s6 + $0x14c] ss:$16 sps:$4 sm:$0xff]  }
 0x2ed   : > { %3992 = vmatpush1.bf16.msra.mxu1 %v6264_v12  ;;  %3911 = vmatprep.subr.bf16.mxu0 %v6269_v13  ;;  %v6345_v12 = vld [vmem:[%s8304_s6 + $0x140] ss:$16 sps:$4 sm:$0xff]   ;;  %v6348_v13 = vld [vmem:[%s8304_s6 + $0x148] ss:$16 sps:$4 sm:$0xff]  }
 0x2ee   : > { %3993 = vmatprep.subr.bf16.mxu1 %v6272_v14  ;;  %v6353_v14 = vld [vmem:[%s8304_s6 + $0x164] ss:$16 sps:$4 sm:$0xff]  }
 0x2f0   : > { %3912 = vmatpush1.bf16.msra.mxu0 %v6267_v15  ;;  %v6356_v15 = vld [vmem:[%s8304_s6 + $0x16c] ss:$16 sps:$4 sm:$0xff]  }
 0x2f1   : > { %3994 = vmatpush1.bf16.msra.mxu1 %v6270_v16  ;;  %3913 = vmatprep.subr.bf16.mxu0 %v6275_v17  ;;  %v6351_v16 = vld [vmem:[%s8304_s6 + $0x160] ss:$16 sps:$4 sm:$0xff]   ;;  %v6354_v17 = vld [vmem:[%s8304_s6 + $0x168] ss:$16 sps:$4 sm:$0xff]  }
 0x2f2   : > { %3995 = vmatprep.subr.bf16.mxu1 %v6278_v44 }
 0x2f4   : > { %3914 = vmatpush1.bf16.msra.mxu0 %v6273_v23  ;;  %v6359_v23 = vld [vmem:[%s8304_s6 + $0x184] ss:$16 sps:$4 sm:$0xff]  }
 0x2f5   : > { %3996 = vmatpush1.bf16.msra.mxu1 %v6276_v24  ;;  %3915 = vmatprep.subr.bf16.mxu0 %v6281_v45  ;;  %v6362_v24 = vld [vmem:[%s8304_s6 + $0x18c] ss:$16 sps:$4 sm:$0xff]  }
 0x2f6   : > { %3997 = vmatprep.subr.bf16.mxu1 %v6284_v25 }
 0x2f8   : > { %3916 = vmatpush1.bf16.msra.mxu0 %v6279_v26 }
 0x2f9   : > { %3998 = vmatpush1.bf16.msra.mxu1 %v6282_v27  ;;  %4886 = vmatprep.subr.bf16.mxu0 %v6287_v48  ;;  %v4009_v27 = vsel %vm4008_vm3, %v7768_v39, 0.0 }
 0x2fa   : > { %4968 = vmatprep.subr.bf16.mxu1 %v6290_v28 }
 0x2fb   : > { %3918 = vmatmul.mubr.bf16.vlgmr.msra.gmra.mrb[12].mxu0 %v7535_v53 }
 0x2fc   : > { %4000 = vmatmul.mubr.bf16.vlgmr.msra.gmra.mrb[12].mxu1 %v7535_v53  ;;  %4887 = vmatpush1.bf16.msra.mxu0 %v6285_v30  ;;  %v6302_v53 = vld [vmem:[%s8304_s6 + $0x4c] ss:$16 sps:$4 sm:$0xff]  }
 0x2fd   : > { %4969 = vmatpush1.bf16.msra.mxu1 %v6288_v31  ;;  %4888 = vmatprep.subr.bf16.mxu0 %v6293_v32  ;;  %v4025_v32 = vsel %vm4008_vm3, %v7777_v43, 0.0 }
 0x2fe   : > { %4970 = vmatprep.subr.bf16.mxu1 %v6296_v34 }
 0x300   : > { %4889 = vmatpush1.bf16.msra.mxu0 %v6291_v35 }
 0x301   : > { %4971 = vmatpush1.bf16.msra.mxu1 %v6294_v36  ;;  %4890 = vmatprep.subr.bf16.mxu0 %v6299_v37 }
 0x302   : > { %4972 = vmatprep.subr.bf16.mxu1 %v6302_v53  ;;  %v4047_v53 = vsel %vm4008_vm3, %v7779_v19, 0.0 }
 0x304   : > { %4891 = vmatpush1.bf16.msra.mxu0 %v6297_v38 }
 0x305   : > { %4973 = vmatpush1.bf16.msra.mxu1 %v6300_v18  ;;  %4892 = vmatprep.subr.bf16.mxu0 %v6305_v41 }
 0x306   : > { %4974 = vmatprep.subr.bf16.mxu1 %v6308_v46  ;;  %v6357_v46 = vld [vmem:[%s8304_s6 + $0x180] ss:$16 sps:$4 sm:$0xff]  }
 0x308   : > { %4893 = vmatpush1.bf16.msra.mxu0 %v6303_v47  ;;  %v6360_v47 = vld [vmem:[%s8304_s6 + $0x188] ss:$16 sps:$4 sm:$0xff]  }
 0x309   : > { %4975 = vmatpush1.bf16.msra.mxu1 %v6306_v49  ;;  %4894 = vmatprep.subr.bf16.mxu0 %v6311_v50  ;;  %v6363_v50 = vld [vmem:[%s8304_s6 + $0x1a0] ss:$16 sps:$4 sm:$0xff]  }
 0x30a   : > { %4976 = vmatprep.subr.bf16.mxu1 %v6314_v51  ;;  %v6366_v51 = vld [vmem:[%s8304_s6 + $0x1a8] ss:$16 sps:$4 sm:$0xff]  }
 0x30c   : > { %4895 = vmatpush1.bf16.msra.mxu0 %v6309_v29  ;;  %v6368_v29 = vld [vmem:[%s8304_s6 + $0x1ac] ss:$16 sps:$4 sm:$0xff]  }
 0x30d   : > { %4977 = vmatpush1.bf16.msra.mxu1 %v6312_v52  ;;  %4896 = vmatprep.subr.bf16.mxu0 %v6317_v54  ;;  %v6371_v52 = vld [vmem:[%s8304_s6 + $0x1c4] ss:$16 sps:$4 sm:$0xff]   ;;  %v6374_v54 = vld [vmem:[%s8304_s6 + $0x1cc] ss:$16 sps:$4 sm:$0xff]  }
 0x30e   : > { %4978 = vmatprep.subr.bf16.mxu1 %v6320_v55  ;;  %v6369_v55 = vld [vmem:[%s8304_s6 + $0x1c0] ss:$16 sps:$4 sm:$0xff]  }
 0x310   : > { %4897 = vmatpush1.bf16.msra.mxu0 %v6315_v56  ;;  %v6372_v56 = vld [vmem:[%s8304_s6 + $0x1c8] ss:$16 sps:$4 sm:$0xff]  }
 0x311   : > { %4979 = vmatpush1.bf16.msra.mxu1 %v6318_v57  ;;  %4898 = vmatprep.subr.bf16.mxu0 %v6323_v58  ;;  %v6377_v57 = vld [vmem:[%s8304_s6 + $0x1e4] ss:$16 sps:$4 sm:$0xff]   ;;  %v6380_v58 = vld [vmem:[%s8304_s6 + $0x1ec] ss:$16 sps:$4 sm:$0xff]  }
 0x312   : > { %4980 = vmatprep.subr.bf16.mxu1 %v6326_v59  ;;  %v6375_v59 = vld [vmem:[%s8304_s6 + $0x1e0] ss:$16 sps:$4 sm:$0xff]  }
 0x314   : > { %4899 = vmatpush1.bf16.msra.mxu0 %v6321_v60  ;;  %v6378_v60 = vld [vmem:[%s8304_s6 + $0x1e8] ss:$16 sps:$4 sm:$0xff]  }
 0x315   : > { %4981 = vmatpush1.bf16.msra.mxu1 %v6324_v61  ;;  %4900 = vmatprep.subr.bf16.mxu0 %v6329_v62  ;;  %v6383_v61 = vld [vmem:[%s8304_s6 + $0x204] ss:$16 sps:$4 sm:$0xff]   ;;  %v6386_v62 = vld [vmem:[%s8304_s6 + $0x20c] ss:$16 sps:$4 sm:$0xff]  }
 0x316   : > { %4982 = vmatprep.subr.bf16.mxu1 %v6332_v63  ;;  %v4016_v63 = vrot.slane %v7768_v39, 6  ;;  %v4084_v39 = vld [vmem:[%s8303_s5] sm:$0xf] }
 0x318   : > { %4901 = vmatpush1.bf16.msra.mxu0 %v6327_v0  ;;  %v4041_v0 = vrot.slane %v7770_v40, 6 }
 0x319   : > { %4983 = vmatpush1.bf16.msra.mxu1 %v6330_v1  ;;  %4902 = vmatprep.subr.bf16.mxu0 %v6335_v2  ;;  %v4030_v1 = vrot.slane %v7777_v43, 6  ;;  %v4052_v2 = vrot.slane %v7779_v19, 6 }
 0x31a   : > { %4984 = vmatprep.subr.bf16.mxu1 %v6338_v3  ;;  %v4058_v3 = vld [vmem:[%s8302_s4] sm:$0xf] }
 0x31b   : > { %v4063_v19 = vrot.slane %v4058_v3, %v7437_v20 }
 0x31c   : > { %4903 = vmatpush1.bf16.msra.mxu0 %v6333_v4 }
 0x31d   : > { %4985 = vmatpush1.bf16.msra.mxu1 %v6336_v5  ;;  %4904 = vmatprep.subr.bf16.mxu0 %v6341_v6 }
 0x31e   : > { %4986 = vmatprep.subr.bf16.mxu1 %v6344_v7  ;;  %v4071_v7 = vrot.slane %v4058_v3, %v7514_v33 }
 0x320   : > { %4905 = vmatpush1.bf16.msra.mxu0 %v6339_v8  ;;  %v4067_v8 = vrot.slane %v4058_v3, %v7440_v21 }
 0x321   : > { %4987 = vmatpush1.bf16.msra.mxu1 %v6342_v9  ;;  %4906 = vmatprep.subr.bf16.mxu0 %v6347_v10  ;;  %v4075_v9 = vrot.slane %v4058_v3, %v7443_v22  ;;  %v6387_v3 = vld [vmem:[%s8304_s6 + $0x220] ss:$16 sps:$4 sm:$0xff]  }
 0x322   : > { %4988 = vmatprep.subr.bf16.mxu1 %v6350_v11 }
 0x324   : > { %4907 = vmatpush1.bf16.msra.mxu0 %v6345_v12 }
 0x325   : > { %4989 = vmatpush1.bf16.msra.mxu1 %v6348_v13  ;;  %4908 = vmatprep.subr.bf16.mxu0 %v6353_v14  ;;  %v4093_v13 = vrot.slane %v4084_v39, %v7440_v21  ;;  %v4089_v14 = vrot.slane %v4084_v39, %v7437_v20 }
 0x326   : > { %4990 = vmatprep.subr.bf16.mxu1 %v6356_v15  ;;  %v4101_v15 = vrot.slane %v4084_v39, %v7443_v22 }
 0x328   : > { %4909 = vmatpush1.bf16.msra.mxu0 %v6351_v16 }
 0x329   : > { %4991 = vmatpush1.bf16.msra.mxu1 %v6354_v17  ;;  %4910 = vmatprep.subr.bf16.mxu0 %v6359_v23 }
 0x32a   : > { %4992 = vmatprep.subr.bf16.mxu1 %v6362_v24 }
 0x32c   : > { %4911 = vmatpush1.bf16.msra.mxu0 %v6357_v46 }
 0x32d   : > { %4993 = vmatpush1.bf16.msra.mxu1 %v6360_v47 }
 0x32e   : > { %4994 = vmatprep.subr.bf16.mxu1 %v6368_v29 }
 0x331   : > { %4995 = vmatpush1.bf16.msra.mxu1 %v6366_v51 }
 0x332   : > { %4996 = vmatprep.subr.bf16.mxu1 %v6374_v54 }
 0x335   : > { %4997 = vmatpush1.bf16.msra.mxu1 %v6372_v56 }
 0x336   : > { %4998 = vmatprep.subr.bf16.mxu1 %v6380_v58 }
 0x339   : > { %4999 = vmatpush1.bf16.msra.mxu1 %v6378_v60 }
 0x33a   : > { %5009 = vmatprep.subr.bf16.mxu1 %v6386_v62  ;;  %v6384_v62 = vld [vmem:[%s8304_s6 + $0x208] ss:$16 sps:$4 sm:$0xff]  }
 0x34e   : > { %v7965_v44 = vpop.f32.mrb[8].mxu0 }
 0x34f   : > { %v4010_v45 = vrot.slane %v7965_v44, 7  ;;  %v7974_v25 = vpop.f32.mrb[8].mxu1  ;;  %v7976_v26 = vpop.f32.mrb[9].mxu0  ;;  %v4019_v4 = vrot.slane %v7965_v44, 5 }
 0x350   : > { %v4037_v48 = vrot.slane %v7974_v25, 7  ;;  %v4026_v28 = vrot.slane %v7976_v26, 7  ;;  %v7982_v30 = vpop.f32.mrb[9].mxu1  ;;  %v3759_v31 = vpop.f32.mrb[10].mxu0  ;;  %v4043_v5 = vrot.slane %v7974_v25, 5  ;;  %v4032_v6 = vrot.slane %v7976_v26, 5 }
 0x351   : > { %v7987_v34 = vsel %vm4011_vm4, %v4010_v45, %v4009_v27  ;;  %v4048_v35 = vrot.slane %v7982_v30, 7  ;;  %v3841_v36 = vpop.f32.mrb[10].mxu1  ;;  %v3760_v37 = vpop.f32.mrb[11].mxu0  ;;  %v4054_v40 = vrot.slane %v7982_v30, 5  ;;  %v4097_v45 = vrot.slane %v4084_v39, %v7514_v33  ;;  %v6393_v39 = vld [vmem:[%s8304_s6 + $0x240] ss:$16 sps:$4 sm:$0xff]  }
 0x352   : > { %v7994_v38 = vsel %vm4011_vm4, %v4037_v48, %v7775_v42  ;;  %v7997_v18 = vsel %vm4011_vm4, %v4026_v28, %v4025_v32  ;;  %v3842_v41 = vpop.f32.mrb[11].mxu1  ;;  %v6365_v42 = vld [vmem:[%s8304_s6 + $0x1a4] ss:$16 sps:$4 sm:$0xff]  }
 0x353   : > { %v8006_v49 = vsel %vm4011_vm4, %v4048_v35, %v4047_v53  ;;  %4912 = vmatprep.subr.bf16.mxu0 %v6365_v42 }
 0x354   : > { %4913 = vmatpush1.bf16.msra.mxu0 %v6363_v50 }
 0x355   : > { %4914 = vmatprep.subr.bf16.mxu0 %v6371_v52 }
 0x358   : > { %4915 = vmatpush1.bf16.msra.mxu0 %v6369_v55 }
 0x359   : > { %4916 = vmatprep.subr.bf16.mxu0 %v6377_v57 }
 0x35c   : > { %4917 = vmatpush1.bf16.msra.mxu0 %v6375_v59 }
 0x35d   : > { %4927 = vmatprep.subr.bf16.mxu0 %v6383_v61  ;;  %v6381_v61 = vld [vmem:[%s8304_s6 + $0x200] ss:$16 sps:$4 sm:$0xff]  }
 0x3ce   : > { %v3919_v43 = vpop.f32.mrb[12].mxu0 }
 0x3cf   : > { %v4013_v10 = vrot.slane %v3919_v43, 6  ;;  %v4001_v11 = vpop.f32.mrb[12].mxu1  ;;  %v3921_v12 = vpop.f32.mrb[13].mxu0  ;;  %v4022_v16 = vrot.slane %v3919_v43, 4  ;;  %v6401_v43 = vld [vmem:[%s8304_s6 + $0x264] ss:$16 sps:$4 sm:$0xff]  }
 0x3d0   : > { %v4039_v17 = vrot.slane %v4001_v11, 6  ;;  %v4028_v44 = vrot.slane %v3921_v12, 6  ;;  %v4003_v23 = vpop.f32.mrb[13].mxu1  ;;  %v3923_v24 = vpop.f32.mrb[14].mxu0  ;;  %v4045_v26 = vrot.slane %v4001_v11, 4  ;;  %v4034_v27 = vrot.slane %v3921_v12, 4 }
 0x3d1   : > { %v4015_v25 = vsel %vm4014_vm5, %v4013_v10, %v7987_v34  ;;  %v4050_v48 = vrot.slane %v4003_v23, 6  ;;  %v4005_v28 = vpop.f32.mrb[14].mxu1  ;;  %v3924_v30 = vpop.f32.mrb[15].mxu0  ;;  %v4056_v31 = vrot.slane %v4003_v23, 4  ;;  %v6410_v10 = vld [vmem:[%s8304_s6 + $0x28c] ss:$16 sps:$4 sm:$0xff]  }
 0x3d2   : > { %v4018_v21 = vsel %vm4017_vm6, %v4016_v63, %v4015_v25  ;;  %v4040_v20 = vsel %vm4014_vm5, %v4039_v17, %v7994_v38  ;;  %v4029_v22 = vsel %vm4014_vm5, %v4028_v44, %v7997_v18  ;;  %v4006_v32 = vpop.f32.mrb[15].mxu1  ;;  %v6405_v11 = vld [vmem:[%s8304_s6 + $0x280] ss:$16 sps:$4 sm:$0xff]   ;;  %v6408_v12 = vld [vmem:[%s8304_s6 + $0x288] ss:$16 sps:$4 sm:$0xff]  }
 0x3d3   : > { %v4021_v33 = vsel %vm4020_vm7, %v4019_v4, %v4018_v21  ;;  %v4042_v35 = vsel %vm4017_vm6, %v4041_v0, %v4040_v20  ;;  %v4031_v34 = vsel %vm4017_vm6, %v4030_v1, %v4029_v22  ;;  %v4051_v36 = vsel %vm4014_vm5, %v4050_v48, %v8006_v49  ;;  %v6389_v0 = vld [vmem:[%s8304_s6 + $0x224] ss:$16 sps:$4 sm:$0xff]   ;;  %v6392_v1 = vld [vmem:[%s8304_s6 + $0x22c] ss:$16 sps:$4 sm:$0xff]   ;;  %v6390_v4 = vld [vmem:[%s8304_s6 + $0x228] ss:$16 sps:$4 sm:$0xff]  }
 0x3d4   : > { %v4024_v37 = vsel %vm4023_vm8, %v4022_v16, %v4021_v33  ;;  %v4044_v53 = vsel %vm4020_vm7, %v4043_v5, %v4042_v35  ;;  %v4033_v38 = vsel %vm4020_vm7, %v4032_v6, %v4031_v34  ;;  %v4053_v41 = vsel %vm4017_vm6, %v4052_v2, %v4051_v36  ;;  %v6395_v5 = vld [vmem:[%s8304_s6 + $0x244] ss:$16 sps:$4 sm:$0xff]   ;;  %v6398_v6 = vld [vmem:[%s8304_s6 + $0x24c] ss:$16 sps:$4 sm:$0xff]   ;;  %v6414_v16 = vld [vmem:[%s8304_s6 + $0x2a8] ss:$16 sps:$4 sm:$0xff]  }
 0x3d5   : > { %v4080_v18 = vmul.f32 %v4063_v19, %v4024_v37  ;;  %v4046_v46 = vsel %vm4023_vm8, %v4045_v26, %v4044_v53  ;;  %v4035_v47 = vsel %vm4023_vm8, %v4034_v27, %v4033_v38  ;;  %v4055_v42 = vsel %vm4020_vm7, %v4054_v40, %v4053_v41  ;;  %v6396_v40 = vld [vmem:[%s8304_s6 + $0x248] ss:$16 sps:$4 sm:$0xff]   ;;  %v6404_v19 = vld [vmem:[%s8304_s6 + $0x26c] ss:$16 sps:$4 sm:$0xff]   ;;  %v6419_v17 = vld [vmem:[%s8304_s6 + $0x2c4] ss:$16 sps:$4 sm:$0xff]  }
 0x3d6   : > { %v4082_v50 = vmul.f32 %v4071_v7, %v4046_v46  ;;  %v4057_v51 = vsel %vm4023_vm8, %v4056_v31, %v4055_v42  ;;  %v4081_v29 = vmul.f32 %v4067_v8, %v4035_v47  ;;  %v6399_v7 = vld [vmem:[%s8304_s6 + $0x260] ss:$16 sps:$4 sm:$0xff]   ;;  %v6402_v8 = vld [vmem:[%s8304_s6 + $0x268] ss:$16 sps:$4 sm:$0xff]   ;;  %v6422_v44 = vld [vmem:[%s8304_s6 + $0x2cc] ss:$16 sps:$4 sm:$0xff]  }
 0x3d7   : > { %v4106_v49 = vadd.f32 %v4089_v14, %v4080_v18  ;;  %v4083_v52 = vmul.f32 %v4075_v9, %v4057_v51  ;;  %v6407_v9 = vld [vmem:[%s8304_s6 + $0x284] ss:$16 sps:$4 sm:$0xff]   ;;  %v6416_v14 = vld [vmem:[%s8304_s6 + $0x2ac] ss:$16 sps:$4 sm:$0xff]   ;;  %v6417_v23 = vld [vmem:[%s8304_s6 + $0x2c0] ss:$16 sps:$4 sm:$0xff]  }
 0x3d8   : > { %v4107_v54 = vadd.f32 %v4093_v13, %v4081_v29  ;;  %v8092_v55 = vadd.f32 %v4097_v45, %v4082_v50  ;;  %v6413_v13 = vld [vmem:[%s8304_s6 + $0x2a4] ss:$16 sps:$4 sm:$0xff]   ;;  %v6420_v24 = vld [vmem:[%s8304_s6 + $0x2c8] ss:$16 sps:$4 sm:$0xff]   ;;  %v6428_v25 = vld [vmem:[%s8304_s6 + $0x2ec] ss:$16 sps:$4 sm:$0xff]  }
 0x3d9   : > { %v4110_v56 = vmax.f32 %v4106_v49, 0.0  ;;  %v4109_v57 = vadd.f32 %v4101_v15, %v4083_v52  ;;  %v6411_v15 = vld [vmem:[%s8304_s6 + $0x2a0] ss:$16 sps:$4 sm:$0xff]   ;;  %v6425_v45 = vld [vmem:[%s8304_s6 + $0x2e4] ss:$16 sps:$4 sm:$0xff]  }
 0x3da   : > { %v4111_v58 = vmax.f32 %v4107_v54, 0.0  ;;  %v6423_v26 = vld [vmem:[%s8304_s6 + $0x2e0] ss:$16 sps:$4 sm:$0xff]   ;;  %v6426_v27 = vld [vmem:[%s8304_s6 + $0x2e8] ss:$16 sps:$4 sm:$0xff]  }
 0x3db   : > { %v4113_v59 = vmax.f32 %v4109_v57, 0.0  ;;  %v4114_v63 = vpack.c.bf16 %v4110_v56, %v4110_v56  ;;  %v6431_v48 = vld [vmem:[%s8304_s6 + $0x304] ss:$16 sps:$4 sm:$0xff]   ;;  %v6434_v28 = vld [vmem:[%s8304_s6 + $0x30c] ss:$16 sps:$4 sm:$0xff]  }
 0x3dc   : > { %v4115_v60 = vpack.c.bf16 %v4111_v58, %v4111_v58  ;;  %v6429_v30 = vld [vmem:[%s8304_s6 + $0x300] ss:$16 sps:$4 sm:$0xff]   ;;  %v6432_v21 = vld [vmem:[%s8304_s6 + $0x308] ss:$16 sps:$4 sm:$0xff]   ;;  %v6437_v20 = vld [vmem:[%s8304_s6 + $0x324] ss:$16 sps:$4 sm:$0xff]  }
 0x3dd   : > { %v4117_v2 = vpack.c.bf16 %v4113_v59, %v4113_v59  ;;  %v6440_v22 = vld [vmem:[%s8304_s6 + $0x32c] ss:$16 sps:$4 sm:$0xff]   ;;  %v6435_v31 = vld [vmem:[%s8304_s6 + $0x320] ss:$16 sps:$4 sm:$0xff]   ;;  %v6438_v32 = vld [vmem:[%s8304_s6 + $0x328] ss:$16 sps:$4 sm:$0xff]  }
 0x3de   : > { %4918 = vmatprep.mubr.bf16.mxu0 %v4115_v60  ;;  %5000 = vmatprep.mubr.bf16.mxu1 %v4115_v60  ;;  %v6443_v33 = vld [vmem:[%s8304_s6 + $0x344] ss:$16 sps:$4 sm:$0xff]   ;;  %v6446_v35 = vld [vmem:[%s8304_s6 + $0x34c] ss:$16 sps:$4 sm:$0xff]   ;;  %v6441_v34 = vld [vmem:[%s8304_s6 + $0x340] ss:$16 sps:$4 sm:$0xff]  }
 0x3df   : > { %4919 = vmatmul.mubr.bf16.vlgmr.msra.gmra.mrb[16].mxu0 %v4114_v63  ;;  %5001 = vmatmul.mubr.bf16.vlgmr.msra.gmra.mrb[16].mxu1 %v4114_v63  ;;  %v6444_v36 = vld [vmem:[%s8304_s6 + $0x348] ss:$16 sps:$4 sm:$0xff]   ;;  %v6449_v37 = vld [vmem:[%s8304_s6 + $0x364] ss:$16 sps:$4 sm:$0xff]   ;;  %v6452_v53 = vld [vmem:[%s8304_s6 + $0x36c] ss:$16 sps:$4 sm:$0xff]  }
 0x3e0   : > { %4928 = vmatpush1.bf16.msra.mxu0 %v6381_v61  ;;  %5010 = vmatpush1.bf16.msra.mxu1 %v6384_v62  ;;  %v6447_v38 = vld [vmem:[%s8304_s6 + $0x360] ss:$16 sps:$4 sm:$0xff]   ;;  %v6450_v41 = vld [vmem:[%s8304_s6 + $0x368] ss:$16 sps:$4 sm:$0xff]   ;;  %v6455_v18 = vld [vmem:[%s8304_s6 + $0x384] ss:$16 sps:$4 sm:$0xff]  }
 0x3e1   : > { %4959 = vmatprep.mubr.bf16.mxu0 %v4117_v2  ;;  %5041 = vmatprep.mubr.bf16.mxu1 %v4117_v2  ;;  %v6458_v46 = vld [vmem:[%s8304_s6 + $0x38c] ss:$16 sps:$4 sm:$0xff]   ;;  %v6453_v47 = vld [vmem:[%s8304_s6 + $0x380] ss:$16 sps:$4 sm:$0xff]   ;;  %v6456_v42 = vld [vmem:[%s8304_s6 + $0x388] ss:$16 sps:$4 sm:$0xff]  }
 0x3e2   : > { %4929 = vmatprep.subr.bf16.mxu0 %v6389_v0  ;;  %5011 = vmatprep.subr.bf16.mxu1 %v6392_v1  ;;  %v6461_v50 = vld [vmem:[%s8304_s6 + $0x3a4] ss:$16 sps:$4 sm:$0xff]   ;;  %v6464_v51 = vld [vmem:[%s8304_s6 + $0x3ac] ss:$16 sps:$4 sm:$0xff]   ;;  %v6459_v29 = vld [vmem:[%s8304_s6 + $0x3a0] ss:$16 sps:$4 sm:$0xff]  }
 0x3e3   : > { %v6462_v49 = vld [vmem:[%s8304_s6 + $0x3a8] ss:$16 sps:$4 sm:$0xff]   ;;  %v6467_v52 = vld [vmem:[%s8304_s6 + $0x3c4] ss:$16 sps:$4 sm:$0xff]   ;;  %v6470_v54 = vld [vmem:[%s8304_s6 + $0x3cc] ss:$16 sps:$4 sm:$0xff]  }
 0x3e4   : > { %4930 = vmatpush1.bf16.msra.mxu0 %v6387_v3  ;;  %5012 = vmatpush1.bf16.msra.mxu1 %v6390_v4  ;;  %v6465_v56 = vld [vmem:[%s8304_s6 + $0x3c0] ss:$16 sps:$4 sm:$0xff]   ;;  %v6468_v57 = vld [vmem:[%s8304_s6 + $0x3c8] ss:$16 sps:$4 sm:$0xff]   ;;  %v6473_v58 = vld [vmem:[%s8304_s6 + $0x3e4] ss:$16 sps:$4 sm:$0xff]  }
 0x3e5   : > { %4931 = vmatprep.subr.bf16.mxu0 %v6395_v5  ;;  %5013 = vmatprep.subr.bf16.mxu1 %v6398_v6  ;;  %v6476_v59 = vld [vmem:[%s8304_s6 + $0x3ec] ss:$16 sps:$4 sm:$0xff]   ;;  %v6471_v60 = vld [vmem:[%s8304_s6 + $0x3e0] ss:$16 sps:$4 sm:$0xff]   ;;  %v6474_v61 = vld [vmem:[%s8304_s6 + $0x3e8] ss:$16 sps:$4 sm:$0xff]  }
 0x3e6   : > { %v4112_v62 = vmax.f32 %v8092_v55, 0.0 }
 0x3e8   : > { %4932 = vmatpush1.bf16.msra.mxu0 %v6393_v39  ;;  %5014 = vmatpush1.bf16.msra.mxu1 %v6396_v40  ;;  %v4116_v63 = vpack.c.bf16 %v4112_v62, %v4112_v62 }
 0x3e9   : > { %4933 = vmatprep.subr.bf16.mxu0 %v6401_v43  ;;  %5015 = vmatprep.subr.bf16.mxu1 %v6404_v19 }
 0x3ec   : > { %4934 = vmatpush1.bf16.msra.mxu0 %v6399_v7  ;;  %5016 = vmatpush1.bf16.msra.mxu1 %v6402_v8 }
 0x3ed   : > { %4935 = vmatprep.subr.bf16.mxu0 %v6407_v9  ;;  %5017 = vmatprep.subr.bf16.mxu1 %v6410_v10 }
 0x3f0   : > { %4936 = vmatpush1.bf16.msra.mxu0 %v6405_v11  ;;  %5018 = vmatpush1.bf16.msra.mxu1 %v6408_v12 }
 0x3f1   : > { %4937 = vmatprep.subr.bf16.mxu0 %v6413_v13  ;;  %5019 = vmatprep.subr.bf16.mxu1 %v6416_v14 }
 0x3f4   : > { %4938 = vmatpush1.bf16.msra.mxu0 %v6411_v15  ;;  %5020 = vmatpush1.bf16.msra.mxu1 %v6414_v16 }
 0x3f5   : > { %4939 = vmatprep.subr.bf16.mxu0 %v6419_v17  ;;  %5021 = vmatprep.subr.bf16.mxu1 %v6422_v44 }
 0x3f8   : > { %4940 = vmatpush1.bf16.msra.mxu0 %v6417_v23  ;;  %5022 = vmatpush1.bf16.msra.mxu1 %v6420_v24 }
 0x3f9   : > { %4941 = vmatprep.subr.bf16.mxu0 %v6425_v45  ;;  %5023 = vmatprep.subr.bf16.mxu1 %v6428_v25 }
 0x3fc   : > { %4942 = vmatpush1.bf16.msra.mxu0 %v6423_v26  ;;  %5024 = vmatpush1.bf16.msra.mxu1 %v6426_v27 }
 0x3fd   : > { %4943 = vmatprep.subr.bf16.mxu0 %v6431_v48  ;;  %5025 = vmatprep.subr.bf16.mxu1 %v6434_v28 }
 0x400   : > { %4944 = vmatpush1.bf16.msra.mxu0 %v6429_v30  ;;  %5026 = vmatpush1.bf16.msra.mxu1 %v6432_v21 }
 0x401   : > { %4945 = vmatprep.subr.bf16.mxu0 %v6437_v20  ;;  %5027 = vmatprep.subr.bf16.mxu1 %v6440_v22 }
 0x404   : > { %4946 = vmatpush1.bf16.msra.mxu0 %v6435_v31  ;;  %5028 = vmatpush1.bf16.msra.mxu1 %v6438_v32 }
 0x405   : > { %4947 = vmatprep.subr.bf16.mxu0 %v6443_v33  ;;  %5029 = vmatprep.subr.bf16.mxu1 %v6446_v35 }
 0x408   : > { %4948 = vmatpush1.bf16.msra.mxu0 %v6441_v34  ;;  %5030 = vmatpush1.bf16.msra.mxu1 %v6444_v36 }
 0x409   : > { %4949 = vmatprep.subr.bf16.mxu0 %v6449_v37  ;;  %5031 = vmatprep.subr.bf16.mxu1 %v6452_v53 }
 0x40c   : > { %4950 = vmatpush1.bf16.msra.mxu0 %v6447_v38  ;;  %5032 = vmatpush1.bf16.msra.mxu1 %v6450_v41 }
 0x40d   : > { %4951 = vmatprep.subr.bf16.mxu0 %v6455_v18  ;;  %5033 = vmatprep.subr.bf16.mxu1 %v6458_v46 }
 0x410   : > { %4952 = vmatpush1.bf16.msra.mxu0 %v6453_v47  ;;  %5034 = vmatpush1.bf16.msra.mxu1 %v6456_v42 }
 0x411   : > { %4953 = vmatprep.subr.bf16.mxu0 %v6461_v50  ;;  %5035 = vmatprep.subr.bf16.mxu1 %v6464_v51 }
 0x414   : > { %4954 = vmatpush1.bf16.msra.mxu0 %v6459_v29  ;;  %5036 = vmatpush1.bf16.msra.mxu1 %v6462_v49 }
 0x415   : > { %4955 = vmatprep.subr.bf16.mxu0 %v6467_v52  ;;  %5037 = vmatprep.subr.bf16.mxu1 %v6470_v54 }
 0x418   : > { %4956 = vmatpush1.bf16.msra.mxu0 %v6465_v56  ;;  %5038 = vmatpush1.bf16.msra.mxu1 %v6468_v57 }
 0x419   : > { %4957 = vmatprep.subr.bf16.mxu0 %v6473_v58  ;;  %5039 = vmatprep.subr.bf16.mxu1 %v6476_v59 }
 0x41c   : > { %4958 = vmatpush1.bf16.msra.mxu0 %v6471_v60  ;;  %5040 = vmatpush1.bf16.msra.mxu1 %v6474_v61 }
 0x41f   : > { %4960 = vmatmul.mubr.bf16.vlgmr.msra.gmra.mrb[16].mxu0 %v4116_v63  ;;  %5042 = vmatmul.mubr.bf16.vlgmr.msra.gmra.mrb[16].mxu1 %v4116_v63 }
 0x4f2   : > { %v4961_v0 = vpop.f32.mrb[16].mxu0  ;;  %v5043_v1 = vpop.f32.mrb[16].mxu1 }
 0x4f3   : > { %5050 = vst [vmem:[%s1065_s20] sm:$0x3f] %v4961_v0  ;;  %5052 = vst [vmem:[%s1065_s20 + $0x10] sm:$0x3f] %v5043_v1  ;;  %v4963_v2 = vpop.f32.mrb[17].mxu0  ;;  %v5045_v55 = vpop.f32.mrb[17].mxu1 }
 0x4f4   : > { %5051 = vst [vmem:[%s1065_s20 + $0x8] sm:$0x3f] %v4963_v2  ;;  %5053 = vst [vmem:[%s1065_s20 + $0x18] sm:$0x3f] %v5045_v55  ;;  %v4965_v3 = vpop.f32.mrb[18].mxu0  ;;  %v5047_v4 = vpop.f32.mrb[18].mxu1 }
 0x4f5   : > { %v4966_v5 = vpop.f32.mrb[19].mxu0  ;;  %v5048_v6 = vpop.f32.mrb[19].mxu1 }
 0x4f6 PF: > { %p14_p9 = scmp.ge.s32.totalorder %s6560_s28, 5   ;;  %s8306_s24 = smov %s6495_s25 }
 0x4f7   : > { %s8307_s25 = smov %s6569_s8  ;;  %s8308_s26 = smov %s6560_s28 }
 0x4f8   :  { %16 = sbr.rel (!%p14_p9) target bundleno = 2 (0x2), region = 106 }

</bundles_post_ra>
